<compile_context>
chip_gen: v7x
topology: tpu7x:2x2x1
jax: 0.10.0
libtpu: 0.0.40
codegen_flags: <defaults>
</compile_context>

<pallas_src>
import numpy as np

import jax
import jax.numpy as jnp
from jax.experimental import pallas as pl
from jax.experimental.pallas import tpu as pltpu


# ------------------- constant pooling / patch-gather operators ------------------ #

def _avg_pool_matrix(H, W):
    """(H//2*W//2, H*W): left-multiplying a row-major-flattened (H, W) map
    computes 2x2 / stride-2 average pooling."""
    Hh, Wh = H // 2, W // 2
    P = np.zeros((Hh * Wh, H * W), np.float32)
    for i in range(Hh):
        for j in range(Wh):
            for a in range(2):
                for b in range(2):
                    P[i * Wh + j, (2 * i + a) * W + (2 * j + b)] = 0.25
    return P


def _patch_gather_matrices(H, W, k):
    """(k*k, Ho*Wo, H*W): G[di*k+dj] selects, for every kxk valid window
    (stride 1), the input element at spatial offset (di, dj)."""
    Ho, Wo = H - k + 1, W - k + 1
    G = np.zeros((k * k, Ho * Wo, H * W), np.float32)
    for di in range(k):
        for dj in range(k):
            for p in range(Ho):
                for q in range(Wo):
                    G[di * k + dj, p * Wo + q, (p + di) * W + (q + dj)] = 1.0
    return G


# --------------------------------- Pallas kernel -------------------------------- #

def _lenet5_kernel(p1_ref, w1_ref, b1_ref, pool1_ref, g2_ref,
                   w2_ref, b2_ref, w3_ref, b3_ref,
                   f1w_ref, f1b_ref, f2w_ref, f2b_ref, o_ref):
    """Whole LeNet-5 forward for a block of B samples; everything lives in VMEM."""
    f32, bf16 = jnp.float32, jnp.bfloat16
    dot = lambda a, b: jnp.dot(a, b, preferred_element_type=f32)   # bf16 in, f32 acc

    B = p1_ref.shape[0]        # samples per grid step
    KK = g2_ref.shape[0]       # 16 kernel offsets (4x4)
    C2 = w2_ref.shape[0]       # 16 conv2 output channels

    w1 = w1_ref[...]           # (8, 48)     bf16 (6 real rows + 2 zero rows)
    b1 = b1_ref[...]           # (8, 1)      f32
    pool1 = pool1_ref[...]     # (484, 121)  bf16
    w2 = w2_ref[...]           # (16, 128)   bf16 (column = dd*8 + ci)
    b2 = b2_ref[...]           # (16, 1)     f32
    w3 = w3_ref[...]           # (1024, 120) bf16 (pool2 folded in)
    b3 = b3_ref[...]           # (1, 120)    f32

    feats = []
    for n in range(B):
        p1 = p1_ref[n]                                     # (48, 484) bf16
        # conv1 + tanh: channels on sublanes, 484 spatial positions on lanes.
        y1 = jnp.tanh(dot(w1, p1) + b1).astype(bf16)       # (8, 484)
        # avg_pool2d(2,2) as a single matmul.
        pl1 = dot(y1, pool1).astype(bf16)                  # (8, 121)
        # conv2: 16 independent shift-gather matmuls (1 MXU push each),
        # sublane-concat (8-aligned blocks), then ONE weight matmul.
        gat = [dot(pl1, g2_ref[dd]).astype(bf16) for dd in range(KK)]   # 16 x (8, 64)
        stacked = jnp.concatenate(gat, axis=0)             # (128, 64)
        y2 = jnp.tanh(dot(w2, stacked) + b2)               # (16, 64) f32
        # pool2 + conv3 folded into w3: lane-flatten y2 -> (1, 1024), one matmul.
        y2b = y2.astype(bf16)
        y2flat = jnp.concatenate([y2b[c:c + 1, :] for c in range(C2)], axis=1)  # (1, 1024)
        y3 = jnp.tanh(dot(y2flat, w3) + b3).astype(bf16)   # (1, 120)
        feats.append(y3)

    y3all = feats[0] if B == 1 else jnp.concatenate(feats, axis=0)   # (B, 120) bf16
    # fc1 + tanh, fc2 -- batched over all B samples in the block.
    y4 = jnp.tanh(dot(y3all, f1w_ref[...]) + f1b_ref[...])           # (B, 84) f32
    logits = dot(y4.astype(bf16), f2w_ref[...]) + f2b_ref[...]       # (B, 128) f32
    o_ref[...] = logits.astype(o_ref.dtype)


# ----------------------------------- wrapper ------------------------------------ #

def lenet5_forward(params, x, block_b=None):
    """Forward pass of the PyTorch LeNet_5 on NCHW input x (f32)."""
    N, Cin, H, W = x.shape
    k = 4
    Ho1, Wo1 = H - k + 1, W - k + 1                  # conv1 out (22, 22)
    assert Ho1 % 2 == 0 and Wo1 % 2 == 0
    Hp1, Wp1 = Ho1 // 2, Wo1 // 2                    # pool1 out (11, 11)
    Ho2, Wo2 = Hp1 - k + 1, Wp1 - k + 1              # conv2 out (8, 8)
    assert Ho2 % 2 == 0 and Wo2 % 2 == 0
    Hp2, Wp2 = Ho2 // 2, Wo2 // 2                    # pool2 out (4, 4)
    assert (Hp2, Wp2) == (k, k), "conv3 needs a 4x4 map (use 25x25 inputs)"

    f32, bf16 = jnp.float32, jnp.bfloat16
    S1, P1, S2, KK = Ho1 * Wo1, Hp1 * Wp1, Ho2 * Wo2, k * k
    R1 = KK * Cin
    C1, C1p, C2, C3 = 6, 8, 16, 120
    OUTP = 128

    # conv1 im2col, TRANSPOSED: (N, 48, 484) -- patch dim on sublanes, spatial on lanes.
    xh = jnp.transpose(x.astype(f32), (0, 2, 3, 1))                      # NHWC
    slabs = [jnp.transpose(
                 xh[:, di:di + Ho1, dj:dj + Wo1, :].reshape(N, S1, Cin), (0, 2, 1))
             for di in range(k) for dj in range(k)]
    p1 = jnp.concatenate(slabs, axis=1).astype(bf16)                     # (N, 48, 484)

    # Constant pool / gather operators (exact in bf16: entries are 0 / 0.25 / 1).
    pool1T = jnp.asarray(_avg_pool_matrix(Ho1, Wo1).T, bf16)             # (484, 121)
    g2T = jnp.asarray(np.transpose(_patch_gather_matrices(Hp1, Wp1, k),
                                   (0, 2, 1)), bf16)                     # (16, 121, 64)

    # conv1 weights, transposed + zero-padded to 8 output channels.
    w1T = jnp.transpose(params["conv1_w"], (0, 2, 3, 1)).reshape(C1, R1)
    w1T = jnp.pad(w1T, ((0, C1p - C1), (0, 0))).astype(bf16)             # (8, 48)
    b1c = jnp.pad(params["conv1_b"], (0, C1p - C1)).reshape(C1p, 1).astype(f32)

    # conv2 weights: (16, 128), column index dd*8 + ci (padded ci).
    w2 = jnp.transpose(params["conv2_w"], (0, 2, 3, 1)).reshape(C2, KK, C1)
    w2 = jnp.pad(w2, ((0, 0), (0, 0), (0, C1p - C1))).reshape(C2, KK * C1p).astype(bf16)
    b2c = params["conv2_b"].reshape(C2, 1).astype(f32)

    # conv3 with pool2 folded in: (16*64, 120); row index c*64 + p*8 + q.
    w3x = jnp.repeat(jnp.repeat(params["conv3_w"], 2, axis=2), 2, axis=3) * 0.25
    W3 = jnp.transpose(w3x, (1, 2, 3, 0)).reshape(C2 * S2, C3).astype(bf16)
    b3r = params["conv3_b"].reshape(1, C3).astype(f32)

    f1w = params["fc1_w"].T.astype(bf16)                                 # (120, 84)
    f1b = params["fc1_b"].reshape(1, -1).astype(f32)
    f2w = jnp.pad(params["fc2_w"].T, ((0, 0), (0, OUTP - 2))).astype(bf16)   # (84, 128)
    f2b = jnp.pad(params["fc2_b"], (0, OUTP - 2)).reshape(1, OUTP).astype(f32)

    # Batch B samples per grid step to amortize per-step overhead; keep the
    # second-minor output dim either == N (single step) or a multiple of 8.
    if block_b is None:
        block_b = N if N <= 8 else 8
    Npad = ((N + block_b - 1) // block_b) * block_b
    if Npad != N:
        p1 = jnp.pad(p1, ((0, Npad - N), (0, 0), (0, 0)))

    def _resident(a):    # whole-array operand, resident across all grid steps
        zeros = (0,) * a.ndim
        return pl.BlockSpec(a.shape, lambda g, _z=zeros: _z)

    consts = (w1T, b1c, pool1T, g2T, w2, b2c, W3, b3r, f1w, f1b, f2w, f2b)

    out = pl.pallas_call(
        _lenet5_kernel,
        out_shape=jax.ShapeDtypeStruct((Npad, OUTP), f32),
        grid=(Npad // block_b,),
        in_specs=[pl.BlockSpec((block_b, R1, S1), lambda g: (g, 0, 0))]
                 + [_resident(a) for a in consts],
        out_specs=pl.BlockSpec((block_b, OUTP), lambda g: (g, 0)),
        compiler_params=pltpu.CompilerParams(dimension_semantics=("parallel",)),
    )(p1, *consts)
    return out[:N, :2]


# ---------------------------- params / reference check -------------------------- #

def init_params(key):
    # NOTE: He-normal init (PyTorch default is kaiming_uniform); forward math is
    # what matters here.
    ks = jax.random.split(key, 5)

    def he(k, shape, fan_in):
        return jax.random.normal(k, shape, jnp.float32) * (2.0 / fan_in) ** 0.5

    return {
        "conv1_w": he(ks[0], (6, 3, 4, 4), 3 * 4 * 4),
        "conv1_b": jnp.zeros((6,), jnp.float32),
        "conv2_w": he(ks[1], (16, 6, 4, 4), 6 * 4 * 4),
        "conv2_b": jnp.zeros((16,), jnp.float32),
        "conv3_w": he(ks[2], (120, 16, 4, 4), 16 * 4 * 4),
        "conv3_b": jnp.zeros((120,), jnp.float32),
        "fc1_w": he(ks[3], (84, 120), 120),     # PyTorch Linear layout (out, in)
        "fc1_b": jnp.zeros((84,), jnp.float32),
        "fc2_w": he(ks[4], (2, 84), 84),
        "fc2_b": jnp.zeros((2,), jnp.float32),
    }


def _reference_forward(params, x):
    """Plain-JAX (XLA, f32) reference with identical semantics."""
    def conv(v, w, b):
        y = jax.lax.conv_general_dilated(
            v, w, (1, 1), "VALID", dimension_numbers=("NCHW", "OIHW", "NCHW"))
        return jnp.tanh(y + b[None, :, None, None])

    def pool(v):
        n, c, h, w = v.shape
        return v.reshape(n, c, h // 2, 2, w // 2, 2).mean(axis=(3, 5))

    y = pool(conv(x, params["conv1_w"], params["conv1_b"]))
    y = pool(conv(y, params["conv2_w"], params["conv2_b"]))
    y = conv(y, params["conv3_w"], params["conv3_b"])
    y = y.reshape(-1, 120)
    y = jnp.tanh(y @ params["fc1_w"].T + params["fc1_b"])
    return y @ params["fc2_w"].T + params["fc2_b"]


if __name__ == "__main__":
    x = jax.random.normal(jax.random.PRNGKey(0), (2, 3, 25, 25), jnp.float32)
    params = init_params(jax.random.PRNGKey(42))

    fwd = jax.jit(lenet5_forward)
    out = jax.block_until_ready(fwd(params, x))
    assert out.shape == (2, 2), out.shape

    ref = _reference_forward(params, x)
    np.testing.assert_allclose(np.asarray(out), np.asarray(ref), rtol=0.1, atol=0.1)

    print("KERNEL_OK")
</pallas_src>

<mosaic_0001>
module attributes {stable_mosaic.version = 11 : i64} {
  func.func @_lenet5_kernel(%arg0: i32, %arg1: memref<2x48x484xbf16, #tpu.memory_space<vmem>>, %arg2: memref<8x48xbf16, #tpu.memory_space<vmem>>, %arg3: memref<8x1xf32, #tpu.memory_space<vmem>>, %arg4: memref<484x121xbf16, #tpu.memory_space<vmem>>, %arg5: memref<16x121x64xbf16, #tpu.memory_space<vmem>>, %arg6: memref<16x128xbf16, #tpu.memory_space<vmem>>, %arg7: memref<16x1xf32, #tpu.memory_space<vmem>>, %arg8: memref<1024x120xbf16, #tpu.memory_space<vmem>>, %arg9: memref<1x120xf32, #tpu.memory_space<vmem>>, %arg10: memref<120x84xbf16, #tpu.memory_space<vmem>>, %arg11: memref<1x84xf32, #tpu.memory_space<vmem>>, %arg12: memref<84x128xbf16, #tpu.memory_space<vmem>>, %arg13: memref<1x128xf32, #tpu.memory_space<vmem>>, %arg14: memref<2x128xf32, #tpu.memory_space<vmem>>) attributes {dimension_semantics = [#tpu.dimension_semantics<parallel>], iteration_bounds = array<i64: 1>, scalar_prefetch = 0 : i64, scratch_operands = 0 : i64, tpu.core_type = #tpu.core_type<tc>, window_params = [{transform_indices = @transform_0, window_bounds = array<i64: 2, 48, 484>}, {pipeline_mode = #tpu.pipeline_mode<synchronous>, transform_indices = @transform_1, window_bounds = array<i64: 8, 48>}, {pipeline_mode = #tpu.pipeline_mode<synchronous>, transform_indices = @transform_2, window_bounds = array<i64: 8, 1>}, {pipeline_mode = #tpu.pipeline_mode<synchronous>, transform_indices = @transform_3, window_bounds = array<i64: 484, 121>}, {pipeline_mode = #tpu.pipeline_mode<synchronous>, transform_indices = @transform_4, window_bounds = array<i64: 16, 121, 64>}, {pipeline_mode = #tpu.pipeline_mode<synchronous>, transform_indices = @transform_5, window_bounds = array<i64: 16, 128>}, {pipeline_mode = #tpu.pipeline_mode<synchronous>, transform_indices = @transform_6, window_bounds = array<i64: 16, 1>}, {pipeline_mode = #tpu.pipeline_mode<synchronous>, transform_indices = @transform_7, window_bounds = array<i64: 1024, 120>}, {pipeline_mode = #tpu.pipeline_mode<synchronous>, transform_indices = @transform_8, window_bounds = array<i64: 1, 120>}, {pipeline_mode = #tpu.pipeline_mode<synchronous>, transform_indices = @transform_9, window_bounds = array<i64: 120, 84>}, {pipeline_mode = #tpu.pipeline_mode<synchronous>, transform_indices = @transform_10, window_bounds = array<i64: 1, 84>}, {pipeline_mode = #tpu.pipeline_mode<synchronous>, transform_indices = @transform_11, window_bounds = array<i64: 84, 128>}, {pipeline_mode = #tpu.pipeline_mode<synchronous>, transform_indices = @transform_12, window_bounds = array<i64: 1, 128>}, {transform_indices = @transform_13, window_bounds = array<i64: 2, 128>}]} {
    %c0 = arith.constant 0 : index
    %c0_0 = arith.constant 0 : index
    %0 = vector.load %arg2[%c0, %c0_0] : memref<8x48xbf16, #tpu.memory_space<vmem>>, vector<8x48xbf16>
    %c0_1 = arith.constant 0 : index
    %c0_2 = arith.constant 0 : index
    %1 = vector.load %arg3[%c0_1, %c0_2] : memref<8x1xf32, #tpu.memory_space<vmem>>, vector<8x1xf32>
    %c0_3 = arith.constant 0 : index
    %c0_4 = arith.constant 0 : index
    %2 = vector.load %arg4[%c0_3, %c0_4] : memref<484x121xbf16, #tpu.memory_space<vmem>>, vector<484x121xbf16>
    %c0_5 = arith.constant 0 : index
    %c0_6 = arith.constant 0 : index
    %3 = vector.load %arg6[%c0_5, %c0_6] : memref<16x128xbf16, #tpu.memory_space<vmem>>, vector<16x128xbf16>
    %c0_7 = arith.constant 0 : index
    %c0_8 = arith.constant 0 : index
    %4 = vector.load %arg7[%c0_7, %c0_8] : memref<16x1xf32, #tpu.memory_space<vmem>>, vector<16x1xf32>
    %c0_9 = arith.constant 0 : index
    %c0_10 = arith.constant 0 : index
    %5 = vector.load %arg8[%c0_9, %c0_10] : memref<1024x120xbf16, #tpu.memory_space<vmem>>, vector<1024x120xbf16>
    %c0_11 = arith.constant 0 : index
    %c0_12 = arith.constant 0 : index
    %6 = vector.load %arg9[%c0_11, %c0_12] : memref<1x120xf32, #tpu.memory_space<vmem>>, vector<1x120xf32>
    %c0_13 = arith.constant 0 : index
    %c0_14 = arith.constant 0 : index
    %c0_15 = arith.constant 0 : index
    %7 = vector.load %arg1[%c0_13, %c0_14, %c0_15] : memref<2x48x484xbf16, #tpu.memory_space<vmem>>, vector<1x48x484xbf16>
    %8 = vector.shape_cast %7 : vector<1x48x484xbf16> to vector<48x484xbf16>
    %cst = arith.constant dense<0.000000e+00> : vector<8x484xf32>
    %9 = tpu.matmul %0, %8, %cst {dimension_numbers = #tpu.dot_dimension_numbers<[1], [0], [0], [1], [0, 0, 1, 1], [], []>} : vector<8x48xbf16>, vector<48x484xbf16>, vector<8x484xf32> -> vector<8x484xf32>
    %10 = vector.broadcast %1 : vector<8x1xf32> to vector<8x484xf32>
    %11 = arith.addf %9, %10 : vector<8x484xf32>
    %12 = math.tanh %11 : vector<8x484xf32>
    %13 = arith.truncf %12 : vector<8x484xf32> to vector<8x484xbf16>
    %cst_16 = arith.constant dense<0.000000e+00> : vector<8x121xf32>
    %14 = tpu.matmul %13, %2, %cst_16 {dimension_numbers = #tpu.dot_dimension_numbers<[1], [0], [0], [1], [0, 0, 1, 1], [], []>} : vector<8x484xbf16>, vector<484x121xbf16>, vector<8x121xf32> -> vector<8x121xf32>
    %15 = arith.truncf %14 : vector<8x121xf32> to vector<8x121xbf16>
    %c0_17 = arith.constant 0 : index
    %c0_18 = arith.constant 0 : index
    %c0_19 = arith.constant 0 : index
    %16 = vector.load %arg5[%c0_17, %c0_18, %c0_19] : memref<16x121x64xbf16, #tpu.memory_space<vmem>>, vector<1x121x64xbf16>
    %17 = vector.shape_cast %16 : vector<1x121x64xbf16> to vector<121x64xbf16>
    %cst_20 = arith.constant dense<0.000000e+00> : vector<8x64xf32>
    %18 = tpu.matmul %15, %17, %cst_20 {dimension_numbers = #tpu.dot_dimension_numbers<[1], [0], [0], [1], [0, 0, 1, 1], [], []>} : vector<8x121xbf16>, vector<121x64xbf16>, vector<8x64xf32> -> vector<8x64xf32>
    %19 = arith.truncf %18 : vector<8x64xf32> to vector<8x64xbf16>
    %c1 = arith.constant 1 : index
    %c0_21 = arith.constant 0 : index
    %c0_22 = arith.constant 0 : index
    %20 = vector.load %arg5[%c1, %c0_21, %c0_22] : memref<16x121x64xbf16, #tpu.memory_space<vmem>>, vector<1x121x64xbf16>
    %21 = vector.shape_cast %20 : vector<1x121x64xbf16> to vector<121x64xbf16>
    %cst_23 = arith.constant dense<0.000000e+00> : vector<8x64xf32>
    %22 = tpu.matmul %15, %21, %cst_23 {dimension_numbers = #tpu.dot_dimension_numbers<[1], [0], [0], [1], [0, 0, 1, 1], [], []>} : vector<8x121xbf16>, vector<121x64xbf16>, vector<8x64xf32> -> vector<8x64xf32>
    %23 = arith.truncf %22 : vector<8x64xf32> to vector<8x64xbf16>
    %c2 = arith.constant 2 : index
    %c0_24 = arith.constant 0 : index
    %c0_25 = arith.constant 0 : index
    %24 = vector.load %arg5[%c2, %c0_24, %c0_25] : memref<16x121x64xbf16, #tpu.memory_space<vmem>>, vector<1x121x64xbf16>
    %25 = vector.shape_cast %24 : vector<1x121x64xbf16> to vector<121x64xbf16>
    %cst_26 = arith.constant dense<0.000000e+00> : vector<8x64xf32>
    %26 = tpu.matmul %15, %25, %cst_26 {dimension_numbers = #tpu.dot_dimension_numbers<[1], [0], [0], [1], [0, 0, 1, 1], [], []>} : vector<8x121xbf16>, vector<121x64xbf16>, vector<8x64xf32> -> vector<8x64xf32>
    %27 = arith.truncf %26 : vector<8x64xf32> to vector<8x64xbf16>
    %c3 = arith.constant 3 : index
    %c0_27 = arith.constant 0 : index
    %c0_28 = arith.constant 0 : index
    %28 = vector.load %arg5[%c3, %c0_27, %c0_28] : memref<16x121x64xbf16, #tpu.memory_space<vmem>>, vector<1x121x64xbf16>
    %29 = vector.shape_cast %28 : vector<1x121x64xbf16> to vector<121x64xbf16>
    %cst_29 = arith.constant dense<0.000000e+00> : vector<8x64xf32>
    %30 = tpu.matmul %15, %29, %cst_29 {dimension_numbers = #tpu.dot_dimension_numbers<[1], [0], [0], [1], [0, 0, 1, 1], [], []>} : vector<8x121xbf16>, vector<121x64xbf16>, vector<8x64xf32> -> vector<8x64xf32>
    %31 = arith.truncf %30 : vector<8x64xf32> to vector<8x64xbf16>
    %c4 = arith.constant 4 : index
    %c0_30 = arith.constant 0 : index
    %c0_31 = arith.constant 0 : index
    %32 = vector.load %arg5[%c4, %c0_30, %c0_31] : memref<16x121x64xbf16, #tpu.memory_space<vmem>>, vector<1x121x64xbf16>
    %33 = vector.shape_cast %32 : vector<1x121x64xbf16> to vector<121x64xbf16>
    %cst_32 = arith.constant dense<0.000000e+00> : vector<8x64xf32>
    %34 = tpu.matmul %15, %33, %cst_32 {dimension_numbers = #tpu.dot_dimension_numbers<[1], [0], [0], [1], [0, 0, 1, 1], [], []>} : vector<8x121xbf16>, vector<121x64xbf16>, vector<8x64xf32> -> vector<8x64xf32>
    %35 = arith.truncf %34 : vector<8x64xf32> to vector<8x64xbf16>
    %c5 = arith.constant 5 : index
    %c0_33 = arith.constant 0 : index
    %c0_34 = arith.constant 0 : index
    %36 = vector.load %arg5[%c5, %c0_33, %c0_34] : memref<16x121x64xbf16, #tpu.memory_space<vmem>>, vector<1x121x64xbf16>
    %37 = vector.shape_cast %36 : vector<1x121x64xbf16> to vector<121x64xbf16>
    %cst_35 = arith.constant dense<0.000000e+00> : vector<8x64xf32>
    %38 = tpu.matmul %15, %37, %cst_35 {dimension_numbers = #tpu.dot_dimension_numbers<[1], [0], [0], [1], [0, 0, 1, 1], [], []>} : vector<8x121xbf16>, vector<121x64xbf16>, vector<8x64xf32> -> vector<8x64xf32>
    %39 = arith.truncf %38 : vector<8x64xf32> to vector<8x64xbf16>
    %c6 = arith.constant 6 : index
    %c0_36 = arith.constant 0 : index
    %c0_37 = arith.constant 0 : index
    %40 = vector.load %arg5[%c6, %c0_36, %c0_37] : memref<16x121x64xbf16, #tpu.memory_space<vmem>>, vector<1x121x64xbf16>
    %41 = vector.shape_cast %40 : vector<1x121x64xbf16> to vector<121x64xbf16>
    %cst_38 = arith.constant dense<0.000000e+00> : vector<8x64xf32>
    %42 = tpu.matmul %15, %41, %cst_38 {dimension_numbers = #tpu.dot_dimension_numbers<[1], [0], [0], [1], [0, 0, 1, 1], [], []>} : vector<8x121xbf16>, vector<121x64xbf16>, vector<8x64xf32> -> vector<8x64xf32>
    %43 = arith.truncf %42 : vector<8x64xf32> to vector<8x64xbf16>
    %c7 = arith.constant 7 : index
    %c0_39 = arith.constant 0 : index
    %c0_40 = arith.constant 0 : index
    %44 = vector.load %arg5[%c7, %c0_39, %c0_40] : memref<16x121x64xbf16, #tpu.memory_space<vmem>>, vector<1x121x64xbf16>
    %45 = vector.shape_cast %44 : vector<1x121x64xbf16> to vector<121x64xbf16>
    %cst_41 = arith.constant dense<0.000000e+00> : vector<8x64xf32>
    %46 = tpu.matmul %15, %45, %cst_41 {dimension_numbers = #tpu.dot_dimension_numbers<[1], [0], [0], [1], [0, 0, 1, 1], [], []>} : vector<8x121xbf16>, vector<121x64xbf16>, vector<8x64xf32> -> vector<8x64xf32>
    %47 = arith.truncf %46 : vector<8x64xf32> to vector<8x64xbf16>
    %c8 = arith.constant 8 : index
    %c0_42 = arith.constant 0 : index
    %c0_43 = arith.constant 0 : index
    %48 = vector.load %arg5[%c8, %c0_42, %c0_43] : memref<16x121x64xbf16, #tpu.memory_space<vmem>>, vector<1x121x64xbf16>
    %49 = vector.shape_cast %48 : vector<1x121x64xbf16> to vector<121x64xbf16>
    %cst_44 = arith.constant dense<0.000000e+00> : vector<8x64xf32>
    %50 = tpu.matmul %15, %49, %cst_44 {dimension_numbers = #tpu.dot_dimension_numbers<[1], [0], [0], [1], [0, 0, 1, 1], [], []>} : vector<8x121xbf16>, vector<121x64xbf16>, vector<8x64xf32> -> vector<8x64xf32>
    %51 = arith.truncf %50 : vector<8x64xf32> to vector<8x64xbf16>
    %c9 = arith.constant 9 : index
    %c0_45 = arith.constant 0 : index
    %c0_46 = arith.constant 0 : index
    %52 = vector.load %arg5[%c9, %c0_45, %c0_46] : memref<16x121x64xbf16, #tpu.memory_space<vmem>>, vector<1x121x64xbf16>
    %53 = vector.shape_cast %52 : vector<1x121x64xbf16> to vector<121x64xbf16>
    %cst_47 = arith.constant dense<0.000000e+00> : vector<8x64xf32>
    %54 = tpu.matmul %15, %53, %cst_47 {dimension_numbers = #tpu.dot_dimension_numbers<[1], [0], [0], [1], [0, 0, 1, 1], [], []>} : vector<8x121xbf16>, vector<121x64xbf16>, vector<8x64xf32> -> vector<8x64xf32>
    %55 = arith.truncf %54 : vector<8x64xf32> to vector<8x64xbf16>
    %c10 = arith.constant 10 : index
    %c0_48 = arith.constant 0 : index
    %c0_49 = arith.constant 0 : index
    %56 = vector.load %arg5[%c10, %c0_48, %c0_49] : memref<16x121x64xbf16, #tpu.memory_space<vmem>>, vector<1x121x64xbf16>
    %57 = vector.shape_cast %56 : vector<1x121x64xbf16> to vector<121x64xbf16>
    %cst_50 = arith.constant dense<0.000000e+00> : vector<8x64xf32>
    %58 = tpu.matmul %15, %57, %cst_50 {dimension_numbers = #tpu.dot_dimension_numbers<[1], [0], [0], [1], [0, 0, 1, 1], [], []>} : vector<8x121xbf16>, vector<121x64xbf16>, vector<8x64xf32> -> vector<8x64xf32>
    %59 = arith.truncf %58 : vector<8x64xf32> to vector<8x64xbf16>
    %c11 = arith.constant 11 : index
    %c0_51 = arith.constant 0 : index
    %c0_52 = arith.constant 0 : index
    %60 = vector.load %arg5[%c11, %c0_51, %c0_52] : memref<16x121x64xbf16, #tpu.memory_space<vmem>>, vector<1x121x64xbf16>
    %61 = vector.shape_cast %60 : vector<1x121x64xbf16> to vector<121x64xbf16>
    %cst_53 = arith.constant dense<0.000000e+00> : vector<8x64xf32>
    %62 = tpu.matmul %15, %61, %cst_53 {dimension_numbers = #tpu.dot_dimension_numbers<[1], [0], [0], [1], [0, 0, 1, 1], [], []>} : vector<8x121xbf16>, vector<121x64xbf16>, vector<8x64xf32> -> vector<8x64xf32>
    %63 = arith.truncf %62 : vector<8x64xf32> to vector<8x64xbf16>
    %c12 = arith.constant 12 : index
    %c0_54 = arith.constant 0 : index
    %c0_55 = arith.constant 0 : index
    %64 = vector.load %arg5[%c12, %c0_54, %c0_55] : memref<16x121x64xbf16, #tpu.memory_space<vmem>>, vector<1x121x64xbf16>
    %65 = vector.shape_cast %64 : vector<1x121x64xbf16> to vector<121x64xbf16>
    %cst_56 = arith.constant dense<0.000000e+00> : vector<8x64xf32>
    %66 = tpu.matmul %15, %65, %cst_56 {dimension_numbers = #tpu.dot_dimension_numbers<[1], [0], [0], [1], [0, 0, 1, 1], [], []>} : vector<8x121xbf16>, vector<121x64xbf16>, vector<8x64xf32> -> vector<8x64xf32>
    %67 = arith.truncf %66 : vector<8x64xf32> to vector<8x64xbf16>
    %c13 = arith.constant 13 : index
    %c0_57 = arith.constant 0 : index
    %c0_58 = arith.constant 0 : index
    %68 = vector.load %arg5[%c13, %c0_57, %c0_58] : memref<16x121x64xbf16, #tpu.memory_space<vmem>>, vector<1x121x64xbf16>
    %69 = vector.shape_cast %68 : vector<1x121x64xbf16> to vector<121x64xbf16>
    %cst_59 = arith.constant dense<0.000000e+00> : vector<8x64xf32>
    %70 = tpu.matmul %15, %69, %cst_59 {dimension_numbers = #tpu.dot_dimension_numbers<[1], [0], [0], [1], [0, 0, 1, 1], [], []>} : vector<8x121xbf16>, vector<121x64xbf16>, vector<8x64xf32> -> vector<8x64xf32>
    %71 = arith.truncf %70 : vector<8x64xf32> to vector<8x64xbf16>
    %c14 = arith.constant 14 : index
    %c0_60 = arith.constant 0 : index
    %c0_61 = arith.constant 0 : index
    %72 = vector.load %arg5[%c14, %c0_60, %c0_61] : memref<16x121x64xbf16, #tpu.memory_space<vmem>>, vector<1x121x64xbf16>
    %73 = vector.shape_cast %72 : vector<1x121x64xbf16> to vector<121x64xbf16>
    %cst_62 = arith.constant dense<0.000000e+00> : vector<8x64xf32>
    %74 = tpu.matmul %15, %73, %cst_62 {dimension_numbers = #tpu.dot_dimension_numbers<[1], [0], [0], [1], [0, 0, 1, 1], [], []>} : vector<8x121xbf16>, vector<121x64xbf16>, vector<8x64xf32> -> vector<8x64xf32>
    %75 = arith.truncf %74 : vector<8x64xf32> to vector<8x64xbf16>
    %c15 = arith.constant 15 : index
    %c0_63 = arith.constant 0 : index
    %c0_64 = arith.constant 0 : index
    %76 = vector.load %arg5[%c15, %c0_63, %c0_64] : memref<16x121x64xbf16, #tpu.memory_space<vmem>>, vector<1x121x64xbf16>
    %77 = vector.shape_cast %76 : vector<1x121x64xbf16> to vector<121x64xbf16>
    %cst_65 = arith.constant dense<0.000000e+00> : vector<8x64xf32>
    %78 = tpu.matmul %15, %77, %cst_65 {dimension_numbers = #tpu.dot_dimension_numbers<[1], [0], [0], [1], [0, 0, 1, 1], [], []>} : vector<8x121xbf16>, vector<121x64xbf16>, vector<8x64xf32> -> vector<8x64xf32>
    %79 = arith.truncf %78 : vector<8x64xf32> to vector<8x64xbf16>
    %80 = tpu.concatenate %19, %23, %27, %31, %35, %39, %43, %47, %51, %55, %59, %63, %67, %71, %75, %79 in 0 : vector<8x64xbf16>, vector<8x64xbf16>, vector<8x64xbf16>, vector<8x64xbf16>, vector<8x64xbf16>, vector<8x64xbf16>, vector<8x64xbf16>, vector<8x64xbf16>, vector<8x64xbf16>, vector<8x64xbf16>, vector<8x64xbf16>, vector<8x64xbf16>, vector<8x64xbf16>, vector<8x64xbf16>, vector<8x64xbf16>, vector<8x64xbf16> -> vector<128x64xbf16>
    %cst_66 = arith.constant dense<0.000000e+00> : vector<16x64xf32>
    %81 = tpu.matmul %3, %80, %cst_66 {dimension_numbers = #tpu.dot_dimension_numbers<[1], [0], [0], [1], [0, 0, 1, 1], [], []>} : vector<16x128xbf16>, vector<128x64xbf16>, vector<16x64xf32> -> vector<16x64xf32>
    %82 = vector.broadcast %4 : vector<16x1xf32> to vector<16x64xf32>
    %83 = arith.addf %81, %82 : vector<16x64xf32>
    %84 = math.tanh %83 : vector<16x64xf32>
    %85 = arith.truncf %84 : vector<16x64xf32> to vector<16x64xbf16>
    %86 = vector.extract_strided_slice %85 {offsets = [0, 0], sizes = [1, 64], strides = [1, 1]} : vector<16x64xbf16> to vector<1x64xbf16>
    %87 = vector.extract_strided_slice %85 {offsets = [1, 0], sizes = [1, 64], strides = [1, 1]} : vector<16x64xbf16> to vector<1x64xbf16>
    %88 = vector.extract_strided_slice %85 {offsets = [2, 0], sizes = [1, 64], strides = [1, 1]} : vector<16x64xbf16> to vector<1x64xbf16>
    %89 = vector.extract_strided_slice %85 {offsets = [3, 0], sizes = [1, 64], strides = [1, 1]} : vector<16x64xbf16> to vector<1x64xbf16>
    %90 = vector.extract_strided_slice %85 {offsets = [4, 0], sizes = [1, 64], strides = [1, 1]} : vector<16x64xbf16> to vector<1x64xbf16>
    %91 = vector.extract_strided_slice %85 {offsets = [5, 0], sizes = [1, 64], strides = [1, 1]} : vector<16x64xbf16> to vector<1x64xbf16>
    %92 = vector.extract_strided_slice %85 {offsets = [6, 0], sizes = [1, 64], strides = [1, 1]} : vector<16x64xbf16> to vector<1x64xbf16>
    %93 = vector.extract_strided_slice %85 {offsets = [7, 0], sizes = [1, 64], strides = [1, 1]} : vector<16x64xbf16> to vector<1x64xbf16>
    %94 = vector.extract_strided_slice %85 {offsets = [8, 0], sizes = [1, 64], strides = [1, 1]} : vector<16x64xbf16> to vector<1x64xbf16>
    %95 = vector.extract_strided_slice %85 {offsets = [9, 0], sizes = [1, 64], strides = [1, 1]} : vector<16x64xbf16> to vector<1x64xbf16>
    %96 = vector.extract_strided_slice %85 {offsets = [10, 0], sizes = [1, 64], strides = [1, 1]} : vector<16x64xbf16> to vector<1x64xbf16>
    %97 = vector.extract_strided_slice %85 {offsets = [11, 0], sizes = [1, 64], strides = [1, 1]} : vector<16x64xbf16> to vector<1x64xbf16>
    %98 = vector.extract_strided_slice %85 {offsets = [12, 0], sizes = [1, 64], strides = [1, 1]} : vector<16x64xbf16> to vector<1x64xbf16>
    %99 = vector.extract_strided_slice %85 {offsets = [13, 0], sizes = [1, 64], strides = [1, 1]} : vector<16x64xbf16> to vector<1x64xbf16>
    %100 = vector.extract_strided_slice %85 {offsets = [14, 0], sizes = [1, 64], strides = [1, 1]} : vector<16x64xbf16> to vector<1x64xbf16>
    %101 = vector.extract_strided_slice %85 {offsets = [15, 0], sizes = [1, 64], strides = [1, 1]} : vector<16x64xbf16> to vector<1x64xbf16>
    %102 = tpu.concatenate %86, %87, %88, %89, %90, %91, %92, %93, %94, %95, %96, %97, %98, %99, %100, %101 in 1 : vector<1x64xbf16>, vector<1x64xbf16>, vector<1x64xbf16>, vector<1x64xbf16>, vector<1x64xbf16>, vector<1x64xbf16>, vector<1x64xbf16>, vector<1x64xbf16>, vector<1x64xbf16>, vector<1x64xbf16>, vector<1x64xbf16>, vector<1x64xbf16>, vector<1x64xbf16>, vector<1x64xbf16>, vector<1x64xbf16>, vector<1x64xbf16> -> vector<1x1024xbf16>
    %cst_67 = arith.constant dense<0.000000e+00> : vector<1x120xf32>
    %103 = tpu.matmul %102, %5, %cst_67 {dimension_numbers = #tpu.dot_dimension_numbers<[1], [0], [0], [1], [0, 0, 1, 1], [], []>} : vector<1x1024xbf16>, vector<1024x120xbf16>, vector<1x120xf32> -> vector<1x120xf32>
    %104 = arith.addf %103, %6 : vector<1x120xf32>
    %105 = math.tanh %104 : vector<1x120xf32>
    %106 = arith.truncf %105 : vector<1x120xf32> to vector<1x120xbf16>
    %c1_68 = arith.constant 1 : index
    %c0_69 = arith.constant 0 : index
    %c0_70 = arith.constant 0 : index
    %107 = vector.load %arg1[%c1_68, %c0_69, %c0_70] : memref<2x48x484xbf16, #tpu.memory_space<vmem>>, vector<1x48x484xbf16>
    %108 = vector.shape_cast %107 : vector<1x48x484xbf16> to vector<48x484xbf16>
    %cst_71 = arith.constant dense<0.000000e+00> : vector<8x484xf32>
    %109 = tpu.matmul %0, %108, %cst_71 {dimension_numbers = #tpu.dot_dimension_numbers<[1], [0], [0], [1], [0, 0, 1, 1], [], []>} : vector<8x48xbf16>, vector<48x484xbf16>, vector<8x484xf32> -> vector<8x484xf32>
    %110 = vector.broadcast %1 : vector<8x1xf32> to vector<8x484xf32>
    %111 = arith.addf %109, %110 : vector<8x484xf32>
    %112 = math.tanh %111 : vector<8x484xf32>
    %113 = arith.truncf %112 : vector<8x484xf32> to vector<8x484xbf16>
    %cst_72 = arith.constant dense<0.000000e+00> : vector<8x121xf32>
    %114 = tpu.matmul %113, %2, %cst_72 {dimension_numbers = #tpu.dot_dimension_numbers<[1], [0], [0], [1], [0, 0, 1, 1], [], []>} : vector<8x484xbf16>, vector<484x121xbf16>, vector<8x121xf32> -> vector<8x121xf32>
    %115 = arith.truncf %114 : vector<8x121xf32> to vector<8x121xbf16>
    %c0_73 = arith.constant 0 : index
    %c0_74 = arith.constant 0 : index
    %c0_75 = arith.constant 0 : index
    %116 = vector.load %arg5[%c0_73, %c0_74, %c0_75] : memref<16x121x64xbf16, #tpu.memory_space<vmem>>, vector<1x121x64xbf16>
    %117 = vector.shape_cast %116 : vector<1x121x64xbf16> to vector<121x64xbf16>
    %cst_76 = arith.constant dense<0.000000e+00> : vector<8x64xf32>
    %118 = tpu.matmul %115, %117, %cst_76 {dimension_numbers = #tpu.dot_dimension_numbers<[1], [0], [0], [1], [0, 0, 1, 1], [], []>} : vector<8x121xbf16>, vector<121x64xbf16>, vector<8x64xf32> -> vector<8x64xf32>
    %119 = arith.truncf %118 : vector<8x64xf32> to vector<8x64xbf16>
    %c1_77 = arith.constant 1 : index
    %c0_78 = arith.constant 0 : index
    %c0_79 = arith.constant 0 : index
    %120 = vector.load %arg5[%c1_77, %c0_78, %c0_79] : memref<16x121x64xbf16, #tpu.memory_space<vmem>>, vector<1x121x64xbf16>
    %121 = vector.shape_cast %120 : vector<1x121x64xbf16> to vector<121x64xbf16>
    %cst_80 = arith.constant dense<0.000000e+00> : vector<8x64xf32>
    %122 = tpu.matmul %115, %121, %cst_80 {dimension_numbers = #tpu.dot_dimension_numbers<[1], [0], [0], [1], [0, 0, 1, 1], [], []>} : vector<8x121xbf16>, vector<121x64xbf16>, vector<8x64xf32> -> vector<8x64xf32>
    %123 = arith.truncf %122 : vector<8x64xf32> to vector<8x64xbf16>
    %c2_81 = arith.constant 2 : index
    %c0_82 = arith.constant 0 : index
    %c0_83 = arith.constant 0 : index
    %124 = vector.load %arg5[%c2_81, %c0_82, %c0_83] : memref<16x121x64xbf16, #tpu.memory_space<vmem>>, vector<1x121x64xbf16>
    %125 = vector.shape_cast %124 : vector<1x121x64xbf16> to vector<121x64xbf16>
    %cst_84 = arith.constant dense<0.000000e+00> : vector<8x64xf32>
    %126 = tpu.matmul %115, %125, %cst_84 {dimension_numbers = #tpu.dot_dimension_numbers<[1], [0], [0], [1], [0, 0, 1, 1], [], []>} : vector<8x121xbf16>, vector<121x64xbf16>, vector<8x64xf32> -> vector<8x64xf32>
    %127 = arith.truncf %126 : vector<8x64xf32> to vector<8x64xbf16>
    %c3_85 = arith.constant 3 : index
    %c0_86 = arith.constant 0 : index
    %c0_87 = arith.constant 0 : index
    %128 = vector.load %arg5[%c3_85, %c0_86, %c0_87] : memref<16x121x64xbf16, #tpu.memory_space<vmem>>, vector<1x121x64xbf16>
    %129 = vector.shape_cast %128 : vector<1x121x64xbf16> to vector<121x64xbf16>
    %cst_88 = arith.constant dense<0.000000e+00> : vector<8x64xf32>
    %130 = tpu.matmul %115, %129, %cst_88 {dimension_numbers = #tpu.dot_dimension_numbers<[1], [0], [0], [1], [0, 0, 1, 1], [], []>} : vector<8x121xbf16>, vector<121x64xbf16>, vector<8x64xf32> -> vector<8x64xf32>
    %131 = arith.truncf %130 : vector<8x64xf32> to vector<8x64xbf16>
    %c4_89 = arith.constant 4 : index
    %c0_90 = arith.constant 0 : index
    %c0_91 = arith.constant 0 : index
    %132 = vector.load %arg5[%c4_89, %c0_90, %c0_91] : memref<16x121x64xbf16, #tpu.memory_space<vmem>>, vector<1x121x64xbf16>
    %133 = vector.shape_cast %132 : vector<1x121x64xbf16> to vector<121x64xbf16>
    %cst_92 = arith.constant dense<0.000000e+00> : vector<8x64xf32>
    %134 = tpu.matmul %115, %133, %cst_92 {dimension_numbers = #tpu.dot_dimension_numbers<[1], [0], [0], [1], [0, 0, 1, 1], [], []>} : vector<8x121xbf16>, vector<121x64xbf16>, vector<8x64xf32> -> vector<8x64xf32>
    %135 = arith.truncf %134 : vector<8x64xf32> to vector<8x64xbf16>
    %c5_93 = arith.constant 5 : index
    %c0_94 = arith.constant 0 : index
    %c0_95 = arith.constant 0 : index
    %136 = vector.load %arg5[%c5_93, %c0_94, %c0_95] : memref<16x121x64xbf16, #tpu.memory_space<vmem>>, vector<1x121x64xbf16>
    %137 = vector.shape_cast %136 : vector<1x121x64xbf16> to vector<121x64xbf16>
    %cst_96 = arith.constant dense<0.000000e+00> : vector<8x64xf32>
    %138 = tpu.matmul %115, %137, %cst_96 {dimension_numbers = #tpu.dot_dimension_numbers<[1], [0], [0], [1], [0, 0, 1, 1], [], []>} : vector<8x121xbf16>, vector<121x64xbf16>, vector<8x64xf32> -> vector<8x64xf32>
    %139 = arith.truncf %138 : vector<8x64xf32> to vector<8x64xbf16>
    %c6_97 = arith.constant 6 : index
    %c0_98 = arith.constant 0 : index
    %c0_99 = arith.constant 0 : index
    %140 = vector.load %arg5[%c6_97, %c0_98, %c0_99] : memref<16x121x64xbf16, #tpu.memory_space<vmem>>, vector<1x121x64xbf16>
    %141 = vector.shape_cast %140 : vector<1x121x64xbf16> to vector<121x64xbf16>
    %cst_100 = arith.constant dense<0.000000e+00> : vector<8x64xf32>
    %142 = tpu.matmul %115, %141, %cst_100 {dimension_numbers = #tpu.dot_dimension_numbers<[1], [0], [0], [1], [0, 0, 1, 1], [], []>} : vector<8x121xbf16>, vector<121x64xbf16>, vector<8x64xf32> -> vector<8x64xf32>
    %143 = arith.truncf %142 : vector<8x64xf32> to vector<8x64xbf16>
    %c7_101 = arith.constant 7 : index
    %c0_102 = arith.constant 0 : index
    %c0_103 = arith.constant 0 : index
    %144 = vector.load %arg5[%c7_101, %c0_102, %c0_103] : memref<16x121x64xbf16, #tpu.memory_space<vmem>>, vector<1x121x64xbf16>
    %145 = vector.shape_cast %144 : vector<1x121x64xbf16> to vector<121x64xbf16>
    %cst_104 = arith.constant dense<0.000000e+00> : vector<8x64xf32>
    %146 = tpu.matmul %115, %145, %cst_104 {dimension_numbers = #tpu.dot_dimension_numbers<[1], [0], [0], [1], [0, 0, 1, 1], [], []>} : vector<8x121xbf16>, vector<121x64xbf16>, vector<8x64xf32> -> vector<8x64xf32>
    %147 = arith.truncf %146 : vector<8x64xf32> to vector<8x64xbf16>
    %c8_105 = arith.constant 8 : index
    %c0_106 = arith.constant 0 : index
    %c0_107 = arith.constant 0 : index
    %148 = vector.load %arg5[%c8_105, %c0_106, %c0_107] : memref<16x121x64xbf16, #tpu.memory_space<vmem>>, vector<1x121x64xbf16>
    %149 = vector.shape_cast %148 : vector<1x121x64xbf16> to vector<121x64xbf16>
    %cst_108 = arith.constant dense<0.000000e+00> : vector<8x64xf32>
    %150 = tpu.matmul %115, %149, %cst_108 {dimension_numbers = #tpu.dot_dimension_numbers<[1], [0], [0], [1], [0, 0, 1, 1], [], []>} : vector<8x121xbf16>, vector<121x64xbf16>, vector<8x64xf32> -> vector<8x64xf32>
    %151 = arith.truncf %150 : vector<8x64xf32> to vector<8x64xbf16>
    %c9_109 = arith.constant 9 : index
    %c0_110 = arith.constant 0 : index
    %c0_111 = arith.constant 0 : index
    %152 = vector.load %arg5[%c9_109, %c0_110, %c0_111] : memref<16x121x64xbf16, #tpu.memory_space<vmem>>, vector<1x121x64xbf16>
    %153 = vector.shape_cast %152 : vector<1x121x64xbf16> to vector<121x64xbf16>
    %cst_112 = arith.constant dense<0.000000e+00> : vector<8x64xf32>
    %154 = tpu.matmul %115, %153, %cst_112 {dimension_numbers = #tpu.dot_dimension_numbers<[1], [0], [0], [1], [0, 0, 1, 1], [], []>} : vector<8x121xbf16>, vector<121x64xbf16>, vector<8x64xf32> -> vector<8x64xf32>
    %155 = arith.truncf %154 : vector<8x64xf32> to vector<8x64xbf16>
    %c10_113 = arith.constant 10 : index
    %c0_114 = arith.constant 0 : index
    %c0_115 = arith.constant 0 : index
    %156 = vector.load %arg5[%c10_113, %c0_114, %c0_115] : memref<16x121x64xbf16, #tpu.memory_space<vmem>>, vector<1x121x64xbf16>
    %157 = vector.shape_cast %156 : vector<1x121x64xbf16> to vector<121x64xbf16>
    %cst_116 = arith.constant dense<0.000000e+00> : vector<8x64xf32>
    %158 = tpu.matmul %115, %157, %cst_116 {dimension_numbers = #tpu.dot_dimension_numbers<[1], [0], [0], [1], [0, 0, 1, 1], [], []>} : vector<8x121xbf16>, vector<121x64xbf16>, vector<8x64xf32> -> vector<8x64xf32>
    %159 = arith.truncf %158 : vector<8x64xf32> to vector<8x64xbf16>
    %c11_117 = arith.constant 11 : index
    %c0_118 = arith.constant 0 : index
    %c0_119 = arith.constant 0 : index
    %160 = vector.load %arg5[%c11_117, %c0_118, %c0_119] : memref<16x121x64xbf16, #tpu.memory_space<vmem>>, vector<1x121x64xbf16>
    %161 = vector.shape_cast %160 : vector<1x121x64xbf16> to vector<121x64xbf16>
    %cst_120 = arith.constant dense<0.000000e+00> : vector<8x64xf32>
    %162 = tpu.matmul %115, %161, %cst_120 {dimension_numbers = #tpu.dot_dimension_numbers<[1], [0], [0], [1], [0, 0, 1, 1], [], []>} : vector<8x121xbf16>, vector<121x64xbf16>, vector<8x64xf32> -> vector<8x64xf32>
    %163 = arith.truncf %162 : vector<8x64xf32> to vector<8x64xbf16>
    %c12_121 = arith.constant 12 : index
    %c0_122 = arith.constant 0 : index
    %c0_123 = arith.constant 0 : index
    %164 = vector.load %arg5[%c12_121, %c0_122, %c0_123] : memref<16x121x64xbf16, #tpu.memory_space<vmem>>, vector<1x121x64xbf16>
    %165 = vector.shape_cast %164 : vector<1x121x64xbf16> to vector<121x64xbf16>
    %cst_124 = arith.constant dense<0.000000e+00> : vector<8x64xf32>
    %166 = tpu.matmul %115, %165, %cst_124 {dimension_numbers = #tpu.dot_dimension_numbers<[1], [0], [0], [1], [0, 0, 1, 1], [], []>} : vector<8x121xbf16>, vector<121x64xbf16>, vector<8x64xf32> -> vector<8x64xf32>
    %167 = arith.truncf %166 : vector<8x64xf32> to vector<8x64xbf16>
    %c13_125 = arith.constant 13 : index
    %c0_126 = arith.constant 0 : index
    %c0_127 = arith.constant 0 : index
    %168 = vector.load %arg5[%c13_125, %c0_126, %c0_127] : memref<16x121x64xbf16, #tpu.memory_space<vmem>>, vector<1x121x64xbf16>
    %169 = vector.shape_cast %168 : vector<1x121x64xbf16> to vector<121x64xbf16>
    %cst_128 = arith.constant dense<0.000000e+00> : vector<8x64xf32>
    %170 = tpu.matmul %115, %169, %cst_128 {dimension_numbers = #tpu.dot_dimension_numbers<[1], [0], [0], [1], [0, 0, 1, 1], [], []>} : vector<8x121xbf16>, vector<121x64xbf16>, vector<8x64xf32> -> vector<8x64xf32>
    %171 = arith.truncf %170 : vector<8x64xf32> to vector<8x64xbf16>
    %c14_129 = arith.constant 14 : index
    %c0_130 = arith.constant 0 : index
    %c0_131 = arith.constant 0 : index
    %172 = vector.load %arg5[%c14_129, %c0_130, %c0_131] : memref<16x121x64xbf16, #tpu.memory_space<vmem>>, vector<1x121x64xbf16>
    %173 = vector.shape_cast %172 : vector<1x121x64xbf16> to vector<121x64xbf16>
    %cst_132 = arith.constant dense<0.000000e+00> : vector<8x64xf32>
    %174 = tpu.matmul %115, %173, %cst_132 {dimension_numbers = #tpu.dot_dimension_numbers<[1], [0], [0], [1], [0, 0, 1, 1], [], []>} : vector<8x121xbf16>, vector<121x64xbf16>, vector<8x64xf32> -> vector<8x64xf32>
    %175 = arith.truncf %174 : vector<8x64xf32> to vector<8x64xbf16>
    %c15_133 = arith.constant 15 : index
    %c0_134 = arith.constant 0 : index
    %c0_135 = arith.constant 0 : index
    %176 = vector.load %arg5[%c15_133, %c0_134, %c0_135] : memref<16x121x64xbf16, #tpu.memory_space<vmem>>, vector<1x121x64xbf16>
    %177 = vector.shape_cast %176 : vector<1x121x64xbf16> to vector<121x64xbf16>
    %cst_136 = arith.constant dense<0.000000e+00> : vector<8x64xf32>
    %178 = tpu.matmul %115, %177, %cst_136 {dimension_numbers = #tpu.dot_dimension_numbers<[1], [0], [0], [1], [0, 0, 1, 1], [], []>} : vector<8x121xbf16>, vector<121x64xbf16>, vector<8x64xf32> -> vector<8x64xf32>
    %179 = arith.truncf %178 : vector<8x64xf32> to vector<8x64xbf16>
    %180 = tpu.concatenate %119, %123, %127, %131, %135, %139, %143, %147, %151, %155, %159, %163, %167, %171, %175, %179 in 0 : vector<8x64xbf16>, vector<8x64xbf16>, vector<8x64xbf16>, vector<8x64xbf16>, vector<8x64xbf16>, vector<8x64xbf16>, vector<8x64xbf16>, vector<8x64xbf16>, vector<8x64xbf16>, vector<8x64xbf16>, vector<8x64xbf16>, vector<8x64xbf16>, vector<8x64xbf16>, vector<8x64xbf16>, vector<8x64xbf16>, vector<8x64xbf16> -> vector<128x64xbf16>
    %cst_137 = arith.constant dense<0.000000e+00> : vector<16x64xf32>
    %181 = tpu.matmul %3, %180, %cst_137 {dimension_numbers = #tpu.dot_dimension_numbers<[1], [0], [0], [1], [0, 0, 1, 1], [], []>} : vector<16x128xbf16>, vector<128x64xbf16>, vector<16x64xf32> -> vector<16x64xf32>
    %182 = vector.broadcast %4 : vector<16x1xf32> to vector<16x64xf32>
    %183 = arith.addf %181, %182 : vector<16x64xf32>
    %184 = math.tanh %183 : vector<16x64xf32>
    %185 = arith.truncf %184 : vector<16x64xf32> to vector<16x64xbf16>
    %186 = vector.extract_strided_slice %185 {offsets = [0, 0], sizes = [1, 64], strides = [1, 1]} : vector<16x64xbf16> to vector<1x64xbf16>
    %187 = vector.extract_strided_slice %185 {offsets = [1, 0], sizes = [1, 64], strides = [1, 1]} : vector<16x64xbf16> to vector<1x64xbf16>
    %188 = vector.extract_strided_slice %185 {offsets = [2, 0], sizes = [1, 64], strides = [1, 1]} : vector<16x64xbf16> to vector<1x64xbf16>
    %189 = vector.extract_strided_slice %185 {offsets = [3, 0], sizes = [1, 64], strides = [1, 1]} : vector<16x64xbf16> to vector<1x64xbf16>
    %190 = vector.extract_strided_slice %185 {offsets = [4, 0], sizes = [1, 64], strides = [1, 1]} : vector<16x64xbf16> to vector<1x64xbf16>
    %191 = vector.extract_strided_slice %185 {offsets = [5, 0], sizes = [1, 64], strides = [1, 1]} : vector<16x64xbf16> to vector<1x64xbf16>
    %192 = vector.extract_strided_slice %185 {offsets = [6, 0], sizes = [1, 64], strides = [1, 1]} : vector<16x64xbf16> to vector<1x64xbf16>
    %193 = vector.extract_strided_slice %185 {offsets = [7, 0], sizes = [1, 64], strides = [1, 1]} : vector<16x64xbf16> to vector<1x64xbf16>
    %194 = vector.extract_strided_slice %185 {offsets = [8, 0], sizes = [1, 64], strides = [1, 1]} : vector<16x64xbf16> to vector<1x64xbf16>
    %195 = vector.extract_strided_slice %185 {offsets = [9, 0], sizes = [1, 64], strides = [1, 1]} : vector<16x64xbf16> to vector<1x64xbf16>
    %196 = vector.extract_strided_slice %185 {offsets = [10, 0], sizes = [1, 64], strides = [1, 1]} : vector<16x64xbf16> to vector<1x64xbf16>
    %197 = vector.extract_strided_slice %185 {offsets = [11, 0], sizes = [1, 64], strides = [1, 1]} : vector<16x64xbf16> to vector<1x64xbf16>
    %198 = vector.extract_strided_slice %185 {offsets = [12, 0], sizes = [1, 64], strides = [1, 1]} : vector<16x64xbf16> to vector<1x64xbf16>
    %199 = vector.extract_strided_slice %185 {offsets = [13, 0], sizes = [1, 64], strides = [1, 1]} : vector<16x64xbf16> to vector<1x64xbf16>
    %200 = vector.extract_strided_slice %185 {offsets = [14, 0], sizes = [1, 64], strides = [1, 1]} : vector<16x64xbf16> to vector<1x64xbf16>
    %201 = vector.extract_strided_slice %185 {offsets = [15, 0], sizes = [1, 64], strides = [1, 1]} : vector<16x64xbf16> to vector<1x64xbf16>
    %202 = tpu.concatenate %186, %187, %188, %189, %190, %191, %192, %193, %194, %195, %196, %197, %198, %199, %200, %201 in 1 : vector<1x64xbf16>, vector<1x64xbf16>, vector<1x64xbf16>, vector<1x64xbf16>, vector<1x64xbf16>, vector<1x64xbf16>, vector<1x64xbf16>, vector<1x64xbf16>, vector<1x64xbf16>, vector<1x64xbf16>, vector<1x64xbf16>, vector<1x64xbf16>, vector<1x64xbf16>, vector<1x64xbf16>, vector<1x64xbf16>, vector<1x64xbf16> -> vector<1x1024xbf16>
    %cst_138 = arith.constant dense<0.000000e+00> : vector<1x120xf32>
    %203 = tpu.matmul %202, %5, %cst_138 {dimension_numbers = #tpu.dot_dimension_numbers<[1], [0], [0], [1], [0, 0, 1, 1], [], []>} : vector<1x1024xbf16>, vector<1024x120xbf16>, vector<1x120xf32> -> vector<1x120xf32>
    %204 = arith.addf %203, %6 : vector<1x120xf32>
    %205 = math.tanh %204 : vector<1x120xf32>
    %206 = arith.truncf %205 : vector<1x120xf32> to vector<1x120xbf16>
    %207 = tpu.concatenate %106, %206 in 0 : vector<1x120xbf16>, vector<1x120xbf16> -> vector<2x120xbf16>
    %c0_139 = arith.constant 0 : index
    %c0_140 = arith.constant 0 : index
    %208 = vector.load %arg10[%c0_139, %c0_140] : memref<120x84xbf16, #tpu.memory_space<vmem>>, vector<120x84xbf16>
    %cst_141 = arith.constant dense<0.000000e+00> : vector<2x84xf32>
    %209 = tpu.matmul %207, %208, %cst_141 {dimension_numbers = #tpu.dot_dimension_numbers<[1], [0], [0], [1], [0, 0, 1, 1], [], []>} : vector<2x120xbf16>, vector<120x84xbf16>, vector<2x84xf32> -> vector<2x84xf32>
    %c0_142 = arith.constant 0 : index
    %c0_143 = arith.constant 0 : index
    %210 = vector.load %arg11[%c0_142, %c0_143] : memref<1x84xf32, #tpu.memory_space<vmem>>, vector<1x84xf32>
    %211 = vector.broadcast %210 : vector<1x84xf32> to vector<2x84xf32>
    %212 = arith.addf %209, %211 : vector<2x84xf32>
    %213 = math.tanh %212 : vector<2x84xf32>
    %214 = arith.truncf %213 : vector<2x84xf32> to vector<2x84xbf16>
    %c0_144 = arith.constant 0 : index
    %c0_145 = arith.constant 0 : index
    %215 = vector.load %arg12[%c0_144, %c0_145] : memref<84x128xbf16, #tpu.memory_space<vmem>>, vector<84x128xbf16>
    %cst_146 = arith.constant dense<0.000000e+00> : vector<2x128xf32>
    %216 = tpu.matmul %214, %215, %cst_146 {dimension_numbers = #tpu.dot_dimension_numbers<[1], [0], [0], [1], [0, 0, 1, 1], [], []>} : vector<2x84xbf16>, vector<84x128xbf16>, vector<2x128xf32> -> vector<2x128xf32>
    %c0_147 = arith.constant 0 : index
    %c0_148 = arith.constant 0 : index
    %217 = vector.load %arg13[%c0_147, %c0_148] : memref<1x128xf32, #tpu.memory_space<vmem>>, vector<1x128xf32>
    %218 = vector.broadcast %217 : vector<1x128xf32> to vector<2x128xf32>
    %219 = arith.addf %216, %218 : vector<2x128xf32>
    %c0_149 = arith.constant 0 : index
    %c0_150 = arith.constant 0 : index
    %220 = vector.load %arg14[%c0_149, %c0_150] : memref<2x128xf32, #tpu.memory_space<vmem>>, vector<2x128xf32>
    tpu.vector_store %arg14[%c0_149, %c0_150], %219 {strides = array<i32>} : memref<2x128xf32, #tpu.memory_space<vmem>>, vector<2x128xf32>,
    return
  }
  func.func @transform_0(%arg0: i32) -> (i32, i32, i32) {
    %c0_i32 = arith.constant 0 : i32
    %c0_i32_0 = arith.constant 0 : i32
    %c0_i32_1 = arith.constant 0 : i32
    return %arg0, %c0_i32, %c0_i32_0 : i32, i32, i32
  }
  func.func @transform_1(%arg0: i32) -> (i32, i32) {
    %c0_i32 = arith.constant 0 : i32
    %c0_i32_0 = arith.constant 0 : i32
    %c0_i32_1 = arith.constant 0 : i32
    return %c0_i32, %c0_i32_0 : i32, i32
  }
  func.func @transform_2(%arg0: i32) -> (i32, i32) {
    %c0_i32 = arith.constant 0 : i32
    %c0_i32_0 = arith.constant 0 : i32
    %c0_i32_1 = arith.constant 0 : i32
    return %c0_i32, %c0_i32_0 : i32, i32
  }
  func.func @transform_3(%arg0: i32) -> (i32, i32) {
    %c0_i32 = arith.constant 0 : i32
    %c0_i32_0 = arith.constant 0 : i32
    %c0_i32_1 = arith.constant 0 : i32
    return %c0_i32, %c0_i32_0 : i32, i32
  }
  func.func @transform_4(%arg0: i32) -> (i32, i32, i32) {
    %c0_i32 = arith.constant 0 : i32
    %c0_i32_0 = arith.constant 0 : i32
    %c0_i32_1 = arith.constant 0 : i32
    %c0_i32_2 = arith.constant 0 : i32
    return %c0_i32, %c0_i32_0, %c0_i32_1 : i32, i32, i32
  }
  func.func @transform_5(%arg0: i32) -> (i32, i32) {
    %c0_i32 = arith.constant 0 : i32
    %c0_i32_0 = arith.constant 0 : i32
    %c0_i32_1 = arith.constant 0 : i32
    return %c0_i32, %c0_i32_0 : i32, i32
  }
  func.func @transform_6(%arg0: i32) -> (i32, i32) {
    %c0_i32 = arith.constant 0 : i32
    %c0_i32_0 = arith.constant 0 : i32
    %c0_i32_1 = arith.constant 0 : i32
    return %c0_i32, %c0_i32_0 : i32, i32
  }
  func.func @transform_7(%arg0: i32) -> (i32, i32) {
    %c0_i32 = arith.constant 0 : i32
    %c0_i32_0 = arith.constant 0 : i32
    %c0_i32_1 = arith.constant 0 : i32
    return %c0_i32, %c0_i32_0 : i32, i32
  }
  func.func @transform_8(%arg0: i32) -> (i32, i32) {
    %c0_i32 = arith.constant 0 : i32
    %c0_i32_0 = arith.constant 0 : i32
    %c0_i32_1 = arith.constant 0 : i32
    return %c0_i32, %c0_i32_0 : i32, i32
  }
  func.func @transform_9(%arg0: i32) -> (i32, i32) {
    %c0_i32 = arith.constant 0 : i32
    %c0_i32_0 = arith.constant 0 : i32
    %c0_i32_1 = arith.constant 0 : i32
    return %c0_i32, %c0_i32_0 : i32, i32
  }
  func.func @transform_10(%arg0: i32) -> (i32, i32) {
    %c0_i32 = arith.constant 0 : i32
    %c0_i32_0 = arith.constant 0 : i32
    %c0_i32_1 = arith.constant 0 : i32
    return %c0_i32, %c0_i32_0 : i32, i32
  }
  func.func @transform_11(%arg0: i32) -> (i32, i32) {
    %c0_i32 = arith.constant 0 : i32
    %c0_i32_0 = arith.constant 0 : i32
    %c0_i32_1 = arith.constant 0 : i32
    return %c0_i32, %c0_i32_0 : i32, i32
  }
  func.func @transform_12(%arg0: i32) -> (i32, i32) {
    %c0_i32 = arith.constant 0 : i32
    %c0_i32_0 = arith.constant 0 : i32
    %c0_i32_1 = arith.constant 0 : i32
    return %c0_i32, %c0_i32_0 : i32, i32
  }
  func.func @transform_13(%arg0: i32) -> (i32, i32) {
    %c0_i32 = arith.constant 0 : i32
    %c0_i32_0 = arith.constant 0 : i32
    return %arg0, %c0_i32 : i32, i32
  }
}

</mosaic_0001>

<bundles_post_ra>
// kernel: lenet5_forward.1
= control target key start
LH: loop header
LB: loop body
LE: loop exit
PB: predicated region body
PF: predicated region fallthrough
CT: control target
= control target key end

     0   :  { %v6961_v2 = vmov 0   ;;  %vm319_vm0 = vcmask 392192   ;;  %vm600_vm1 = vcmask 1041408   ;;  %v6962_v48 = vmov 0.0   ;;  %s9132_s0 = inlined_call_operand.vmem [shape: bf16[2,48,484], index: 0, kind: input, shape index: {}]   ;;  %s9133_s1 = inlined_call_operand.vmem [shape: bf16[8,48], index: 1, kind: input, shape index: {}]   ;;  %s9134_s2 = inlined_call_operand.vmem [shape: f32[8,1], index: 2, kind: input, shape index: {}]   ;;  %s9135_s3 = inlined_call_operand.vmem [shape: bf16[484,121], index: 3, kind: input, shape index: {}]   ;;  %s9136_s4 = inlined_call_operand.vmem [shape: bf16[16,121,64], index: 4, kind: input, shape index: {}]   ;;  %s9137_s5 = inlined_call_operand.vmem [shape: bf16[16,128], index: 5, kind: input, shape index: {}]   ;;  %s9138_s6 = inlined_call_operand.vmem [shape: f32[16,1], index: 6, kind: input, shape index: {}]   ;;  %s9139_s7 = inlined_call_operand.vmem [shape: bf16[1024,120], index: 7, kind: input, shape index: {}]   ;;  %s9140_s8 = inlined_call_operand.vmem [shape: f32[1,120], index: 8, kind: input, shape index: {}]   ;;  %s9141_s9 = inlined_call_operand.vmem [shape: bf16[120,84], index: 9, kind: input, shape index: {}]   ;;  %s9142_s10 = inlined_call_operand.vmem [shape: f32[1,84], index: 10, kind: input, shape index: {}]   ;;  %s9143_s11 = inlined_call_operand.vmem [shape: bf16[84,128], index: 11, kind: input, shape index: {}]   ;;  %s9144_s12 = inlined_call_operand.vmem [shape: f32[1,128], index: 12, kind: input, shape index: {}]   ;;  %s9145_s13 = inlined_call_operand.hbm [shape: f32[2,128], index: 13, kind: output, shape index: {}]  }
   0x1   :  { %v6424_v0 = vld [vmem:[%s9132_s0 + $0x4] ss:$16 sps:$4 sm:$0xff]   ;;  %v6426_v1 = vld [vmem:[%s9132_s0 + $0xc] ss:$16 sps:$4 sm:$0xff]   ;;  %355 = vmatprep.mubr.bf16.mxu0 %v6961_v2  ;;  %396 = vmatprep.mubr.bf16.mxu1 %v6961_v2  ;;  %v6428_v3 = vld [vmem:[%s9132_s0] ss:$16 sps:$4 sm:$0xff]  }
   0x2   :  { %323 = vmatprep.subr.bf16.mxu0 %v6424_v0  ;;  %v6429_v4 = vld [vmem:[%s9132_s0 + $0x8] ss:$16 sps:$4 sm:$0xff]   ;;  %6422 = vset.pattern.permute.xlu0 %v6961_v2  ;;  %v6430_v5 = vld [vmem:[%s9132_s0 + $0x24] ss:$16 sps:$4 sm:$0xff]   ;;  %v6432_v6 = vld [vmem:[%s9132_s0 + $0x2c] ss:$16 sps:$4 sm:$0xff]  }
   0x3   :  { %364 = vmatprep.subr.bf16.mxu1 %v6426_v1  ;;  %6423 = vset.pattern.permute.xlu1 %v6961_v2  ;;  %v6434_v7 = vld [vmem:[%s9132_s0 + $0x20] ss:$16 sps:$4 sm:$0xff]   ;;  %v6435_v8 = vld [vmem:[%s9132_s0 + $0x28] ss:$16 sps:$4 sm:$0xff]   ;;  %v6436_v9 = vld [vmem:[%s9132_s0 + $0x44] ss:$16 sps:$4 sm:$0xff]  }
   0x4   :  { %324 = vmatpush1.bf16.msra.mxu0 %v6428_v3  ;;  %365 = vmatpush1.bf16.msra.mxu1 %v6429_v4  ;;  %v6438_v10 = vld [vmem:[%s9132_s0 + $0x4c] ss:$16 sps:$4 sm:$0xff]   ;;  %v6440_v11 = vld [vmem:[%s9132_s0 + $0x40] ss:$16 sps:$4 sm:$0xff]   ;;  %v6441_v12 = vld [vmem:[%s9132_s0 + $0x48] ss:$16 sps:$4 sm:$0xff]  }
   0x5   :  { %325 = vmatprep.subr.bf16.mxu0 %v6430_v5  ;;  %366 = vmatprep.subr.bf16.mxu1 %v6432_v6  ;;  %v47_v13 = vld [vmem:[%s9134_s2] sm:$0xff]  ;;  %v6443_v17 = vld [vmem:[%s9135_s3 + $0x88] sm:$0xff]   ;;  %v6444_v20 = vld [vmem:[%s9135_s3 + $0x90] sm:$0xff]  }
   0x6   :  { %v46_v14 = vld [vmem:[%s9133_s1] sm:$0xf]  ;;  %256 = vperm.xlu0 %6422, %v47_v13   ;;  %v6452_v21 = vld [vmem:[%s9135_s3 + $0x48] sm:$0xff]   ;;  %v6455_v23 = vld [vmem:[%s9135_s3 + $0x50] sm:$0xff]  }
   0x7   :  { %v111_v15 = vld [vmem:[%s9138_s6] sm:$0xff]  ;;  %v6453_v22 = vld [vmem:[%s9135_s3 + $0x8] sm:$0xff]   ;;  %v6456_v24 = vld [vmem:[%s9135_s3 + $0x10] sm:$0xff]  }
   0x8   :  { %326 = vmatpush1.bf16.msra.mxu0 %v6434_v7  ;;  %367 = vmatpush1.bf16.msra.mxu1 %v6435_v8  ;;  %v6442_v16 = vld [vmem:[%s9135_s3 + $0x80] sm:$0xff]   ;;  %v6445_v25 = vld [vmem:[%s9135_s3 + $0x98] sm:$0xff]   ;;  %v6447_v29 = vld [vmem:[%s9135_s3 + $0xa8] sm:$0xff]  }
   0x9   :  { %327 = vmatprep.subr.bf16.mxu0 %v6436_v9  ;;  %368 = vmatprep.subr.bf16.mxu1 %v6438_v10  ;;  %v6449_v18 = vld [vmem:[%s9135_s3 + $0x40] sm:$0xff]   ;;  %v6458_v26 = vld [vmem:[%s9135_s3 + $0x58] sm:$0xff]   ;;  %v6448_v30 = vld [vmem:[%s9135_s3 + $0xb0] sm:$0xff]  }
   0xa   :  { %2470 = vperm.xlu0 %6422, %v111_v15   ;;  %v6450_v19 = vld [vmem:[%s9135_s3] sm:$0xff]   ;;  %v6459_v28 = vld [vmem:[%s9135_s3 + $0x18] sm:$0xff]   ;;  %v6457_v33 = vld [vmem:[%s9135_s3 + $0xc8] sm:$0xff]  }
   0xb   :  { %v6446_v27 = vld [vmem:[%s9135_s3 + $0xa0] sm:$0xff]   ;;  %v6451_v31 = vld [vmem:[%s9135_s3 + $0xb8] sm:$0xff]   ;;  %v6460_v34 = vld [vmem:[%s9135_s3 + $0xd0] sm:$0xff]  }
   0xc   :  { %328 = vmatpush1.bf16.msra.mxu0 %v6440_v11  ;;  %369 = vmatpush1.bf16.msra.mxu1 %v6441_v12  ;;  %v6454_v32 = vld [vmem:[%s9135_s3 + $0xc0] sm:$0xff]   ;;  %v6463_v37 = vld [vmem:[%s9135_s3 + $0xd8] sm:$0xff]   ;;  %v6464_v38 = vld [vmem:[%s9135_s3 + $0x68] sm:$0xff]  }
   0xd   :  { %644 = vmatprep.subr.bf16.mxu1 %v6961_v2  ;;  %5158 = vmatprep.subr.bf16.mxu0 %v6449_v18  ;;  %v6461_v35 = vld [vmem:[%s9135_s3 + $0x60] sm:$0xff]   ;;  %v6465_v39 = vld [vmem:[%s9135_s3 + $0x28] sm:$0xff]   ;;  %v6467_v41 = vld [vmem:[%s9135_s3 + $0x70] sm:$0xff]  }
   0xe   :  { %v6462_v36 = vld [vmem:[%s9135_s3 + $0x20] sm:$0xff]   ;;  %v6468_v42 = vld [vmem:[%s9135_s3 + $0x30] sm:$0xff]   ;;  %v6469_v43 = vld [vmem:[%s9135_s3 + $0xe8] sm:$0xff]  }
   0xf   :  { %4614 = vmatmul.mubr.msk.bf16.vlgmr.msra.gmra.mrb[0].mxu0 %vm319_vm0, %v46_v14  ;;  %4615 = vmatmul.mubr.msk.bf16.vlgmr.msra.gmra.mrb[0].mxu1 %vm319_vm0, %v46_v14  ;;  %v6466_v40 = vld [vmem:[%s9135_s3 + $0xe0] sm:$0xff]   ;;  %v6470_v44 = vld [vmem:[%s9135_s3 + $0x78] sm:$0xff]   ;;  %v6472_v45 = vld [vmem:[%s9135_s3 + $0xf0] ss:$0 sps:$4 sm:$0x33]  }
  0x10   :  { %645 = vmatpush1.bf16.msra.mxu1 %v6442_v16  ;;  %5159 = vmatpush3.bf16.msra.mxu0 %v6450_v19  ;;  %v6471_v46 = vld [vmem:[%s9135_s3 + $0x38] sm:$0xff]   ;;  %v7197_v47 = vsel %vm600_vm1, %v6472_v45, 0 }
  0x11   :  { %646 = vmatprep.subr.bf16.mxu1 %v6961_v2  ;;  %5160 = vmatprep.subr.bf16.mxu0 %v6452_v21 }
  0x14   :  { %647 = vmatpush1.bf16.msra.mxu1 %v6443_v17  ;;  %5161 = vmatpush3.bf16.msra.mxu0 %v6453_v22 }
  0x15   :  { %648 = vmatprep.subr.bf16.mxu1 %v6961_v2  ;;  %5162 = vmatprep.subr.bf16.mxu0 %v6455_v23 }
  0x18   :  { %649 = vmatpush1.bf16.msra.mxu1 %v6444_v20  ;;  %5163 = vmatpush3.bf16.msra.mxu0 %v6456_v24 }
  0x19   :  { %650 = vmatprep.subr.bf16.mxu1 %v6961_v2  ;;  %5164 = vmatprep.subr.bf16.mxu0 %v6458_v26 }
  0x1c   :  { %651 = vmatpush1.bf16.msra.mxu1 %v6445_v25  ;;  %5165 = vmatpush3.bf16.msra.mxu0 %v6459_v28 }
  0x1d   :  { %652 = vmatprep.subr.bf16.mxu1 %v6961_v2  ;;  %5166 = vmatprep.subr.bf16.mxu0 %v6461_v35 }
  0x20   :  { %653 = vmatpush1.bf16.msra.mxu1 %v6446_v27  ;;  %5167 = vmatpush3.bf16.msra.mxu0 %v6462_v36 }
  0x21   :  { %654 = vmatprep.subr.bf16.mxu1 %v6961_v2  ;;  %5168 = vmatprep.subr.bf16.mxu0 %v6464_v38 }
  0x24   :  { %655 = vmatpush1.bf16.msra.mxu1 %v6447_v29  ;;  %5169 = vmatpush3.bf16.msra.mxu0 %v6465_v39 }
  0x25   :  { %656 = vmatprep.subr.bf16.mxu1 %v6961_v2  ;;  %5170 = vmatprep.subr.bf16.mxu0 %v6467_v41 }
  0x28   :  { %657 = vmatpush1.bf16.msra.mxu1 %v6448_v30  ;;  %5171 = vmatpush3.bf16.msra.mxu0 %v6468_v42 }
  0x29   :  { %658 = vmatprep.subr.bf16.mxu1 %v6961_v2  ;;  %5172 = vmatprep.subr.bf16.mxu0 %v6470_v44 }
  0x2c   :  { %659 = vmatpush1.bf16.msra.mxu1 %v6451_v31  ;;  %5173 = vmatpush3.bf16.msra.mxu0 %v6471_v46 }
  0x2d   :  { %660 = vmatprep.subr.bf16.mxu1 %v6961_v2  ;;  %5700 = vmatprep.subr.bf16.mxu0 %v6962_v48 }
  0x30   :  { %661 = vmatpush1.bf16.msra.mxu1 %v6454_v32 }
  0x31   :  { %662 = vmatprep.subr.bf16.mxu1 %v6961_v2 }
  0x34   :  { %663 = vmatpush1.bf16.msra.mxu1 %v6457_v33 }
  0x35   :  { %664 = vmatprep.subr.bf16.mxu1 %v6961_v2 }
  0x38   :  { %665 = vmatpush1.bf16.msra.mxu1 %v6460_v34 }
  0x39   :  { %666 = vmatprep.subr.bf16.mxu1 %v6961_v2 }
  0x3c   :  { %667 = vmatpush1.bf16.msra.mxu1 %v6463_v37 }
  0x3d   :  { %668 = vmatprep.subr.bf16.mxu1 %v6961_v2 }
  0x40   :  { %669 = vmatpush1.bf16.msra.mxu1 %v6466_v40 }
  0x41   :  { %670 = vmatprep.subr.bf16.mxu1 %v6961_v2 }
  0x44   :  { %671 = vmatpush1.bf16.msra.mxu1 %v6469_v43 }
  0x45   :  { %672 = vmatprep.subr.bf16.mxu1 %v6961_v2 }
  0x48   :  { %673 = vmatpush1.bf16.msra.mxu1 %v7197_v47 }
  0x49   :  { %5720 = vmatprep.subr.bf16.mxu1 %v6962_v48 }
  0x4a   :  { %18 = vsyncpa [#allocation3], 0  ;;  %vm596_vm2 = vcmask 818176   ;;  %v6473_v5 = vld [vmem:[%s9136_s4] sm:$0xff]   ;;  %v6475_v9 = vld [vmem:[%s9136_s4 + $0x8] sm:$0xff]   ;;  %vm752_vm3 = vcmask 1043456  }
  0x4b   :  { %v6474_v8 = vld [vmem:[%s9136_s4 + $0x40] sm:$0xff]   ;;  %v6476_v10 = vld [vmem:[%s9136_s4 + $0x48] sm:$0xff]   ;;  %v6477_v11 = vld [vmem:[%s9136_s4 + $0x10] sm:$0xff]   ;;  %vm753_vm4 = vcmask 1044480   ;;  %v6963_v22 = vmov 65535   ;;  %vm6964_vm5 = vmmov 0  }
  0x4c   :  { %v6478_v12 = vld [vmem:[%s9136_s4 + $0x50] sm:$0xff]   ;;  %v6479_v13 = vld [vmem:[%s9136_s4 + $0x18] sm:$0xff]   ;;  %v6481_v15 = vld [vmem:[%s9136_s4 + $0x20] sm:$0xff]   ;;  %v754_v23 = vsel %vm752_vm3, 4294967295, %v6963_v22  ;;  %vm748_vm6 = vcmask 990208   ;;  %s6965_s28 = smov 64  }
  0x4d   :  { %v6480_v14 = vld [vmem:[%s9136_s4 + $0x58] sm:$0xff]   ;;  %v6482_v16 = vld [vmem:[%s9136_s4 + $0x60] sm:$0xff]   ;;  %v6483_v17 = vld [vmem:[%s9136_s4 + $0x28] sm:$0xff]   ;;  %v7272_v25 = vsel %vm753_vm4, %v754_v23, 0  ;;  %vm2562_vm7 = vcmask 523264   ;;  %vm4369_vm8 = vcmask 1040384  }
  0x4e   :  { %v6484_v18 = vld [vmem:[%s9136_s4 + $0x68] sm:$0xff]   ;;  %v6485_v19 = vld [vmem:[%s9136_s4 + $0x30] sm:$0xff]   ;;  %v6487_v21 = vld [vmem:[%s9136_s4 + $0x38] sm:$0x1f]   ;;  %vm4370_vm9 = vsmask.f32 256 }
  0x4f   :  { %v6486_v20 = vld [vmem:[%s9136_s4 + $0x70] sm:$0xff]   ;;  %v6488_v24 = vld [vmem:[%s9136_s4 + $0x78] sm:$0x1f]   ;;  %v7275_v26 = vand.u32 %v6487_v21, %v7272_v25  ;;  %v6489_v38 = vld [vmem:[%s9136_s4 + $0x80] sm:$0xff]   ;;  %vm4440_vm11 = vcmask 982016   ;;  %vm4540_vm12 = vcmask 687104  }
  0x50   :  { %v7278_v27 = vand.u32 %v6488_v24, %v7272_v25  ;;  %v6490_v39 = vld [vmem:[%s9136_s4 + $0xc0] sm:$0xff]   ;;  %v6491_v41 = vld [vmem:[%s9136_s4 + $0x88] sm:$0xff]   ;;  %v6493_v43 = vld [vmem:[%s9136_s4 + $0x90] sm:$0xff]  }
  0x51   :  { %v6492_v42 = vld [vmem:[%s9136_s4 + $0xc8] sm:$0xff]   ;;  %v6494_v44 = vld [vmem:[%s9136_s4 + $0xd0] sm:$0xff]   ;;  %v6495_v45 = vld [vmem:[%s9136_s4 + $0x98] sm:$0xff]  }
  0x52   :  { %v6496_v46 = vld [vmem:[%s9136_s4 + $0xd8] sm:$0xff]   ;;  %v6529_v23 = vld [vmem:[%s9136_s4 + $0x1a0] sm:$0xff]   ;;  %vm4371_vm10 = vmand %vm4369_vm8, %vm4370_vm9 }
  0x53   :  { %v6527_v21 = vld [vmem:[%s9136_s4 + $0x198] sm:$0xff]   ;;  %v6530_v24 = vld [vmem:[%s9136_s4 + $0x1e0] sm:$0xff]  }
  0x54   :  { %v6528_v22 = vld [vmem:[%s9136_s4 + $0x1d8] sm:$0xff]  }
  0x85   :  { %v7202_v49 = vpop.permute.xlu0 %256 }
  0xe2   :  { %v357_v50 = vpop.f32.mrb[0].mxu0  ;;  %v398_v51 = vpop.f32.mrb[0].mxu1 }
  0xe3   :  { %v358_v52 = vadd.f32 %v357_v50, %v7202_v49  ;;  %v399_v53 = vadd.f32 %v398_v51, %v7202_v49  ;;  %v359_v54 = vpop.f32.mrb[1].mxu0  ;;  %v400_v55 = vpop.f32.mrb[1].mxu1  ;;  %v6497_v50 = vld [vmem:[%s9136_s4 + $0xa0] sm:$0xff]  }
  0xe4   :  { %v360_v56 = vadd.f32 %v359_v54, %v7202_v49  ;;  %v401_v57 = vadd.f32 %v400_v55, %v7202_v49  ;;  %v361_v58 = vpop.f32.mrb[2].mxu0  ;;  %v402_v59 = vpop.f32.mrb[2].mxu1  ;;  %v6498_v51 = vld [vmem:[%s9136_s4 + $0xe0] sm:$0xff]   ;;  %v6501_v54 = vld [vmem:[%s9136_s4 + $0xb0] sm:$0xff]  }
  0xe5   :  { %6698 = vtanh.f32 %v358_v52  ;;  %v362_v60 = vpop.f32.mrb[3].mxu0  ;;  %v403_v61 = vpop.f32.mrb[3].mxu1  ;;  %v6499_v52 = vld [vmem:[%s9136_s4 + $0xa8] sm:$0xff]   ;;  %v6502_v55 = vld [vmem:[%s9136_s4 + $0xf0] sm:$0xff]  }
  0xe6   :  { %6700 = vtanh.f32 %v399_v53  ;;  %v6500_v53 = vld [vmem:[%s9136_s4 + $0xe8] sm:$0xff]   ;;  %v6505_v60 = vld [vmem:[%s9136_s4 + $0x100] sm:$0xff]  }
  0xe7   :  { %6702 = vtanh.f32 %v360_v56  ;;  %v6503_v56 = vld [vmem:[%s9136_s4 + $0xb8] sm:$0x1f]   ;;  %v6506_v61 = vld [vmem:[%s9136_s4 + $0x140] sm:$0xff]  }
  0xe8   :  { %6704 = vtanh.f32 %v401_v57  ;;  %v6504_v57 = vld [vmem:[%s9136_s4 + $0xf8] sm:$0x1f]   ;;  %v7359_v58 = vand.u32 %v6503_v56, %v7272_v25 }
  0xe9   :  { %v7362_v59 = vand.u32 %v6504_v57, %v7272_v25 }
  0xef   :  { %v6699_v62 = vpop.eup %6698 }
  0xf0   :  { %v6701_v63 = vpop.eup %6700  ;;  %v409_v6 = vpack.c.bf16 %v6699_v62, %v6699_v62  ;;  %v6507_v62 = vld [vmem:[%s9136_s4 + $0x108] sm:$0xff]  }
  0xf1   :  { %v6703_v0 = vpop.eup %6702  ;;  %v411_v3 = vpack.c.bf16 %v6701_v63, %v6701_v63  ;;  %v6508_v63 = vld [vmem:[%s9136_s4 + $0x148] sm:$0xff]  }
  0xf2   :  { %v6705_v1 = vpop.eup %6704  ;;  %v410_v4 = vpack.c.bf16 %v6703_v0, %v6703_v0  ;;  %v6509_v0 = vld [vmem:[%s9136_s4 + $0x110] sm:$0xff]  }
  0xf3   :  { %v412_v7 = vpack.c.bf16 %v6705_v1, %v6705_v1  ;;  %v6510_v1 = vld [vmem:[%s9136_s4 + $0x150] sm:$0xff]  }
  0xf4   :  { %636 = vmatprep.mubr.bf16.mxu0 %v410_v4  ;;  %v6512_v4 = vld [vmem:[%s9136_s4 + $0x158] sm:$0xff]  }
  0xf5   :  { %4647 = vmatprep.mubr.msk.bf16.mxu1 %vm596_vm2, %v412_v7  ;;  %637 = vmatmul.mubr.bf16.vlgmr.msra.gmra.mrb[4].mxu0 %v409_v6  ;;  %v6514_v6 = vld [vmem:[%s9136_s4 + $0x160] sm:$0xff]   ;;  %v6515_v7 = vld [vmem:[%s9136_s4 + $0x128] sm:$0xff]  }
  0xf6   :  { %677 = vmatmul.mubr.bf16.vlgmr.msra.gmra.mrb[4].mxu1 %v411_v3  ;;  %5701 = vmatpush3.bf16.msra.mxu0 %v6473_v5  ;;  %v6511_v3 = vld [vmem:[%s9136_s4 + $0x118] sm:$0xff]   ;;  %v6513_v5 = vld [vmem:[%s9136_s4 + $0x120] sm:$0xff]  }
  0xf7   :  { %5721 = vmatpush3.bf16.msra.mxu1 %v6474_v8  ;;  %5702 = vmatprep.subr.bf16.mxu0 %v6962_v48  ;;  %v6516_v8 = vld [vmem:[%s9136_s4 + $0x168] sm:$0xff]  }
  0xf8   :  { %5722 = vmatprep.subr.bf16.mxu1 %v6962_v48  ;;  %5716 = vmatprep.mubr.msk.bf16.mxu0 %vm6964_vm5, %v6962_v48 }
  0xf9   :  { %5736 = vmatprep.mubr.msk.bf16.mxu1 %vm6964_vm5, %v6962_v48 }
  0xfa   :  { %5703 = vmatpush3.bf16.msra.mxu0 %v6475_v9  ;;  %v6517_v9 = vld [vmem:[%s9136_s4 + $0x130] sm:$0xff]  }
  0xfb   :  { %5723 = vmatpush3.bf16.msra.mxu1 %v6476_v10  ;;  %5704 = vmatprep.subr.bf16.mxu0 %v6962_v48  ;;  %v6518_v10 = vld [vmem:[%s9136_s4 + $0x170] sm:$0xff]  }
  0xfc   :  { %5724 = vmatprep.subr.bf16.mxu1 %v6962_v48 }
  0xfe   :  { %5705 = vmatpush3.bf16.msra.mxu0 %v6477_v11  ;;  %v6519_v11 = vld [vmem:[%s9136_s4 + $0x138] sm:$0x1f]  }
  0xff   :  { %5725 = vmatpush3.bf16.msra.mxu1 %v6478_v12  ;;  %5706 = vmatprep.subr.bf16.mxu0 %v6962_v48  ;;  %v6520_v12 = vld [vmem:[%s9136_s4 + $0x178] sm:$0x1f]  }
 0x100   :  { %5726 = vmatprep.subr.bf16.mxu1 %v6962_v48 }
 0x102   :  { %5707 = vmatpush3.bf16.msra.mxu0 %v6479_v13  ;;  %v7439_v13 = vand.u32 %v6519_v11, %v7272_v25  ;;  %v6567_v11 = vld [vmem:[%s9136_s4 + $0x2b8] sm:$0x1f]  }
 0x103   :  { %5727 = vmatpush3.bf16.msra.mxu1 %v6480_v14  ;;  %5708 = vmatprep.subr.bf16.mxu0 %v6962_v48  ;;  %v7442_v14 = vand.u32 %v6520_v12, %v7272_v25  ;;  %v6568_v12 = vld [vmem:[%s9136_s4 + $0x2f8] sm:$0x1f]  }
 0x104   :  { %5728 = vmatprep.subr.bf16.mxu1 %v6962_v48 }
 0x106   :  { %5709 = vmatpush3.bf16.msra.mxu0 %v6481_v15  ;;  %v6521_v15 = vld [vmem:[%s9136_s4 + $0x180] sm:$0xff]  }
 0x107   :  { %5729 = vmatpush3.bf16.msra.mxu1 %v6482_v16  ;;  %5710 = vmatprep.subr.bf16.mxu0 %v6962_v48  ;;  %v6522_v16 = vld [vmem:[%s9136_s4 + $0x1c0] sm:$0xff]  }
 0x108   :  { %5730 = vmatprep.subr.bf16.mxu1 %v6962_v48 }
 0x10a   :  { %5711 = vmatpush3.bf16.msra.mxu0 %v6483_v17  ;;  %v6523_v17 = vld [vmem:[%s9136_s4 + $0x188] sm:$0xff]  }
 0x10b   :  { %5731 = vmatpush3.bf16.msra.mxu1 %v6484_v18  ;;  %5712 = vmatprep.subr.bf16.mxu0 %v6962_v48  ;;  %v6524_v18 = vld [vmem:[%s9136_s4 + $0x1c8] sm:$0xff]  }
 0x10c   :  { %5732 = vmatprep.subr.bf16.mxu1 %v6962_v48 }
 0x10e   :  { %5713 = vmatpush3.bf16.msra.mxu0 %v6485_v19  ;;  %v6525_v19 = vld [vmem:[%s9136_s4 + $0x190] sm:$0xff]  }
 0x10f   :  { %5733 = vmatpush3.bf16.msra.mxu1 %v6486_v20  ;;  %5714 = vmatprep.subr.bf16.mxu0 %v6962_v48  ;;  %v6526_v20 = vld [vmem:[%s9136_s4 + $0x1d0] sm:$0xff]  }
 0x110   :  { %5734 = vmatprep.subr.bf16.mxu1 %v6962_v48 }
 0x112   :  { %5715 = vmatpush3.bf16.msra.mxu0 %v7275_v26 }
 0x113   :  { %5735 = vmatpush3.bf16.msra.mxu1 %v7278_v27  ;;  %5740 = vmatprep.subr.bf16.mxu0 %v6962_v48 }
 0x114   :  { %5760 = vmatprep.subr.bf16.mxu1 %v6962_v48 }
 0x1c8   :  { %v5174_v28 = vpop.f32.mrb[4].mxu0 }
 0x1c9   :  { %v678_v29 = vpop.f32.mrb[4].mxu1  ;;  %v5175_v30 = vpop.f32.mrb[5].mxu0 }
 0x1ca   :  { %v5176_v31 = vadd.f32 %v5175_v30, %v5174_v28  ;;  %v680_v32 = vpop.f32.mrb[5].mxu1  ;;  %v5177_v33 = vpop.f32.mrb[6].mxu0  ;;  %v6531_v28 = vld [vmem:[%s9136_s4 + $0x1a8] sm:$0xff]   ;;  %v6533_v30 = vld [vmem:[%s9136_s4 + $0x1b0] sm:$0xff]  }
 0x1cb   :  { %v681_v34 = vpop.f32.mrb[6].mxu1  ;;  %v5178_v35 = vpop.f32.mrb[7].mxu0  ;;  %v6535_v32 = vld [vmem:[%s9136_s4 + $0x1b8] sm:$0x1f]  }
 0x1cc   :  { %v679_v36 = vadd.f32 %v5176_v31, %v678_v29  ;;  %v682_v37 = vpop.f32.mrb[7].mxu1  ;;  %v6532_v29 = vld [vmem:[%s9136_s4 + $0x1e8] sm:$0xff]   ;;  %v6534_v31 = vld [vmem:[%s9136_s4 + $0x1f0] sm:$0xff]   ;;  %v6536_v33 = vld [vmem:[%s9136_s4 + $0x1f8] sm:$0x1f]   ;;  %v7519_v34 = vand.u32 %v6535_v32, %v7272_v25 }
 0x1cd   :  { %v7522_v35 = vand.u32 %v6536_v33, %v7272_v25  ;;  %v6538_v37 = vld [vmem:[%s9136_s4 + $0x240] sm:$0xff]   ;;  %v6581_v32 = vld [vmem:[%s9136_s4 + $0x330] sm:$0xff]  }
 0x1ce   :  { %v7294_v40 = vpack.c.bf16 %v679_v36, %v679_v36  ;;  %v6537_v36 = vld [vmem:[%s9136_s4 + $0x200] sm:$0xff]   ;;  %v6582_v33 = vld [vmem:[%s9136_s4 + $0x370] sm:$0xff]  }
 0x1d0   :  { %5717 = vmatmul.mubr.msk.bf16.vlgmr.msra.gmra.mrb[8].mxu0 %vm748_vm6, %v7294_v40  ;;  %5737 = vmatmul.mubr.msk.bf16.vlgmr.msra.gmra.mrb[8].mxu1 %vm748_vm6, %v7294_v40 }
 0x1d1   :  { %5741 = vmatpush3.bf16.msra.mxu0 %v6489_v38  ;;  %5761 = vmatpush3.bf16.msra.mxu1 %v6490_v39  ;;  %v6539_v38 = vld [vmem:[%s9136_s4 + $0x208] sm:$0xff]  }
 0x1d2   :  { %5742 = vmatprep.subr.bf16.mxu0 %v6962_v48  ;;  %5762 = vmatprep.subr.bf16.mxu1 %v6962_v48  ;;  %v6540_v39 = vld [vmem:[%s9136_s4 + $0x248] sm:$0xff]  }
 0x1d3   :  { %5756 = vmatprep.mubr.msk.bf16.mxu0 %vm6964_vm5, %v6962_v48  ;;  %5776 = vmatprep.mubr.msk.bf16.mxu1 %vm6964_vm5, %v6962_v48 }
 0x1d5   :  { %5743 = vmatpush3.bf16.msra.mxu0 %v6491_v41  ;;  %5763 = vmatpush3.bf16.msra.mxu1 %v6492_v42  ;;  %v6541_v41 = vld [vmem:[%s9136_s4 + $0x210] sm:$0xff]  }
 0x1d6   :  { %5744 = vmatprep.subr.bf16.mxu0 %v6962_v48  ;;  %5764 = vmatprep.subr.bf16.mxu1 %v6962_v48  ;;  %v6542_v42 = vld [vmem:[%s9136_s4 + $0x250] sm:$0xff]  }
 0x1d9   :  { %5745 = vmatpush3.bf16.msra.mxu0 %v6493_v43  ;;  %5765 = vmatpush3.bf16.msra.mxu1 %v6494_v44  ;;  %v6543_v43 = vld [vmem:[%s9136_s4 + $0x218] sm:$0xff]  }
 0x1da   :  { %5746 = vmatprep.subr.bf16.mxu0 %v6962_v48  ;;  %5766 = vmatprep.subr.bf16.mxu1 %v6962_v48  ;;  %v6544_v44 = vld [vmem:[%s9136_s4 + $0x258] sm:$0xff]  }
 0x1dd   :  { %5747 = vmatpush3.bf16.msra.mxu0 %v6495_v45  ;;  %5767 = vmatpush3.bf16.msra.mxu1 %v6496_v46  ;;  %v6545_v45 = vld [vmem:[%s9136_s4 + $0x220] sm:$0xff]  }
 0x1de   :  { %5748 = vmatprep.subr.bf16.mxu0 %v6962_v48  ;;  %5768 = vmatprep.subr.bf16.mxu1 %v6962_v48  ;;  %v6546_v46 = vld [vmem:[%s9136_s4 + $0x260] sm:$0xff]  }
 0x1e1   :  { %5749 = vmatpush3.bf16.msra.mxu0 %v6497_v50  ;;  %5769 = vmatpush3.bf16.msra.mxu1 %v6498_v51  ;;  %v6547_v50 = vld [vmem:[%s9136_s4 + $0x228] sm:$0xff]  }
 0x1e2   :  { %5750 = vmatprep.subr.bf16.mxu0 %v6962_v48  ;;  %5770 = vmatprep.subr.bf16.mxu1 %v6962_v48  ;;  %v6548_v51 = vld [vmem:[%s9136_s4 + $0x268] sm:$0xff]  }
 0x1e5   :  { %5751 = vmatpush3.bf16.msra.mxu0 %v6499_v52  ;;  %5771 = vmatpush3.bf16.msra.mxu1 %v6500_v53  ;;  %v6549_v52 = vld [vmem:[%s9136_s4 + $0x230] sm:$0xff]  }
 0x1e6   :  { %5752 = vmatprep.subr.bf16.mxu0 %v6962_v48  ;;  %5772 = vmatprep.subr.bf16.mxu1 %v6962_v48  ;;  %v6550_v53 = vld [vmem:[%s9136_s4 + $0x270] sm:$0xff]  }
 0x1e9   :  { %5753 = vmatpush3.bf16.msra.mxu0 %v6501_v54  ;;  %5773 = vmatpush3.bf16.msra.mxu1 %v6502_v55  ;;  %v6551_v54 = vld [vmem:[%s9136_s4 + $0x238] sm:$0x1f]  }
 0x1ea   :  { %5754 = vmatprep.subr.bf16.mxu0 %v6962_v48  ;;  %5774 = vmatprep.subr.bf16.mxu1 %v6962_v48  ;;  %v6552_v55 = vld [vmem:[%s9136_s4 + $0x278] sm:$0x1f]   ;;  %v7599_v56 = vand.u32 %v6551_v54, %v7272_v25  ;;  %v6595_v54 = vld [vmem:[%s9136_s4 + $0x3a8] sm:$0xff]  }
 0x1eb   :  { %v7602_v57 = vand.u32 %v6552_v55, %v7272_v25  ;;  %v6596_v55 = vld [vmem:[%s9136_s4 + $0x3e8] sm:$0xff]  }
 0x1ed   :  { %5755 = vmatpush3.bf16.msra.mxu0 %v7359_v58  ;;  %5775 = vmatpush3.bf16.msra.mxu1 %v7362_v59 }
 0x1ee   :  { %5780 = vmatprep.subr.bf16.mxu0 %v6962_v48  ;;  %5800 = vmatprep.subr.bf16.mxu1 %v6962_v48 }
 0x1f0   :  { %5757 = vmatmul.mubr.msk.bf16.vlgmr.msra.gmra.mrb[12].mxu0 %vm748_vm6, %v7294_v40  ;;  %5777 = vmatmul.mubr.msk.bf16.vlgmr.msra.gmra.mrb[12].mxu1 %vm748_vm6, %v7294_v40 }
 0x1f1   :  { %5781 = vmatpush3.bf16.msra.mxu0 %v6505_v60  ;;  %5801 = vmatpush3.bf16.msra.mxu1 %v6506_v61  ;;  %v6553_v60 = vld [vmem:[%s9136_s4 + $0x280] sm:$0xff]  }
 0x1f2   :  { %5782 = vmatprep.subr.bf16.mxu0 %v6962_v48  ;;  %5802 = vmatprep.subr.bf16.mxu1 %v6962_v48  ;;  %v6554_v61 = vld [vmem:[%s9136_s4 + $0x2c0] sm:$0xff]  }
 0x1f3   :  { %5796 = vmatprep.mubr.msk.bf16.mxu0 %vm6964_vm5, %v6962_v48  ;;  %5816 = vmatprep.mubr.msk.bf16.mxu1 %vm6964_vm5, %v6962_v48 }
 0x1f5   :  { %5783 = vmatpush3.bf16.msra.mxu0 %v6507_v62  ;;  %5803 = vmatpush3.bf16.msra.mxu1 %v6508_v63  ;;  %v6555_v62 = vld [vmem:[%s9136_s4 + $0x288] sm:$0xff]  }
 0x1f6   :  { %5784 = vmatprep.subr.bf16.mxu0 %v6962_v48  ;;  %5804 = vmatprep.subr.bf16.mxu1 %v6962_v48  ;;  %v6556_v63 = vld [vmem:[%s9136_s4 + $0x2c8] sm:$0xff]  }
 0x1f9   :  { %5785 = vmatpush3.bf16.msra.mxu0 %v6509_v0  ;;  %5805 = vmatpush3.bf16.msra.mxu1 %v6510_v1  ;;  %v6557_v0 = vld [vmem:[%s9136_s4 + $0x290] sm:$0xff]  }
 0x1fa   :  { %5786 = vmatprep.subr.bf16.mxu0 %v6962_v48  ;;  %5806 = vmatprep.subr.bf16.mxu1 %v6962_v48  ;;  %v6558_v1 = vld [vmem:[%s9136_s4 + $0x2d0] sm:$0xff]  }
 0x1fd   :  { %5787 = vmatpush3.bf16.msra.mxu0 %v6511_v3  ;;  %5807 = vmatpush3.bf16.msra.mxu1 %v6512_v4  ;;  %v6559_v3 = vld [vmem:[%s9136_s4 + $0x298] sm:$0xff]  }
 0x1fe   :  { %5788 = vmatprep.subr.bf16.mxu0 %v6962_v48  ;;  %5808 = vmatprep.subr.bf16.mxu1 %v6962_v48  ;;  %v6560_v4 = vld [vmem:[%s9136_s4 + $0x2d8] sm:$0xff]  }
 0x201   :  { %5789 = vmatpush3.bf16.msra.mxu0 %v6513_v5  ;;  %5809 = vmatpush3.bf16.msra.mxu1 %v6514_v6  ;;  %v6561_v5 = vld [vmem:[%s9136_s4 + $0x2a0] sm:$0xff]  }
 0x202   :  { %5790 = vmatprep.subr.bf16.mxu0 %v6962_v48  ;;  %5810 = vmatprep.subr.bf16.mxu1 %v6962_v48  ;;  %v6562_v6 = vld [vmem:[%s9136_s4 + $0x2e0] sm:$0xff]  }
 0x205   :  { %5791 = vmatpush3.bf16.msra.mxu0 %v6515_v7  ;;  %5811 = vmatpush3.bf16.msra.mxu1 %v6516_v8  ;;  %v6563_v7 = vld [vmem:[%s9136_s4 + $0x2a8] sm:$0xff]  }
 0x206   :  { %5792 = vmatprep.subr.bf16.mxu0 %v6962_v48  ;;  %5812 = vmatprep.subr.bf16.mxu1 %v6962_v48  ;;  %v6564_v8 = vld [vmem:[%s9136_s4 + $0x2e8] sm:$0xff]  }
 0x209   :  { %5793 = vmatpush3.bf16.msra.mxu0 %v6517_v9  ;;  %5813 = vmatpush3.bf16.msra.mxu1 %v6518_v10  ;;  %v6565_v9 = vld [vmem:[%s9136_s4 + $0x2b0] sm:$0xff]  }
 0x20a   :  { %5794 = vmatprep.subr.bf16.mxu0 %v6962_v48  ;;  %5814 = vmatprep.subr.bf16.mxu1 %v6962_v48  ;;  %v6566_v10 = vld [vmem:[%s9136_s4 + $0x2f0] sm:$0xff]  }
 0x20d   :  { %5795 = vmatpush3.bf16.msra.mxu0 %v7439_v13  ;;  %5815 = vmatpush3.bf16.msra.mxu1 %v7442_v14 }
 0x20e   :  { %5820 = vmatprep.subr.bf16.mxu0 %v6962_v48  ;;  %5840 = vmatprep.subr.bf16.mxu1 %v6962_v48 }
 0x210   :  { %5797 = vmatmul.mubr.msk.bf16.vlgmr.msra.gmra.mrb[16].mxu0 %vm748_vm6, %v7294_v40  ;;  %5817 = vmatmul.mubr.msk.bf16.vlgmr.msra.gmra.mrb[16].mxu1 %vm748_vm6, %v7294_v40 }
 0x211   :  { %5821 = vmatpush3.bf16.msra.mxu0 %v6521_v15  ;;  %5841 = vmatpush3.bf16.msra.mxu1 %v6522_v16  ;;  %v7679_v15 = vand.u32 %v6567_v11, %v7272_v25  ;;  %v7682_v16 = vand.u32 %v6568_v12, %v7272_v25 }
 0x212   :  { %5822 = vmatprep.subr.bf16.mxu0 %v6962_v48  ;;  %5842 = vmatprep.subr.bf16.mxu1 %v6962_v48 }
 0x213   :  { %5836 = vmatprep.mubr.msk.bf16.mxu0 %vm6964_vm5, %v6962_v48  ;;  %5856 = vmatprep.mubr.msk.bf16.mxu1 %vm6964_vm5, %v6962_v48 }
 0x215   :  { %5823 = vmatpush3.bf16.msra.mxu0 %v6523_v17  ;;  %5843 = vmatpush3.bf16.msra.mxu1 %v6524_v18  ;;  %v6569_v17 = vld [vmem:[%s9136_s4 + $0x300] sm:$0xff]  }
 0x216   :  { %5824 = vmatprep.subr.bf16.mxu0 %v6962_v48  ;;  %5844 = vmatprep.subr.bf16.mxu1 %v6962_v48  ;;  %v6570_v18 = vld [vmem:[%s9136_s4 + $0x340] sm:$0xff]  }
 0x219   :  { %5825 = vmatpush3.bf16.msra.mxu0 %v6525_v19  ;;  %5845 = vmatpush3.bf16.msra.mxu1 %v6526_v20  ;;  %v6571_v19 = vld [vmem:[%s9136_s4 + $0x308] sm:$0xff]  }
 0x21a   :  { %5826 = vmatprep.subr.bf16.mxu0 %v6962_v48  ;;  %5846 = vmatprep.subr.bf16.mxu1 %v6962_v48  ;;  %v6572_v20 = vld [vmem:[%s9136_s4 + $0x348] sm:$0xff]  }
 0x21d   :  { %5827 = vmatpush3.bf16.msra.mxu0 %v6527_v21  ;;  %5847 = vmatpush3.bf16.msra.mxu1 %v6528_v22  ;;  %v6573_v21 = vld [vmem:[%s9136_s4 + $0x310] sm:$0xff]  }
 0x21e   :  { %5828 = vmatprep.subr.bf16.mxu0 %v6962_v48  ;;  %5848 = vmatprep.subr.bf16.mxu1 %v6962_v48  ;;  %v6574_v22 = vld [vmem:[%s9136_s4 + $0x350] sm:$0xff]  }
 0x221   :  { %5829 = vmatpush3.bf16.msra.mxu0 %v6529_v23  ;;  %5849 = vmatpush3.bf16.msra.mxu1 %v6530_v24  ;;  %v6575_v23 = vld [vmem:[%s9136_s4 + $0x318] sm:$0xff]  }
 0x222   :  { %5830 = vmatprep.subr.bf16.mxu0 %v6962_v48  ;;  %5850 = vmatprep.subr.bf16.mxu1 %v6962_v48  ;;  %v6576_v24 = vld [vmem:[%s9136_s4 + $0x358] sm:$0xff]  }
 0x225   :  { %5831 = vmatpush3.bf16.msra.mxu0 %v6531_v28  ;;  %5851 = vmatpush3.bf16.msra.mxu1 %v6532_v29  ;;  %v6577_v28 = vld [vmem:[%s9136_s4 + $0x320] sm:$0xff]  }
 0x226   :  { %5832 = vmatprep.subr.bf16.mxu0 %v6962_v48  ;;  %5852 = vmatprep.subr.bf16.mxu1 %v6962_v48  ;;  %v6578_v29 = vld [vmem:[%s9136_s4 + $0x360] sm:$0xff]  }
 0x229   :  { %5833 = vmatpush3.bf16.msra.mxu0 %v6533_v30  ;;  %5853 = vmatpush3.bf16.msra.mxu1 %v6534_v31  ;;  %v6579_v30 = vld [vmem:[%s9136_s4 + $0x328] sm:$0xff]  }
 0x22a   :  { %5834 = vmatprep.subr.bf16.mxu0 %v6962_v48  ;;  %5854 = vmatprep.subr.bf16.mxu1 %v6962_v48  ;;  %v6580_v31 = vld [vmem:[%s9136_s4 + $0x368] sm:$0xff]  }
 0x22d   :  { %5835 = vmatpush3.bf16.msra.mxu0 %v7519_v34  ;;  %5855 = vmatpush3.bf16.msra.mxu1 %v7522_v35 }
 0x22e   :  { %5860 = vmatprep.subr.bf16.mxu0 %v6962_v48  ;;  %5880 = vmatprep.subr.bf16.mxu1 %v6962_v48 }
 0x230   :  { %5837 = vmatmul.mubr.msk.bf16.vlgmr.msra.gmra.mrb[20].mxu0 %vm748_vm6, %v7294_v40  ;;  %5857 = vmatmul.mubr.msk.bf16.vlgmr.msra.gmra.mrb[20].mxu1 %vm748_vm6, %v7294_v40 }
 0x231   :  { %5861 = vmatpush3.bf16.msra.mxu0 %v6537_v36  ;;  %5881 = vmatpush3.bf16.msra.mxu1 %v6538_v37  ;;  %v6583_v36 = vld [vmem:[%s9136_s4 + $0x338] sm:$0x1f]  }
 0x232   :  { %5862 = vmatprep.subr.bf16.mxu0 %v6962_v48  ;;  %5882 = vmatprep.subr.bf16.mxu1 %v6962_v48  ;;  %v6584_v37 = vld [vmem:[%s9136_s4 + $0x378] sm:$0x1f]  }
 0x233   :  { %5876 = vmatprep.mubr.msk.bf16.mxu0 %vm6964_vm5, %v6962_v48  ;;  %5896 = vmatprep.mubr.msk.bf16.mxu1 %vm6964_vm5, %v6962_v48 }
 0x235   :  { %5863 = vmatpush3.bf16.msra.mxu0 %v6539_v38  ;;  %5883 = vmatpush3.bf16.msra.mxu1 %v6540_v39  ;;  %v7759_v38 = vand.u32 %v6583_v36, %v7272_v25  ;;  %v7762_v39 = vand.u32 %v6584_v37, %v7272_v25 }
 0x236   :  { %5864 = vmatprep.subr.bf16.mxu0 %v6962_v48  ;;  %5884 = vmatprep.subr.bf16.mxu1 %v6962_v48 }
 0x239   :  { %5865 = vmatpush3.bf16.msra.mxu0 %v6541_v41  ;;  %5885 = vmatpush3.bf16.msra.mxu1 %v6542_v42  ;;  %v6585_v41 = vld [vmem:[%s9136_s4 + $0x380] sm:$0xff]  }
 0x23a   :  { %5866 = vmatprep.subr.bf16.mxu0 %v6962_v48  ;;  %5886 = vmatprep.subr.bf16.mxu1 %v6962_v48  ;;  %v6586_v42 = vld [vmem:[%s9136_s4 + $0x3c0] sm:$0xff]  }
 0x23d   :  { %5867 = vmatpush3.bf16.msra.mxu0 %v6543_v43  ;;  %5887 = vmatpush3.bf16.msra.mxu1 %v6544_v44  ;;  %v6587_v43 = vld [vmem:[%s9136_s4 + $0x388] sm:$0xff]  }
 0x23e   :  { %5868 = vmatprep.subr.bf16.mxu0 %v6962_v48  ;;  %5888 = vmatprep.subr.bf16.mxu1 %v6962_v48  ;;  %v6588_v44 = vld [vmem:[%s9136_s4 + $0x3c8] sm:$0xff]  }
 0x241   :  { %5869 = vmatpush3.bf16.msra.mxu0 %v6545_v45  ;;  %5889 = vmatpush3.bf16.msra.mxu1 %v6546_v46  ;;  %v6589_v45 = vld [vmem:[%s9136_s4 + $0x390] sm:$0xff]  }
 0x242   :  { %5870 = vmatprep.subr.bf16.mxu0 %v6962_v48  ;;  %5890 = vmatprep.subr.bf16.mxu1 %v6962_v48  ;;  %v6590_v46 = vld [vmem:[%s9136_s4 + $0x3d0] sm:$0xff]  }
 0x245   :  { %5871 = vmatpush3.bf16.msra.mxu0 %v6547_v50  ;;  %5891 = vmatpush3.bf16.msra.mxu1 %v6548_v51  ;;  %v6591_v50 = vld [vmem:[%s9136_s4 + $0x398] sm:$0xff]  }
 0x246   :  { %5872 = vmatprep.subr.bf16.mxu0 %v6962_v48  ;;  %5892 = vmatprep.subr.bf16.mxu1 %v6962_v48  ;;  %v6592_v51 = vld [vmem:[%s9136_s4 + $0x3d8] sm:$0xff]  }
 0x249   :  { %5873 = vmatpush3.bf16.msra.mxu0 %v6549_v52  ;;  %5893 = vmatpush3.bf16.msra.mxu1 %v6550_v53  ;;  %v6593_v52 = vld [vmem:[%s9136_s4 + $0x3a0] sm:$0xff]  }
 0x24a   :  { %5874 = vmatprep.subr.bf16.mxu0 %v6962_v48  ;;  %5894 = vmatprep.subr.bf16.mxu1 %v6962_v48  ;;  %v6594_v53 = vld [vmem:[%s9136_s4 + $0x3e0] sm:$0xff]  }
 0x24d   :  { %5875 = vmatpush3.bf16.msra.mxu0 %v7599_v56  ;;  %5895 = vmatpush3.bf16.msra.mxu1 %v7602_v57 }
 0x24e   :  { %5900 = vmatprep.subr.bf16.mxu0 %v6962_v48  ;;  %5920 = vmatprep.subr.bf16.mxu1 %v6962_v48 }
 0x250   :  { %5877 = vmatmul.mubr.msk.bf16.vlgmr.msra.gmra.mrb[24].mxu0 %vm748_vm6, %v7294_v40  ;;  %5897 = vmatmul.mubr.msk.bf16.vlgmr.msra.gmra.mrb[24].mxu1 %vm748_vm6, %v7294_v40 }
 0x251   :  { %5901 = vmatpush3.bf16.msra.mxu0 %v6553_v60  ;;  %5921 = vmatpush3.bf16.msra.mxu1 %v6554_v61 }
 0x252   :  { %5902 = vmatprep.subr.bf16.mxu0 %v6962_v48  ;;  %5922 = vmatprep.subr.bf16.mxu1 %v6962_v48 }
 0x253   :  { %5916 = vmatprep.mubr.msk.bf16.mxu0 %vm6964_vm5, %v6962_v48  ;;  %5936 = vmatprep.mubr.msk.bf16.mxu1 %vm6964_vm5, %v6962_v48 }
 0x255   :  { %5903 = vmatpush3.bf16.msra.mxu0 %v6555_v62  ;;  %5923 = vmatpush3.bf16.msra.mxu1 %v6556_v63 }
 0x256   :  { %5904 = vmatprep.subr.bf16.mxu0 %v6962_v48  ;;  %5924 = vmatprep.subr.bf16.mxu1 %v6962_v48 }
 0x259   :  { %5905 = vmatpush3.bf16.msra.mxu0 %v6557_v0  ;;  %5925 = vmatpush3.bf16.msra.mxu1 %v6558_v1  ;;  %v6597_v1 = vld [vmem:[%s9136_s4 + $0x3b0] sm:$0xff]  }
 0x25a   :  { %5906 = vmatprep.subr.bf16.mxu0 %v6962_v48  ;;  %5926 = vmatprep.subr.bf16.mxu1 %v6962_v48 }
 0x25d   :  { %5907 = vmatpush3.bf16.msra.mxu0 %v6559_v3  ;;  %5927 = vmatpush3.bf16.msra.mxu1 %v6560_v4  ;;  %v6598_v3 = vld [vmem:[%s9136_s4 + $0x3f0] sm:$0xff]  }
 0x25e   :  { %5908 = vmatprep.subr.bf16.mxu0 %v6962_v48  ;;  %5928 = vmatprep.subr.bf16.mxu1 %v6962_v48 }
 0x261   :  { %5909 = vmatpush3.bf16.msra.mxu0 %v6561_v5  ;;  %5929 = vmatpush3.bf16.msra.mxu1 %v6562_v6  ;;  %v6599_v6 = vld [vmem:[%s9136_s4 + $0x3b8] sm:$0x1f]  }
 0x262   :  { %5910 = vmatprep.subr.bf16.mxu0 %v6962_v48  ;;  %5930 = vmatprep.subr.bf16.mxu1 %v6962_v48 }
 0x265   :  { %5911 = vmatpush3.bf16.msra.mxu0 %v6563_v7  ;;  %5931 = vmatpush3.bf16.msra.mxu1 %v6564_v8  ;;  %v6600_v7 = vld [vmem:[%s9136_s4 + $0x3f8] sm:$0x1f]  }
 0x266   :  { %5912 = vmatprep.subr.bf16.mxu0 %v6962_v48  ;;  %5932 = vmatprep.subr.bf16.mxu1 %v6962_v48 }
 0x269   :  { %5913 = vmatpush3.bf16.msra.mxu0 %v6565_v9  ;;  %5933 = vmatpush3.bf16.msra.mxu1 %v6566_v10 }
 0x26a   :  { %5914 = vmatprep.subr.bf16.mxu0 %v6962_v48  ;;  %5934 = vmatprep.subr.bf16.mxu1 %v6962_v48 }
 0x26d   :  { %5915 = vmatpush3.bf16.msra.mxu0 %v7679_v15  ;;  %5935 = vmatpush3.bf16.msra.mxu1 %v7682_v16 }
 0x26e   :  { %5940 = vmatprep.subr.bf16.mxu0 %v6962_v48  ;;  %5960 = vmatprep.subr.bf16.mxu1 %v6962_v48 }
 0x270   :  { %5917 = vmatmul.mubr.msk.bf16.vlgmr.msra.gmra.mrb[28].mxu0 %vm748_vm6, %v7294_v40  ;;  %5937 = vmatmul.mubr.msk.bf16.vlgmr.msra.gmra.mrb[28].mxu1 %vm748_vm6, %v7294_v40 }
 0x271   :  { %5941 = vmatpush3.bf16.msra.mxu0 %v6569_v17  ;;  %5961 = vmatpush3.bf16.msra.mxu1 %v6570_v18  ;;  %v7840_v17 = vand.u32 %v6599_v6, %v7272_v25  ;;  %v7843_v18 = vand.u32 %v6600_v7, %v7272_v25 }
 0x272   :  { %5942 = vmatprep.subr.bf16.mxu0 %v6962_v48  ;;  %5962 = vmatprep.subr.bf16.mxu1 %v6962_v48 }
 0x273   :  { %5956 = vmatprep.mubr.msk.bf16.mxu0 %vm6964_vm5, %v6962_v48  ;;  %5976 = vmatprep.mubr.msk.bf16.mxu1 %vm6964_vm5, %v6962_v48 }
 0x275   :  { %5943 = vmatpush3.bf16.msra.mxu0 %v6571_v19  ;;  %5963 = vmatpush3.bf16.msra.mxu1 %v6572_v20 }
 0x276   :  { %5944 = vmatprep.subr.bf16.mxu0 %v6962_v48  ;;  %5964 = vmatprep.subr.bf16.mxu1 %v6962_v48 }
 0x279   :  { %5945 = vmatpush3.bf16.msra.mxu0 %v6573_v21  ;;  %5965 = vmatpush3.bf16.msra.mxu1 %v6574_v22 }
 0x27a   :  { %5946 = vmatprep.subr.bf16.mxu0 %v6962_v48  ;;  %5966 = vmatprep.subr.bf16.mxu1 %v6962_v48 }
 0x27d   :  { %5947 = vmatpush3.bf16.msra.mxu0 %v6575_v23  ;;  %5967 = vmatpush3.bf16.msra.mxu1 %v6576_v24 }
 0x27e   :  { %5948 = vmatprep.subr.bf16.mxu0 %v6962_v48  ;;  %5968 = vmatprep.subr.bf16.mxu1 %v6962_v48 }
 0x281   :  { %5949 = vmatpush3.bf16.msra.mxu0 %v6577_v28  ;;  %5969 = vmatpush3.bf16.msra.mxu1 %v6578_v29 }
 0x282   :  { %5950 = vmatprep.subr.bf16.mxu0 %v6962_v48  ;;  %5970 = vmatprep.subr.bf16.mxu1 %v6962_v48 }
 0x285   :  { %5951 = vmatpush3.bf16.msra.mxu0 %v6579_v30  ;;  %5971 = vmatpush3.bf16.msra.mxu1 %v6580_v31 }
 0x286   :  { %5952 = vmatprep.subr.bf16.mxu0 %v6962_v48  ;;  %5972 = vmatprep.subr.bf16.mxu1 %v6962_v48 }
 0x289   :  { %5953 = vmatpush3.bf16.msra.mxu0 %v6581_v32  ;;  %5973 = vmatpush3.bf16.msra.mxu1 %v6582_v33 }
 0x28a   :  { %5954 = vmatprep.subr.bf16.mxu0 %v6962_v48  ;;  %5974 = vmatprep.subr.bf16.mxu1 %v6962_v48 }
 0x28d   :  { %5955 = vmatpush3.bf16.msra.mxu0 %v7759_v38  ;;  %5975 = vmatpush3.bf16.msra.mxu1 %v7762_v39 }
 0x28e   :  { %5980 = vmatprep.subr.bf16.mxu0 %v6962_v48  ;;  %6000 = vmatprep.subr.bf16.mxu1 %v6962_v48 }
 0x290   :  { %5957 = vmatmul.mubr.msk.bf16.vlgmr.msra.gmra.mrb[32].mxu0 %vm748_vm6, %v7294_v40  ;;  %5977 = vmatmul.mubr.msk.bf16.vlgmr.msra.gmra.mrb[32].mxu1 %vm748_vm6, %v7294_v40 }
 0x291   :  { %5981 = vmatpush3.bf16.msra.mxu0 %v6585_v41  ;;  %6001 = vmatpush3.bf16.msra.mxu1 %v6586_v42 }
 0x292   :  { %5982 = vmatprep.subr.bf16.mxu0 %v6962_v48  ;;  %6002 = vmatprep.subr.bf16.mxu1 %v6962_v48 }
 0x293   :  { %5996 = vmatprep.mubr.msk.bf16.mxu0 %vm6964_vm5, %v6962_v48  ;;  %6016 = vmatprep.mubr.msk.bf16.mxu1 %vm6964_vm5, %v6962_v48 }
 0x295   :  { %5983 = vmatpush3.bf16.msra.mxu0 %v6587_v43  ;;  %6003 = vmatpush3.bf16.msra.mxu1 %v6588_v44 }
 0x296   :  { %5984 = vmatprep.subr.bf16.mxu0 %v6962_v48  ;;  %6004 = vmatprep.subr.bf16.mxu1 %v6962_v48 }
 0x299   :  { %5985 = vmatpush3.bf16.msra.mxu0 %v6589_v45  ;;  %6005 = vmatpush3.bf16.msra.mxu1 %v6590_v46 }
 0x29a   :  { %5986 = vmatprep.subr.bf16.mxu0 %v6962_v48  ;;  %6006 = vmatprep.subr.bf16.mxu1 %v6962_v48 }
 0x29d   :  { %5987 = vmatpush3.bf16.msra.mxu0 %v6591_v50  ;;  %6007 = vmatpush3.bf16.msra.mxu1 %v6592_v51 }
 0x29e   :  { %5988 = vmatprep.subr.bf16.mxu0 %v6962_v48  ;;  %6008 = vmatprep.subr.bf16.mxu1 %v6962_v48 }
 0x2a1   :  { %5989 = vmatpush3.bf16.msra.mxu0 %v6593_v52  ;;  %6009 = vmatpush3.bf16.msra.mxu1 %v6594_v53 }
 0x2a2   :  { %5990 = vmatprep.subr.bf16.mxu0 %v6962_v48  ;;  %6010 = vmatprep.subr.bf16.mxu1 %v6962_v48 }
 0x2a3   :  { %v793_v60 = vpop.f32.mrb[8].mxu0  ;;  %v901_v61 = vpop.f32.mrb[8].mxu1 }
 0x2a4   :  { %v907_v62 = vpack.c.bf16 %v901_v61, %v901_v61  ;;  %v5718_v63 = vpop.f32.mrb[9].mxu0  ;;  %v5738_v0 = vpop.f32.mrb[9].mxu1  ;;  %v799_v8 = vpack.c.bf16 %v793_v60, %v793_v60 }
 0x2a5   :  { %5991 = vmatpush3.bf16.msra.mxu0 %v6595_v54  ;;  %6011 = vmatpush3.bf16.msra.mxu1 %v6596_v55  ;;  %v796_v4 = vpop.f32.mrb[10].mxu0  ;;  %v904_v5 = vpop.f32.mrb[10].mxu1 }
 0x2a6   :  { %v2421_v9 = vrot.slane %v907_v62, 4  ;;  %v5719_v10 = vpop.f32.mrb[11].mxu0  ;;  %v5739_v11 = vpop.f32.mrb[11].mxu1  ;;  %5992 = vmatprep.subr.bf16.mxu0 %v6962_v48  ;;  %6012 = vmatprep.subr.bf16.mxu1 %v6962_v48  ;;  %v112_v5 = vld [vmem:[%s9138_s6 + $0x8] sm:$0xff] }
 0x2a7   :  { %2475 = vperm.xlu1 %6423, %v112_v5  }
 0x2a8   :  { %v2438_v12 = vsel %vm752_vm3, %v799_v8, %v2421_v9 }
 0x2a9   :  { %5993 = vmatpush3.bf16.msra.mxu0 %v6597_v1  ;;  %6013 = vmatpush3.bf16.msra.mxu1 %v6598_v3 }
 0x2aa   :  { %5994 = vmatprep.subr.bf16.mxu0 %v6962_v48  ;;  %6014 = vmatprep.subr.bf16.mxu1 %v6962_v48 }
 0x2ad   :  { %5995 = vmatpush3.bf16.msra.mxu0 %v7840_v17  ;;  %6015 = vmatpush3.bf16.msra.mxu1 %v7843_v18 }
 0x2ae   :  { %6020 = vmatprep.subr.bf16.mxu0 %v6962_v48 }
 0x2b0   :  { %5997 = vmatmul.mubr.msk.bf16.vlgmr.msra.gmra.mrb[36].mxu0 %vm748_vm6, %v7294_v40  ;;  %6017 = vmatmul.mubr.msk.bf16.vlgmr.msra.gmra.mrb[36].mxu1 %vm748_vm6, %v7294_v40 }
 0x2b1   :  { %6021 = vmatpush3.bf16.msra.mxu0 %v2438_v12  ;;  %6036 = vmatprep.mubr.msk.bf16.mxu0 %vm6964_vm5, %v6962_v48 }
 0x2b2   :  { %6022 = vmatprep.subr.bf16.mxu0 %v6962_v48 }
 0x2c3   :  { %v1009_v25 = vpop.f32.mrb[12].mxu0  ;;  %v1117_v19 = vpop.f32.mrb[12].mxu1 }
 0x2c4   :  { %v1123_v20 = vpack.c.bf16 %v1117_v19, %v1117_v19  ;;  %v5758_v21 = vpop.f32.mrb[13].mxu0  ;;  %v5778_v22 = vpop.f32.mrb[13].mxu1  ;;  %v1015_v28 = vpack.c.bf16 %v1009_v25, %v1009_v25 }
 0x2c5   :  { %v1012_v23 = vpop.f32.mrb[14].mxu0  ;;  %v1120_v24 = vpop.f32.mrb[14].mxu1 }
 0x2c6   :  { %v2423_v29 = vrot.slane %v1123_v20, 4  ;;  %v5759_v30 = vpop.f32.mrb[15].mxu0  ;;  %v5779_v31 = vpop.f32.mrb[15].mxu1 }
 0x2c8   :  { %v2442_v32 = vsel %vm752_vm3, %v1015_v28, %v2423_v29 }
 0x2c9   :  { %6023 = vmatpush3.bf16.msra.mxu0 %v2442_v32 }
 0x2ca   :  { %6024 = vmatprep.subr.bf16.mxu0 %v6962_v48 }
 0x2e3   :  { %v1225_v40 = vpop.f32.mrb[16].mxu0  ;;  %v1333_v33 = vpop.f32.mrb[16].mxu1 }
 0x2e4   :  { %v1339_v36 = vpack.c.bf16 %v1333_v33, %v1333_v33  ;;  %v5798_v37 = vpop.f32.mrb[17].mxu0  ;;  %v5818_v41 = vpop.f32.mrb[17].mxu1  ;;  %v1231_v44 = vpack.c.bf16 %v1225_v40, %v1225_v40 }
 0x2e5   :  { %v1228_v42 = vpop.f32.mrb[18].mxu0  ;;  %v1336_v43 = vpop.f32.mrb[18].mxu1 }
 0x2e6   :  { %v2425_v45 = vrot.slane %v1339_v36, 4  ;;  %v5799_v46 = vpop.f32.mrb[19].mxu0  ;;  %v5819_v50 = vpop.f32.mrb[19].mxu1 }
 0x2e8   :  { %v2446_v51 = vsel %vm752_vm3, %v1231_v44, %v2425_v45 }
 0x2e9   :  { %6025 = vmatpush3.bf16.msra.mxu0 %v2446_v51 }
 0x2ea   :  { %6026 = vmatprep.subr.bf16.mxu0 %v6962_v48 }
 0x303   :  { %v1441_v52 = vpop.f32.mrb[20].mxu0  ;;  %v1549_v53 = vpop.f32.mrb[20].mxu1 }
 0x304   :  { %v1555_v54 = vpack.c.bf16 %v1549_v53, %v1549_v53  ;;  %v5838_v55 = vpop.f32.mrb[21].mxu0  ;;  %v5858_v60 = vpop.f32.mrb[21].mxu1  ;;  %v1447_v63 = vpack.c.bf16 %v1441_v52, %v1441_v52 }
 0x305   :  { %v1444_v61 = vpop.f32.mrb[22].mxu0  ;;  %v1552_v62 = vpop.f32.mrb[22].mxu1 }
 0x306   :  { %v2427_v0 = vrot.slane %v1555_v54, 4  ;;  %v5839_v1 = vpop.f32.mrb[23].mxu0  ;;  %v5859_v3 = vpop.f32.mrb[23].mxu1 }
 0x308   :  { %v2450_v4 = vsel %vm752_vm3, %v1447_v63, %v2427_v0 }
 0x309   :  { %6027 = vmatpush3.bf16.msra.mxu0 %v2450_v4 }
 0x30a   :  { %6028 = vmatprep.subr.bf16.mxu0 %v6962_v48 }
 0x323   :  { %v1657_v6 = vpop.f32.mrb[24].mxu0  ;;  %v1765_v7 = vpop.f32.mrb[24].mxu1 }
 0x324   :  { %v1771_v8 = vpack.c.bf16 %v1765_v7, %v1765_v7  ;;  %v5878_v9 = vpop.f32.mrb[25].mxu0  ;;  %v5898_v10 = vpop.f32.mrb[25].mxu1  ;;  %v1663_v25 = vpack.c.bf16 %v1657_v6, %v1657_v6 }
 0x325   :  { %v1660_v11 = vpop.f32.mrb[26].mxu0  ;;  %v1768_v12 = vpop.f32.mrb[26].mxu1  ;;  %v6601_v10 = vld [vmem:[%s9137_s5] sm:$0xff]  }
 0x326   :  { %v2429_v19 = vrot.slane %v1771_v8, 4  ;;  %v5879_v20 = vpop.f32.mrb[27].mxu0  ;;  %v5899_v21 = vpop.f32.mrb[27].mxu1  ;;  %v6602_v11 = vld [vmem:[%s9139_s7 + $0x40] sm:$0xff]  }
 0x327   :  { %v6603_v12 = vld [vmem:[%s9139_s7] sm:$0xff]   ;;  %5333 = vmatprep.subr.bf16.mxu1 %v6602_v11  ;;  %v6609_v21 = vld [vmem:[%s9139_s7 + $0xc8] sm:$0xff]  }
 0x328   :  { %v2454_v22 = vsel %vm752_vm3, %v1663_v25, %v2429_v19  ;;  %v6604_v25 = vld [vmem:[%s9139_s7 + $0x48] sm:$0xff]   ;;  %v6605_v19 = vld [vmem:[%s9139_s7 + $0xc0] sm:$0xff]   ;;  %5334 = vmatpush3.bf16.msra.mxu1 %v6603_v12 }
 0x329   :  { %6029 = vmatpush3.bf16.msra.mxu0 %v2454_v22  ;;  %v6607_v20 = vld [vmem:[%s9139_s7 + $0x80] sm:$0xff]   ;;  %v6606_v22 = vld [vmem:[%s9139_s7 + $0x8] sm:$0xff]   ;;  %5335 = vmatprep.subr.bf16.mxu1 %v6604_v25 }
 0x32a   :  { %6030 = vmatprep.subr.bf16.mxu0 %v6962_v48 }
 0x32c   :  { %5336 = vmatpush3.bf16.msra.mxu1 %v6606_v22 }
 0x343   :  { %v1873_v23 = vpop.f32.mrb[28].mxu0  ;;  %v1981_v24 = vpop.f32.mrb[28].mxu1 }
 0x344   :  { %v1987_v28 = vpack.c.bf16 %v1981_v24, %v1981_v24  ;;  %v5918_v29 = vpop.f32.mrb[29].mxu0  ;;  %v5938_v30 = vpop.f32.mrb[29].mxu1  ;;  %v1879_v40 = vpack.c.bf16 %v1873_v23, %v1873_v23  ;;  %v6608_v23 = vld [vmem:[%s9139_s7 + $0x50] sm:$0xff]   ;;  %v6611_v24 = vld [vmem:[%s9139_s7 + $0x88] sm:$0xff]  }
 0x345   :  { %v1876_v31 = vpop.f32.mrb[30].mxu0  ;;  %v1984_v32 = vpop.f32.mrb[30].mxu1  ;;  %v6610_v29 = vld [vmem:[%s9139_s7 + $0x10] sm:$0xff]   ;;  %5337 = vmatprep.subr.bf16.mxu1 %v6608_v23  ;;  %v6612_v30 = vld [vmem:[%s9139_s7 + $0x58] sm:$0xff]  }
 0x346   :  { %v2431_v33 = vrot.slane %v1987_v28, 4  ;;  %v5919_v36 = vpop.f32.mrb[31].mxu0  ;;  %v5939_v37 = vpop.f32.mrb[31].mxu1  ;;  %v6613_v28 = vld [vmem:[%s9139_s7 + $0xd0] sm:$0xff]   ;;  %v6617_v32 = vld [vmem:[%s9139_s7 + $0xd8] sm:$0xff]   ;;  %5338 = vmatpush3.bf16.msra.mxu1 %v6610_v29 }
 0x347   :  { %v6615_v31 = vld [vmem:[%s9139_s7 + $0x90] sm:$0xff]   ;;  %5339 = vmatprep.subr.bf16.mxu1 %v6612_v30  ;;  %v6619_v36 = vld [vmem:[%s9139_s7 + $0x98] sm:$0xff]   ;;  %v6621_v37 = vld [vmem:[%s9139_s7 + $0xe0] sm:$0xff]  }
 0x348   :  { %v2458_v41 = vsel %vm752_vm3, %v1879_v40, %v2431_v33  ;;  %v6614_v40 = vld [vmem:[%s9139_s7 + $0x18] sm:$0xff]   ;;  %v6616_v33 = vld [vmem:[%s9139_s7 + $0x60] sm:$0xff]  }
 0x349   :  { %6031 = vmatpush3.bf16.msra.mxu0 %v2458_v41  ;;  %v6618_v41 = vld [vmem:[%s9139_s7 + $0x20] sm:$0xff]  }
 0x34a   :  { %6032 = vmatprep.subr.bf16.mxu0 %v6962_v48  ;;  %5340 = vmatpush3.bf16.msra.mxu1 %v6614_v40  ;;  %v6637_v40 = vld [vmem:[%s9139_s7 + $0x148] sm:$0xff]  }
 0x34b   :  { %5341 = vmatprep.subr.bf16.mxu1 %v6616_v33 }
 0x34e   :  { %5342 = vmatpush3.bf16.msra.mxu1 %v6618_v41 }
 0x363   :  { %v2089_v42 = vpop.f32.mrb[32].mxu0  ;;  %v2197_v43 = vpop.f32.mrb[32].mxu1 }
 0x364   :  { %v2203_v44 = vpack.c.bf16 %v2197_v43, %v2197_v43  ;;  %v5958_v45 = vpop.f32.mrb[33].mxu0  ;;  %v5978_v46 = vpop.f32.mrb[33].mxu1  ;;  %v2095_v52 = vpack.c.bf16 %v2089_v42, %v2089_v42  ;;  %v6620_v42 = vld [vmem:[%s9139_s7 + $0x68] sm:$0xff]   ;;  %v6623_v43 = vld [vmem:[%s9139_s7 + $0xa0] sm:$0xff]  }
 0x365   :  { %v2092_v50 = vpop.f32.mrb[34].mxu0  ;;  %v2200_v51 = vpop.f32.mrb[34].mxu1  ;;  %v6622_v45 = vld [vmem:[%s9139_s7 + $0x28] sm:$0xff]   ;;  %5343 = vmatprep.subr.bf16.mxu1 %v6620_v42  ;;  %v6624_v46 = vld [vmem:[%s9139_s7 + $0x70] sm:$0xff]  }
 0x366   :  { %v2433_v53 = vrot.slane %v2203_v44, 4  ;;  %v5959_v54 = vpop.f32.mrb[35].mxu0  ;;  %v5979_v55 = vpop.f32.mrb[35].mxu1  ;;  %v6625_v44 = vld [vmem:[%s9139_s7 + $0xe8] sm:$0xff]   ;;  %v6629_v51 = vld [vmem:[%s9139_s7 + $0xf0] sm:$0xff]   ;;  %5344 = vmatpush3.bf16.msra.mxu1 %v6622_v45 }
 0x367   :  { %v6627_v50 = vld [vmem:[%s9139_s7 + $0xa8] sm:$0xff]   ;;  %5345 = vmatprep.subr.bf16.mxu1 %v6624_v46  ;;  %v7960_v54 = vpop.permute.xlu0 %2470  ;;  %v6640_v46 = vld [vmem:[%s9139_s7 + $0x150] sm:$0xff]  }
 0x368   :  { %v2462_v60 = vsel %vm752_vm3, %v2095_v52, %v2433_v53  ;;  %v6626_v52 = vld [vmem:[%s9139_s7 + $0x30] sm:$0xff]   ;;  %v6628_v53 = vld [vmem:[%s9139_s7 + $0x78] sm:$0xff]  }
 0x369   :  { %6033 = vmatpush3.bf16.msra.mxu0 %v2462_v60  ;;  %v7962_v60 = vpop.permute.xlu1 %2475 }
 0x36a   :  { %6034 = vmatprep.subr.bf16.mxu0 %v6962_v48  ;;  %5346 = vmatpush3.bf16.msra.mxu1 %v6626_v52 }
 0x36b   :  { %5347 = vmatprep.subr.bf16.mxu1 %v6628_v53 }
 0x383   :  { %v2305_v61 = vpop.f32.mrb[36].mxu0  ;;  %v2413_v62 = vpop.f32.mrb[36].mxu1 }
 0x384   :  { %v2419_v63 = vpack.c.bf16 %v2413_v62, %v2413_v62  ;;  %v5998_v0 = vpop.f32.mrb[37].mxu0  ;;  %v6018_v1 = vpop.f32.mrb[37].mxu1  ;;  %v2311_v5 = vpack.c.bf16 %v2305_v61, %v2305_v61 }
 0x385   :  { %v2308_v3 = vpop.f32.mrb[38].mxu0  ;;  %v2416_v4 = vpop.f32.mrb[38].mxu1 }
 0x386   :  { %v2435_v6 = vrot.slane %v2419_v63, 4  ;;  %v5999_v7 = vpop.f32.mrb[39].mxu0  ;;  %v6019_v8 = vpop.f32.mrb[39].mxu1  ;;  %v6630_v3 = vld [vmem:[%s9139_s7 + $0x38] sm:$0xff]   ;;  %v6631_v4 = vld [vmem:[%s9139_s7 + $0xb0] sm:$0xff]  }
 0x387   :  { %5348 = vmatpush3.bf16.msra.mxu1 %v6630_v3  ;;  %v6634_v7 = vld [vmem:[%s9139_s7 + $0xb8] sm:$0xff]   ;;  %v6636_v8 = vld [vmem:[%s9139_s7 + $0x1c0] sm:$0xff]  }
 0x388   :  { %v2466_v9 = vsel %vm752_vm3, %v2311_v5, %v2435_v6  ;;  %v6632_v5 = vld [vmem:[%s9139_s7 + $0xf8] sm:$0xff]   ;;  %v6633_v6 = vld [vmem:[%s9139_s7 + $0x140] sm:$0xff]  }
 0x389   :  { %6035 = vmatpush3.bf16.msra.mxu0 %v2466_v9  ;;  %5377 = vmatprep.subr.bf16.mxu1 %v6633_v6 }
 0x38a   :  { %5355 = vmatprep.subr.bf16.mxu0 %v6605_v19 }
 0x38c   :  { %6037 = vmatmul.mubr.bf16.vlgmr.msra.gmra.mrb[40].mxu0 %v6601_v10 }
 0x38d   :  { %5356 = vmatpush3.bf16.msra.mxu0 %v6607_v20 }
 0x38e   :  { %5357 = vmatprep.subr.bf16.mxu0 %v6609_v21 }
 0x391   :  { %5358 = vmatpush3.bf16.msra.mxu0 %v6611_v24 }
 0x392   :  { %5359 = vmatprep.subr.bf16.mxu0 %v6613_v28 }
 0x395   :  { %5360 = vmatpush3.bf16.msra.mxu0 %v6615_v31  ;;  %v6635_v31 = vld [vmem:[%s9139_s7 + $0x100] sm:$0xff]  }
 0x396   :  { %5361 = vmatprep.subr.bf16.mxu0 %v6617_v32 }
 0x399   :  { %5362 = vmatpush3.bf16.msra.mxu0 %v6619_v36 }
 0x39a   :  { %5363 = vmatprep.subr.bf16.mxu0 %v6621_v37 }
 0x39d   :  { %5364 = vmatpush3.bf16.msra.mxu0 %v6623_v43  ;;  %v6638_v43 = vld [vmem:[%s9139_s7 + $0x108] sm:$0xff]  }
 0x39e   :  { %5365 = vmatprep.subr.bf16.mxu0 %v6625_v44  ;;  %v6639_v44 = vld [vmem:[%s9139_s7 + $0x180] sm:$0xff]  }
 0x3a1   :  { %5366 = vmatpush3.bf16.msra.mxu0 %v6627_v50  ;;  %v6641_v50 = vld [vmem:[%s9139_s7 + $0x1c8] sm:$0xff]  }
 0x3a2   :  { %5367 = vmatprep.subr.bf16.mxu0 %v6629_v51 }
 0x3a5   :  { %5368 = vmatpush3.bf16.msra.mxu0 %v6631_v4  ;;  %v6646_v4 = vld [vmem:[%s9139_s7 + $0x118] sm:$0xff]  }
 0x3a6   :  { %5369 = vmatprep.subr.bf16.mxu0 %v6632_v5  ;;  %v6647_v5 = vld [vmem:[%s9139_s7 + $0x190] sm:$0xff]  }
 0x3a9   :  { %5370 = vmatpush3.bf16.msra.mxu0 %v6634_v7  ;;  %v6648_v7 = vld [vmem:[%s9139_s7 + $0x160] sm:$0xff]  }
 0x3aa   :  { %5399 = vmatprep.subr.bf16.mxu0 %v6636_v8  ;;  %v6649_v8 = vld [vmem:[%s9139_s7 + $0x1d8] sm:$0xff]  }
 0x45f   :  { %v2518_v55 = vpop.f32.mrb[40].mxu0 }
 0x460   :  { %v2519_v61 = vadd.f32 %v2518_v55, %v7960_v54  ;;  %v6038_v62 = vpop.f32.mrb[41].mxu0  ;;  %v6642_v55 = vld [vmem:[%s9139_s7 + $0x110] sm:$0xff]  }
 0x461   :  { %v2521_v63 = vpop.f32.mrb[42].mxu0 }
 0x462   :  { %v2522_v0 = vadd.f32 %v2521_v63, %v7962_v60  ;;  %v6039_v1 = vpop.f32.mrb[43].mxu0  ;;  %6706 = vtanh.f32 %v2519_v61  ;;  %v6643_v61 = vld [vmem:[%s9139_s7 + $0x188] sm:$0xff]   ;;  %v6644_v63 = vld [vmem:[%s9139_s7 + $0x158] sm:$0xff]  }
 0x464   :  { %6708 = vtanh.f32 %v2522_v0  ;;  %v6645_v0 = vld [vmem:[%s9139_s7 + $0x1d0] sm:$0xff]  }
 0x46c   :  { %v6707_v9 = vpop.eup %6706 }
 0x46e   :  { %v6709_v10 = vpop.eup %6708 }
 0x46f   :  { %v7984_v11 = vpack.c.bf16 %v6709_v10, %v6707_v9  ;;  %v6650_v9 = vld [vmem:[%s9139_s7 + $0x120] sm:$0xff]   ;;  %v6651_v10 = vld [vmem:[%s9139_s7 + $0x198] sm:$0xff]  }
 0x471   :  { %v2529_v12 = vshrl.u32 %v7984_v11, 16  ;;  %v2534_v29 = vrot.slane %v7984_v11, 1  ;;  %v2542_v37 = vrot.slane %v7984_v11, 3  ;;  %v2538_v41 = vrot.slane %v7984_v11, 2 }
 0x472   :  { %v2550_v52 = vrot.slane %v7984_v11, 5  ;;  %v2558_v1 = vrot.slane %v7984_v11, 7 }
 0x473   :  { %2531 = vrot.lane.b32.xlu0 %v2529_v12, %s6965_s28  ;;  %v2535_v25 = vrot.slane %v2529_v12, 1  ;;  %v2539_v19 = vrot.slane %v2529_v12, 2  ;;  %v2543_v20 = vrot.slane %v2529_v12, 3  ;;  %v2547_v21 = vrot.slane %v2529_v12, 4 }
 0x474   :  { %v2551_v22 = vrot.slane %v2529_v12, 5  ;;  %v2555_v23 = vrot.slane %v2529_v12, 6  ;;  %v2559_v24 = vrot.slane %v2529_v12, 7  ;;  %v6652_v12 = vld [vmem:[%s9139_s7 + $0x168] sm:$0xff]  }
 0x475   :  { %2536 = vrot.lane.b32.xlu1 %v2535_v25, %s6965_s28  ;;  %v6653_v25 = vld [vmem:[%s9139_s7 + $0x1e0] sm:$0xff]  }
 0x477   :  { %2540 = vrot.lane.b32.xlu0 %v2539_v19, %s6965_s28  ;;  %v6654_v19 = vld [vmem:[%s9139_s7 + $0x128] sm:$0xff]  }
 0x479   :  { %2544 = vrot.lane.b32.xlu1 %v2543_v20, %s6965_s28  ;;  %v6655_v20 = vld [vmem:[%s9139_s7 + $0x1a0] sm:$0xff]  }
 0x47b   :  { %2548 = vrot.lane.b32.xlu0 %v2547_v21, %s6965_s28  ;;  %v6656_v21 = vld [vmem:[%s9139_s7 + $0x170] sm:$0xff]  }
 0x47d   :  { %2552 = vrot.lane.b32.xlu1 %v2551_v22, %s6965_s28  ;;  %v6657_v22 = vld [vmem:[%s9139_s7 + $0x1e8] sm:$0xff]  }
 0x47f   :  { %2556 = vrot.lane.b32.xlu0 %v2555_v23, %s6965_s28  ;;  %v6658_v23 = vld [vmem:[%s9139_s7 + $0x130] sm:$0xff]  }
 0x481   :  { %2560 = vrot.lane.b32.xlu1 %v2559_v24, %s6965_s28  ;;  %v6659_v24 = vld [vmem:[%s9139_s7 + $0x1a8] sm:$0xff]  }
 0x4e5   :  { %v2532_v28 = vpop.permute.xlu0 %2531 }
 0x4e6   :  { %v2564_v33 = vsel %vm2562_vm7, %v7984_v11, %v2532_v28  ;;  %v6660_v28 = vld [vmem:[%s9139_s7 + $0x178] sm:$0xff]  }
 0x4e7   :  { %v2537_v30 = vpop.permute.xlu1 %2536 }
 0x4e8   :  { %v2568_v32 = vsel %vm2562_vm7, %v2534_v29, %v2537_v30  ;;  %v6661_v29 = vld [vmem:[%s9139_s7 + $0x1f0] sm:$0xff]   ;;  %v6662_v30 = vld [vmem:[%s9139_s7 + $0x138] sm:$0xff]  }
 0x4e9   :  { %3010 = vmatprep.mubr.bf16.mxu1 %v2568_v32  ;;  %v2541_v36 = vpop.permute.xlu0 %2540 }
 0x4ea   :  { %3011 = vmatmul.mubr.bf16.vlgmr.msra.gmra.mrb[40].mxu1 %v2564_v33  ;;  %v2572_v51 = vsel %vm2562_vm7, %v2538_v41, %v2541_v36  ;;  %v6667_v33 = vld [vmem:[%s9132_s0 + $0x64] ss:$16 sps:$4 sm:$0xff]   ;;  %v2546_v36 = vrot.slane %v7984_v11, 4  ;;  %v6668_v41 = vld [vmem:[%s9139_s7 + $0x1b8] sm:$0xff]  }
 0x4eb   :  { %5378 = vmatpush3.bf16.msra.mxu1 %v6635_v31  ;;  %v2545_v42 = vpop.permute.xlu1 %2544  ;;  %v6663_v31 = vld [vmem:[%s9139_s7 + $0x1b0] sm:$0xff]  }
 0x4ec   :  { %v2576_v45 = vsel %vm2562_vm7, %v2542_v37, %v2545_v42  ;;  %5379 = vmatprep.subr.bf16.mxu1 %v6637_v40  ;;  %v6664_v40 = vld [vmem:[%s9139_s7 + $0x1f8] sm:$0xff]   ;;  %v6665_v37 = vld [vmem:[%s9132_s0 + $0x60] ss:$16 sps:$4 sm:$0xff]   ;;  %v6671_v42 = vld [vmem:[%s9132_s0 + $0x84] ss:$16 sps:$4 sm:$0xff]  }
 0x4ed   :  { %3050 = vmatprep.mubr.bf16.mxu0 %v2576_v45  ;;  %v2549_v32 = vpop.permute.xlu0 %2548 }
 0x4ee   :  { %3051 = vmatmul.mubr.bf16.vlgmr.msra.gmra.mrb[44].mxu0 %v2572_v51  ;;  %v6672_v51 = vld [vmem:[%s9132_s0 + $0x68] ss:$16 sps:$4 sm:$0xff]  }
 0x4ef   :  { %5380 = vmatpush3.bf16.msra.mxu1 %v6638_v43  ;;  %5400 = vmatpush3.bf16.msra.mxu0 %v6639_v44  ;;  %v2553_v53 = vpop.permute.xlu1 %2552  ;;  %v6674_v43 = vld [vmem:[%s9132_s0 + $0x6c] ss:$16 sps:$4 sm:$0xff]   ;;  %v2580_v44 = vsel %vm2562_vm7, %v2546_v36, %v2549_v32  ;;  %v6750_v32 = vld [vmem:[%s9135_s3 + $0xb0] sm:$0xff]   ;;  %v6753_v36 = vld [vmem:[%s9135_s3 + $0xc0] sm:$0xff]  }
 0x4f0   :  { %5381 = vmatprep.subr.bf16.mxu1 %v6640_v46  ;;  %v2584_v62 = vsel %vm2562_vm7, %v2550_v52, %v2553_v53  ;;  %5401 = vmatprep.subr.bf16.mxu0 %v6641_v50  ;;  %v2554_v46 = vrot.slane %v7984_v11, 6  ;;  %v6669_v50 = vld [vmem:[%s9132_s0 + $0x80] ss:$16 sps:$4 sm:$0xff]   ;;  %v6677_v52 = vld [vmem:[%s9132_s0 + $0xa4] ss:$16 sps:$4 sm:$0xff]  }
 0x4f1   :  { %3090 = vmatprep.mubr.bf16.mxu1 %v2584_v62  ;;  %v2557_v45 = vpop.permute.xlu0 %2556  ;;  %v6680_v11 = vld [vmem:[%s9132_s0 + $0x8c] ss:$16 sps:$4 sm:$0xff]  }
 0x4f2   :  { %v2588_v53 = vsel %vm2562_vm7, %v2554_v46, %v2557_v45  ;;  %v6683_v62 = vld [vmem:[%s9132_s0 + $0xac] ss:$16 sps:$4 sm:$0xff]  }
 0x4f3   :  { %5382 = vmatpush3.bf16.msra.mxu1 %v6642_v55  ;;  %5402 = vmatpush3.bf16.msra.mxu0 %v6643_v61  ;;  %v2561_v3 = vpop.permute.xlu1 %2560  ;;  %v6675_v55 = vld [vmem:[%s9132_s0 + $0xa0] ss:$16 sps:$4 sm:$0xff]   ;;  %v6678_v61 = vld [vmem:[%s9132_s0 + $0x88] ss:$16 sps:$4 sm:$0xff]  }
 0x4f4   :  { %5383 = vmatprep.subr.bf16.mxu1 %v6644_v63  ;;  %5403 = vmatprep.subr.bf16.mxu0 %v6645_v0  ;;  %v2592_v6 = vsel %vm2562_vm7, %v2558_v1, %v2561_v3  ;;  %v6681_v63 = vld [vmem:[%s9132_s0 + $0xa8] ss:$16 sps:$4 sm:$0xff]   ;;  %v6728_v0 = vld [vmem:[%s9135_s3 + $0x40] sm:$0xff]  }
 0x4f5   :  { %3130 = vmatprep.mubr.bf16.mxu0 %v2592_v6  ;;  %v6729_v1 = vld [vmem:[%s9133_s1] sm:$0xf]  ;;  %v6733_v6 = vld [vmem:[%s9135_s3 + $0x8] sm:$0xff]  }
 0x4f6   :  { %v6730_v3 = vld [vmem:[%s9135_s3] sm:$0xff]  }
 0x4f7   :  { %5384 = vmatpush3.bf16.msra.mxu1 %v6646_v4  ;;  %5404 = vmatpush3.bf16.msra.mxu0 %v6647_v5  ;;  %v6731_v4 = vld [vmem:[%s9135_s3 + $0x48] sm:$0xff]   ;;  %v6732_v5 = vld [vmem:[%s9135_s3 + $0x80] sm:$0xff]  }
 0x4f8   :  { %5385 = vmatprep.subr.bf16.mxu1 %v6648_v7  ;;  %5405 = vmatprep.subr.bf16.mxu0 %v6649_v8  ;;  %v6734_v7 = vld [vmem:[%s9135_s3 + $0x50] sm:$0xff]   ;;  %v6735_v8 = vld [vmem:[%s9135_s3 + $0x88] sm:$0xff]  }
 0x4fb   :  { %5386 = vmatpush3.bf16.msra.mxu1 %v6650_v9  ;;  %5406 = vmatpush3.bf16.msra.mxu0 %v6651_v10  ;;  %v6736_v9 = vld [vmem:[%s9135_s3 + $0x10] sm:$0xff]   ;;  %v6737_v10 = vld [vmem:[%s9135_s3 + $0x58] sm:$0xff]  }
 0x4fc   :  { %5387 = vmatprep.subr.bf16.mxu1 %v6652_v12  ;;  %5407 = vmatprep.subr.bf16.mxu0 %v6653_v25  ;;  %v6738_v12 = vld [vmem:[%s9135_s3 + $0x90] sm:$0xff]   ;;  %v6739_v25 = vld [vmem:[%s9135_s3 + $0x18] sm:$0xff]  }
 0x4ff   :  { %5388 = vmatpush3.bf16.msra.mxu1 %v6654_v19  ;;  %5408 = vmatpush3.bf16.msra.mxu0 %v6655_v20  ;;  %v6740_v19 = vld [vmem:[%s9135_s3 + $0x60] sm:$0xff]   ;;  %v6741_v20 = vld [vmem:[%s9135_s3 + $0x98] sm:$0xff]  }
 0x500   :  { %5389 = vmatprep.subr.bf16.mxu1 %v6656_v21  ;;  %5409 = vmatprep.subr.bf16.mxu0 %v6657_v22  ;;  %v6742_v21 = vld [vmem:[%s9135_s3 + $0x20] sm:$0xff]   ;;  %v6743_v22 = vld [vmem:[%s9135_s3 + $0x68] sm:$0xff]  }
 0x503   :  { %5390 = vmatpush3.bf16.msra.mxu1 %v6658_v23  ;;  %5410 = vmatpush3.bf16.msra.mxu0 %v6659_v24  ;;  %v6744_v23 = vld [vmem:[%s9135_s3 + $0xa0] sm:$0xff]   ;;  %v6745_v24 = vld [vmem:[%s9135_s3 + $0x28] sm:$0xff]  }
 0x504   :  { %5391 = vmatprep.subr.bf16.mxu1 %v6660_v28  ;;  %5411 = vmatprep.subr.bf16.mxu0 %v6661_v29  ;;  %v6746_v28 = vld [vmem:[%s9135_s3 + $0x70] sm:$0xff]   ;;  %v6747_v29 = vld [vmem:[%s9135_s3 + $0xa8] sm:$0xff]  }
 0x507   :  { %5392 = vmatpush3.bf16.msra.mxu1 %v6662_v30  ;;  %5412 = vmatpush3.bf16.msra.mxu0 %v6663_v31  ;;  %v6748_v30 = vld [vmem:[%s9135_s3 + $0x30] sm:$0xff]   ;;  %v6749_v31 = vld [vmem:[%s9135_s3 + $0x78] sm:$0xff]  }
 0x508   :  { %5413 = vmatprep.subr.bf16.mxu0 %v6664_v40  ;;  %3213 = vmatprep.subr.bf16.mxu1 %v6667_v33  ;;  %v6751_v40 = vld [vmem:[%s9135_s3 + $0x38] sm:$0xff]  }
 0x509   :  { %v6752_v33 = vld [vmem:[%s9135_s3 + $0xb8] sm:$0xff]  }
 0x50a   :  { %3091 = vmatmul.mubr.bf16.vlgmr.msra.gmra.mrb[44].mxu1 %v2580_v44  ;;  %v6758_v44 = vld [vmem:[%s9135_s3 + $0xe8] sm:$0xff]  }
 0x50b   :  { %5414 = vmatpush3.bf16.msra.mxu0 %v6668_v41  ;;  %3214 = vmatpush1.bf16.msra.mxu1 %v6665_v37  ;;  %v6754_v37 = vld [vmem:[%s9135_s3 + $0xc8] sm:$0xff]   ;;  %v6755_v41 = vld [vmem:[%s9135_s3 + $0xd0] sm:$0xff]  }
 0x50c   :  { %3215 = vmatprep.subr.bf16.mxu1 %v6671_v42  ;;  %3254 = vmatprep.subr.bf16.mxu0 %v6674_v43  ;;  %v6756_v42 = vld [vmem:[%s9135_s3 + $0xd8] sm:$0xff]   ;;  %v6757_v43 = vld [vmem:[%s9135_s3 + $0xe0] sm:$0xff]  }
 0x50d   :  { %3245 = vmatprep.mubr.bf16.mxu1 %v6961_v2 }
 0x50e   :  { %3131 = vmatmul.mubr.bf16.vlgmr.msra.gmra.mrb[48].mxu0 %v2588_v53 }
 0x50f   :  { %3216 = vmatpush1.bf16.msra.mxu1 %v6669_v50  ;;  %3255 = vmatpush1.bf16.msra.mxu0 %v6672_v51 }
 0x510   :  { %3217 = vmatprep.subr.bf16.mxu1 %v6677_v52  ;;  %3256 = vmatprep.subr.bf16.mxu0 %v6680_v11  ;;  %v241_v52 = vld [vmem:[%s9140_s8] sm:$0x1] }
 0x511   :  { %3286 = vmatprep.mubr.bf16.mxu0 %v6961_v2 }
 0x513   :  { %3218 = vmatpush1.bf16.msra.mxu1 %v6675_v55  ;;  %3257 = vmatpush1.bf16.msra.mxu0 %v6678_v61 }
 0x514   :  { %3258 = vmatprep.subr.bf16.mxu0 %v6683_v62  ;;  %5421 = vmatprep.subr.bf16.mxu1 %v6728_v0 }
 0x516   :  { %5121 = vmatmul.mubr.msk.bf16.vlgmr.msra.gmra.mrb[48].mxu1 %vm319_vm0, %v6729_v1 }
 0x517   :  { %3259 = vmatpush1.bf16.msra.mxu0 %v6681_v63  ;;  %5422 = vmatpush3.bf16.msra.mxu1 %v6730_v3 }
 0x518   :  { %3346 = vmatprep.subr.bf16.mxu0 %v6961_v2  ;;  %5423 = vmatprep.subr.bf16.mxu1 %v6731_v4 }
 0x51a   :  { %5122 = vmatmul.mubr.msk.bf16.vlgmr.msra.gmra.mrb[52].mxu0 %vm319_vm0, %v6729_v1 }
 0x51b   :  { %3347 = vmatpush1.bf16.msra.mxu0 %v6732_v5  ;;  %5424 = vmatpush3.bf16.msra.mxu1 %v6733_v6 }
 0x51c   :  { %3348 = vmatprep.subr.bf16.mxu0 %v6961_v2  ;;  %5425 = vmatprep.subr.bf16.mxu1 %v6734_v7 }
 0x51f   :  { %3349 = vmatpush1.bf16.msra.mxu0 %v6735_v8  ;;  %5426 = vmatpush3.bf16.msra.mxu1 %v6736_v9 }
 0x520   :  { %3350 = vmatprep.subr.bf16.mxu0 %v6961_v2  ;;  %5427 = vmatprep.subr.bf16.mxu1 %v6737_v10 }
 0x523   :  { %3351 = vmatpush1.bf16.msra.mxu0 %v6738_v12  ;;  %5428 = vmatpush3.bf16.msra.mxu1 %v6739_v25 }
 0x524   :  { %3352 = vmatprep.subr.bf16.mxu0 %v6961_v2  ;;  %5429 = vmatprep.subr.bf16.mxu1 %v6740_v19 }
 0x527   :  { %3353 = vmatpush1.bf16.msra.mxu0 %v6741_v20  ;;  %5430 = vmatpush3.bf16.msra.mxu1 %v6742_v21 }
 0x528   :  { %3354 = vmatprep.subr.bf16.mxu0 %v6961_v2  ;;  %5431 = vmatprep.subr.bf16.mxu1 %v6743_v22 }
 0x52b   :  { %3355 = vmatpush1.bf16.msra.mxu0 %v6744_v23  ;;  %5432 = vmatpush3.bf16.msra.mxu1 %v6745_v24 }
 0x52c   :  { %3356 = vmatprep.subr.bf16.mxu0 %v6961_v2  ;;  %5433 = vmatprep.subr.bf16.mxu1 %v6746_v28 }
 0x52f   :  { %3357 = vmatpush1.bf16.msra.mxu0 %v6747_v29  ;;  %5434 = vmatpush3.bf16.msra.mxu1 %v6748_v30 }
 0x530   :  { %3358 = vmatprep.subr.bf16.mxu0 %v6961_v2  ;;  %5435 = vmatprep.subr.bf16.mxu1 %v6749_v31 }
 0x533   :  { %3359 = vmatpush1.bf16.msra.mxu0 %v6750_v32  ;;  %5436 = vmatpush3.bf16.msra.mxu1 %v6751_v40 }
 0x534   :  { %3360 = vmatprep.subr.bf16.mxu0 %v6961_v2  ;;  %6040 = vmatprep.subr.bf16.mxu1 %v6962_v48 }
 0x537   :  { %3361 = vmatpush1.bf16.msra.mxu0 %v6752_v33 }
 0x538   :  { %3362 = vmatprep.subr.bf16.mxu0 %v6961_v2 }
 0x53b   :  { %3363 = vmatpush1.bf16.msra.mxu0 %v6753_v36 }
 0x53c   :  { %3364 = vmatprep.subr.bf16.mxu0 %v6961_v2 }
 0x53f   :  { %3365 = vmatpush1.bf16.msra.mxu0 %v6754_v37 }
 0x540   :  { %3366 = vmatprep.subr.bf16.mxu0 %v6961_v2 }
 0x543   :  { %3367 = vmatpush1.bf16.msra.mxu0 %v6755_v41 }
 0x544   :  { %3368 = vmatprep.subr.bf16.mxu0 %v6961_v2 }
 0x547   :  { %3369 = vmatpush1.bf16.msra.mxu0 %v6756_v42 }
 0x548   :  { %3370 = vmatprep.subr.bf16.mxu0 %v6961_v2 }
 0x54b   :  { %3371 = vmatpush1.bf16.msra.mxu0 %v6757_v43 }
 0x54c   :  { %3372 = vmatprep.subr.bf16.mxu0 %v6961_v2 }
 0x54f   :  { %3373 = vmatpush1.bf16.msra.mxu0 %v6758_v44 }
 0x550   :  { %3374 = vmatprep.subr.bf16.mxu0 %v6961_v2 }
 0x553   :  { %3375 = vmatpush1.bf16.msra.mxu0 %v7197_v47 }
 0x554   :  { %6060 = vmatprep.subr.bf16.mxu0 %v6962_v48 }
 0x5bd   :  { %v5349_v45 = vpop.f32.mrb[40].mxu1 }
 0x5be   :  { %v5350_v46 = vpop.f32.mrb[41].mxu1 }
 0x5bf   :  { %v5351_v50 = vadd.f32 %v5350_v46, %v5349_v45  ;;  %v5352_v51 = vpop.f32.mrb[42].mxu1  ;;  %v6759_v45 = vld [vmem:[%s9136_s4] sm:$0xff]  }
 0x5c0   :  { %v5353_v11 = vpop.f32.mrb[43].mxu1  ;;  %v6760_v46 = vld [vmem:[%s9136_s4 + $0x40] sm:$0xff]   ;;  %v6762_v51 = vld [vmem:[%s9136_s4 + $0x48] sm:$0xff]  }
 0x5c1   :  { %v5371_v53 = vpop.f32.mrb[44].mxu0  ;;  %v3013_v61 = vadd.f32 %v5351_v50, %v241_v52  ;;  %v6761_v50 = vld [vmem:[%s9136_s4 + $0x8] sm:$0xff]   ;;  %v6763_v52 = vld [vmem:[%s9136_s4 + $0x10] sm:$0xff]  }
 0x5c2   :  { %v5372_v55 = vpop.f32.mrb[45].mxu0  ;;  %v6764_v11 = vld [vmem:[%s9136_s4 + $0x50] sm:$0xff]  }
 0x5c3   :  { %v5373_v62 = vadd.f32 %v5372_v55, %v5371_v53  ;;  %v5374_v63 = vpop.f32.mrb[46].mxu0  ;;  %v6765_v53 = vld [vmem:[%s9136_s4 + $0x18] sm:$0xff]  }
 0x5c4   :  { %v5375_v0 = vpop.f32.mrb[47].mxu0  ;;  %v6766_v55 = vld [vmem:[%s9136_s4 + $0x58] sm:$0xff]   ;;  %v6769_v63 = vld [vmem:[%s9136_s4 + $0x28] sm:$0xff]  }
 0x5c5   :  { %v3053_v2 = vadd.f32 %v5373_v62, %v3013_v61  ;;  %v6767_v61 = vld [vmem:[%s9136_s4 + $0x20] sm:$0xff]   ;;  %v6770_v0 = vld [vmem:[%s9136_s4 + $0x68] sm:$0xff]  }
 0x5c6   :  { %v6768_v62 = vld [vmem:[%s9136_s4 + $0x60] sm:$0xff]  }
 0x5dd   :  { %v5393_v1 = vpop.f32.mrb[44].mxu1 }
 0x5de   :  { %v5394_v47 = vpop.f32.mrb[45].mxu1 }
 0x5df   :  { %v5395_v3 = vadd.f32 %v5394_v47, %v5393_v1  ;;  %v5396_v4 = vpop.f32.mrb[46].mxu1  ;;  %v6772_v1 = vld [vmem:[%s9136_s4 + $0x70] sm:$0xff]  }
 0x5e0   :  { %v5397_v5 = vpop.f32.mrb[47].mxu1 }
 0x5e1   :  { %v3093_v6 = vadd.f32 %v5395_v3, %v3053_v2  ;;  %v5415_v7 = vpop.f32.mrb[48].mxu0  ;;  %v6771_v2 = vld [vmem:[%s9136_s4 + $0x30] sm:$0xff]  }
 0x5e2   :  { %v5416_v8 = vpop.f32.mrb[49].mxu0 }
 0x5e3   :  { %v5417_v9 = vadd.f32 %v5416_v8, %v5415_v7  ;;  %v5418_v10 = vpop.f32.mrb[50].mxu0 }
 0x5e4   :  { %v5419_v12 = vpop.f32.mrb[51].mxu0 }
 0x5e5   :  { %v8255_v25 = vadd.f32 %v5417_v9, %v3093_v6 }
 0x5e9   :  { %v3247_v19 = vpop.f32.mrb[48].mxu1 }
 0x5ea   :  { %v3248_v20 = vadd.f32 %v3247_v19, %v7202_v49  ;;  %v3249_v21 = vpop.f32.mrb[49].mxu1  ;;  %v6774_v19 = vld [vmem:[%s9136_s4 + $0xc0] sm:$0xff]  }
 0x5eb   :  { %v3250_v22 = vadd.f32 %v3249_v21, %v7202_v49  ;;  %v3251_v23 = vpop.f32.mrb[50].mxu1  ;;  %v6776_v21 = vld [vmem:[%s9136_s4 + $0xc8] sm:$0xff]  }
 0x5ec   :  { %6710 = vtanh.f32 %v3248_v20  ;;  %v3252_v24 = vpop.f32.mrb[51].mxu1  ;;  %v6775_v20 = vld [vmem:[%s9136_s4 + $0x88] sm:$0xff]   ;;  %v6778_v23 = vld [vmem:[%s9136_s4 + $0xd0] sm:$0xff]  }
 0x5ed   :  { %6712 = vtanh.f32 %v3250_v22  ;;  %v3288_v28 = vpop.f32.mrb[52].mxu0  ;;  %v6777_v22 = vld [vmem:[%s9136_s4 + $0x90] sm:$0xff]   ;;  %v6779_v24 = vld [vmem:[%s9136_s4 + $0x98] sm:$0xff]  }
 0x5ee   :  { %v3289_v29 = vadd.f32 %v3288_v28, %v7202_v49  ;;  %v3290_v30 = vpop.f32.mrb[53].mxu0  ;;  %v6780_v28 = vld [vmem:[%s9136_s4 + $0xd8] sm:$0xff]  }
 0x5ef   :  { %v3291_v31 = vadd.f32 %v3290_v30, %v7202_v49  ;;  %v3292_v32 = vpop.f32.mrb[54].mxu0  ;;  %v6782_v30 = vld [vmem:[%s9136_s4 + $0xe0] sm:$0xff]  }
 0x5f0   :  { %6714 = vtanh.f32 %v3289_v29  ;;  %v3293_v40 = vpop.f32.mrb[55].mxu0  ;;  %v6781_v29 = vld [vmem:[%s9136_s4 + $0xa0] sm:$0xff]   ;;  %v6784_v32 = vld [vmem:[%s9136_s4 + $0xe8] sm:$0xff]  }
 0x5f1   :  { %6716 = vtanh.f32 %v3291_v31  ;;  %v6783_v31 = vld [vmem:[%s9136_s4 + $0xa8] sm:$0xff]   ;;  %v6785_v40 = vld [vmem:[%s9136_s4 + $0xb0] sm:$0xff]  }
 0x5f6   :  { %v6711_v33 = vpop.eup %6710 }
 0x5f7   :  { %v6713_v36 = vpop.eup %6712  ;;  %v3299_v41 = vpack.c.bf16 %v6711_v33, %v6711_v33  ;;  %v6786_v33 = vld [vmem:[%s9136_s4 + $0xf0] sm:$0xff]  }
 0x5f8   :  { %v3300_v37 = vpack.c.bf16 %v6713_v36, %v6713_v36  ;;  %v6787_v36 = vld [vmem:[%s9136_s4 + $0x100] sm:$0xff]  }
 0x5fa   :  { %v6715_v42 = vpop.eup %6714  ;;  %3338 = vmatprep.mubr.bf16.mxu1 %v3300_v37  ;;  %v6790_v37 = vld [vmem:[%s9136_s4 + $0x148] sm:$0xff]  }
 0x5fb   :  { %v6717_v43 = vpop.eup %6716  ;;  %3339 = vmatmul.mubr.bf16.vlgmr.msra.gmra.mrb[52].mxu1 %v3299_v41  ;;  %v3301_v49 = vpack.c.bf16 %v6715_v42, %v6715_v42  ;;  %v6791_v41 = vld [vmem:[%s9136_s4 + $0x110] sm:$0xff]  }
 0x5fc   :  { %v3302_v44 = vpack.c.bf16 %v6717_v43, %v6717_v43  ;;  %6041 = vmatpush3.bf16.msra.mxu1 %v6759_v45  ;;  %6056 = vmatprep.mubr.msk.bf16.mxu1 %vm6964_vm5, %v6962_v48  ;;  %v6792_v42 = vld [vmem:[%s9136_s4 + $0x150] sm:$0xff]   ;;  %v6793_v43 = vld [vmem:[%s9136_s4 + $0x118] sm:$0xff]   ;;  %v6795_v45 = vld [vmem:[%s9136_s4 + $0x120] sm:$0xff]  }
 0x5fd   :  { %6042 = vmatprep.subr.bf16.mxu1 %v6962_v48 }
 0x5fe   :  { %5123 = vmatprep.mubr.msk.bf16.mxu0 %vm596_vm2, %v3302_v44  ;;  %v6794_v44 = vld [vmem:[%s9136_s4 + $0x158] sm:$0xff]  }
 0x5ff   :  { %3379 = vmatmul.mubr.bf16.vlgmr.msra.gmra.mrb[56].mxu0 %v3301_v49  ;;  %v6796_v49 = vld [vmem:[%s9136_s4 + $0x160] sm:$0xff]  }
 0x600   :  { %6061 = vmatpush3.bf16.msra.mxu0 %v6760_v46  ;;  %6043 = vmatpush3.bf16.msra.mxu1 %v6761_v50  ;;  %v6797_v46 = vld [vmem:[%s9136_s4 + $0x128] sm:$0xff]  }
 0x601   :  { %6062 = vmatprep.subr.bf16.mxu0 %v6962_v48  ;;  %6044 = vmatprep.subr.bf16.mxu1 %v6962_v48  ;;  %v6798_v50 = vld [vmem:[%s9136_s4 + $0x168] sm:$0xff]  }
 0x602   :  { %6076 = vmatprep.mubr.msk.bf16.mxu0 %vm6964_vm5, %v6962_v48 }
 0x604   :  { %6063 = vmatpush3.bf16.msra.mxu0 %v6762_v51  ;;  %6045 = vmatpush3.bf16.msra.mxu1 %v6763_v52  ;;  %v6799_v51 = vld [vmem:[%s9136_s4 + $0x130] sm:$0xff]  }
 0x605   :  { %6064 = vmatprep.subr.bf16.mxu0 %v6962_v48  ;;  %6046 = vmatprep.subr.bf16.mxu1 %v6962_v48  ;;  %v6800_v52 = vld [vmem:[%s9136_s4 + $0x170] sm:$0xff]  }
 0x608   :  { %6065 = vmatpush3.bf16.msra.mxu0 %v6764_v11  ;;  %6047 = vmatpush3.bf16.msra.mxu1 %v6765_v53  ;;  %v6801_v11 = vld [vmem:[%s9136_s4 + $0x180] sm:$0xff]   ;;  %v6804_v53 = vld [vmem:[%s9136_s4 + $0x1c8] sm:$0xff]  }
 0x609   :  { %6066 = vmatprep.subr.bf16.mxu0 %v6962_v48  ;;  %6048 = vmatprep.subr.bf16.mxu1 %v6962_v48 }
 0x60c   :  { %6067 = vmatpush3.bf16.msra.mxu0 %v6766_v55  ;;  %6049 = vmatpush3.bf16.msra.mxu1 %v6767_v61  ;;  %v6805_v55 = vld [vmem:[%s9136_s4 + $0x190] sm:$0xff]  }
 0x60d   :  { %6068 = vmatprep.subr.bf16.mxu0 %v6962_v48  ;;  %6050 = vmatprep.subr.bf16.mxu1 %v6962_v48  ;;  %v6806_v61 = vld [vmem:[%s9136_s4 + $0x1d0] sm:$0xff]  }
 0x610   :  { %6069 = vmatpush3.bf16.msra.mxu0 %v6768_v62  ;;  %6051 = vmatpush3.bf16.msra.mxu1 %v6769_v63  ;;  %v6807_v62 = vld [vmem:[%s9136_s4 + $0x198] sm:$0xff]  }
 0x611   :  { %6070 = vmatprep.subr.bf16.mxu0 %v6962_v48  ;;  %6052 = vmatprep.subr.bf16.mxu1 %v6962_v48  ;;  %v6808_v63 = vld [vmem:[%s9136_s4 + $0x1d8] sm:$0xff]  }
 0x614   :  { %6071 = vmatpush3.bf16.msra.mxu0 %v6770_v0  ;;  %6053 = vmatpush3.bf16.msra.mxu1 %v6771_v2  ;;  %v6809_v0 = vld [vmem:[%s9136_s4 + $0x1a0] sm:$0xff]  }
 0x615   :  { %6072 = vmatprep.subr.bf16.mxu0 %v6962_v48  ;;  %6054 = vmatprep.subr.bf16.mxu1 %v6962_v48  ;;  %v6810_v2 = vld [vmem:[%s9136_s4 + $0x1e0] sm:$0xff]  }
 0x618   :  { %6073 = vmatpush3.bf16.msra.mxu0 %v6772_v1  ;;  %6055 = vmatpush3.bf16.msra.mxu1 %v7275_v26  ;;  %v6811_v1 = vld [vmem:[%s9136_s4 + $0x1a8] sm:$0xff]  }
 0x619   :  { %6074 = vmatprep.subr.bf16.mxu0 %v6962_v48  ;;  %6080 = vmatprep.subr.bf16.mxu1 %v6962_v48 }
 0x61c   :  { %6075 = vmatpush3.bf16.msra.mxu0 %v7278_v27  ;;  %v6773_v27 = vld [vmem:[%s9136_s4 + $0x80] sm:$0xff]  }
 0x61d   :  { %6100 = vmatprep.subr.bf16.mxu0 %v6962_v48 }
 0x6ce   :  { %v5437_v47 = vpop.f32.mrb[52].mxu1 }
 0x6cf   :  { %v5438_v3 = vpop.f32.mrb[53].mxu1 }
 0x6d0   :  { %v5439_v4 = vadd.f32 %v5438_v3, %v5437_v47  ;;  %v5440_v5 = vpop.f32.mrb[54].mxu1  ;;  %v6812_v47 = vld [vmem:[%s9136_s4 + $0x1e8] sm:$0xff]   ;;  %v6813_v3 = vld [vmem:[%s9136_s4 + $0x1b0] sm:$0xff]  }
 0x6d1   :  { %v5441_v6 = vpop.f32.mrb[55].mxu1  ;;  %v6815_v5 = vld [vmem:[%s9136_s4 + $0x200] sm:$0xff]  }
 0x6d2   :  { %v3380_v7 = vpop.f32.mrb[56].mxu0  ;;  %v6818_v6 = vld [vmem:[%s9136_s4 + $0x248] sm:$0xff]  }
 0x6d3   :  { %v3381_v8 = vadd.f32 %v5439_v4, %v3380_v7  ;;  %v3382_v9 = vpop.f32.mrb[57].mxu0  ;;  %v6814_v4 = vld [vmem:[%s9136_s4 + $0x1f0] sm:$0xff]  }
 0x6d4   :  { %v3383_v10 = vpop.f32.mrb[58].mxu0  ;;  %v6819_v7 = vld [vmem:[%s9136_s4 + $0x210] sm:$0xff]   ;;  %v6821_v9 = vld [vmem:[%s9136_s4 + $0x218] sm:$0xff]  }
 0x6d5   :  { %v8326_v12 = vpack.c.bf16 %v3381_v8, %v3381_v8  ;;  %v3384_v26 = vpop.f32.mrb[59].mxu0  ;;  %v6820_v8 = vld [vmem:[%s9136_s4 + $0x250] sm:$0xff]   ;;  %v6822_v10 = vld [vmem:[%s9136_s4 + $0x258] sm:$0xff]  }
 0x6d6   :  { %v6823_v26 = vld [vmem:[%s9136_s4 + $0x220] sm:$0xff]  }
 0x6d7   :  { %6057 = vmatmul.mubr.msk.bf16.vlgmr.msra.gmra.mrb[56].mxu1 %vm748_vm6, %v8326_v12  ;;  %6077 = vmatmul.mubr.msk.bf16.vlgmr.msra.gmra.mrb[60].mxu0 %vm748_vm6, %v8326_v12 }
 0x6d8   :  { %6081 = vmatpush3.bf16.msra.mxu1 %v6773_v27  ;;  %6101 = vmatpush3.bf16.msra.mxu0 %v6774_v19  ;;  %v6824_v27 = vld [vmem:[%s9136_s4 + $0x260] sm:$0xff]   ;;  %v6825_v19 = vld [vmem:[%s9136_s4 + $0x228] sm:$0xff]  }
 0x6d9   :  { %6082 = vmatprep.subr.bf16.mxu1 %v6962_v48  ;;  %6102 = vmatprep.subr.bf16.mxu0 %v6962_v48 }
 0x6da   :  { %6096 = vmatprep.mubr.msk.bf16.mxu1 %vm6964_vm5, %v6962_v48  ;;  %6116 = vmatprep.mubr.msk.bf16.mxu0 %vm6964_vm5, %v6962_v48 }
 0x6dc   :  { %6083 = vmatpush3.bf16.msra.mxu1 %v6775_v20  ;;  %6103 = vmatpush3.bf16.msra.mxu0 %v6776_v21  ;;  %v6826_v20 = vld [vmem:[%s9136_s4 + $0x268] sm:$0xff]   ;;  %v6827_v21 = vld [vmem:[%s9136_s4 + $0x230] sm:$0xff]  }
 0x6dd   :  { %6084 = vmatprep.subr.bf16.mxu1 %v6962_v48  ;;  %6104 = vmatprep.subr.bf16.mxu0 %v6962_v48 }
 0x6e0   :  { %6085 = vmatpush3.bf16.msra.mxu1 %v6777_v22  ;;  %6105 = vmatpush3.bf16.msra.mxu0 %v6778_v23  ;;  %v6828_v22 = vld [vmem:[%s9136_s4 + $0x270] sm:$0xff]   ;;  %v6829_v23 = vld [vmem:[%s9136_s4 + $0x280] sm:$0xff]  }
 0x6e1   :  { %6086 = vmatprep.subr.bf16.mxu1 %v6962_v48  ;;  %6106 = vmatprep.subr.bf16.mxu0 %v6962_v48 }
 0x6e4   :  { %6087 = vmatpush3.bf16.msra.mxu1 %v6779_v24  ;;  %6107 = vmatpush3.bf16.msra.mxu0 %v6780_v28  ;;  %v6832_v24 = vld [vmem:[%s9136_s4 + $0x2c8] sm:$0xff]   ;;  %v6833_v28 = vld [vmem:[%s9136_s4 + $0x290] sm:$0xff]  }
 0x6e5   :  { %6088 = vmatprep.subr.bf16.mxu1 %v6962_v48  ;;  %6108 = vmatprep.subr.bf16.mxu0 %v6962_v48 }
 0x6e8   :  { %6089 = vmatpush3.bf16.msra.mxu1 %v6781_v29  ;;  %6109 = vmatpush3.bf16.msra.mxu0 %v6782_v30  ;;  %v6834_v29 = vld [vmem:[%s9136_s4 + $0x2d0] sm:$0xff]   ;;  %v6835_v30 = vld [vmem:[%s9136_s4 + $0x298] sm:$0xff]  }
 0x6e9   :  { %6090 = vmatprep.subr.bf16.mxu1 %v6962_v48  ;;  %6110 = vmatprep.subr.bf16.mxu0 %v6962_v48 }
 0x6ec   :  { %6091 = vmatpush3.bf16.msra.mxu1 %v6783_v31  ;;  %6111 = vmatpush3.bf16.msra.mxu0 %v6784_v32  ;;  %v6836_v31 = vld [vmem:[%s9136_s4 + $0x2d8] sm:$0xff]   ;;  %v6837_v32 = vld [vmem:[%s9136_s4 + $0x2a0] sm:$0xff]  }
 0x6ed   :  { %6092 = vmatprep.subr.bf16.mxu1 %v6962_v48  ;;  %6112 = vmatprep.subr.bf16.mxu0 %v6962_v48 }
 0x6f0   :  { %6093 = vmatpush3.bf16.msra.mxu1 %v6785_v40  ;;  %6113 = vmatpush3.bf16.msra.mxu0 %v6786_v33  ;;  %v6838_v40 = vld [vmem:[%s9136_s4 + $0x2e0] sm:$0xff]   ;;  %v6839_v33 = vld [vmem:[%s9136_s4 + $0x2a8] sm:$0xff]  }
 0x6f1   :  { %6094 = vmatprep.subr.bf16.mxu1 %v6962_v48  ;;  %6114 = vmatprep.subr.bf16.mxu0 %v6962_v48 }
 0x6f4   :  { %6095 = vmatpush3.bf16.msra.mxu1 %v7359_v58  ;;  %6115 = vmatpush3.bf16.msra.mxu0 %v7362_v59  ;;  %v6788_v58 = vld [vmem:[%s9136_s4 + $0x140] sm:$0xff]   ;;  %v6789_v59 = vld [vmem:[%s9136_s4 + $0x108] sm:$0xff]  }
 0x6f5   :  { %6120 = vmatprep.subr.bf16.mxu1 %v6962_v48  ;;  %6140 = vmatprep.subr.bf16.mxu0 %v6962_v48 }
 0x6f7   :  { %6097 = vmatmul.mubr.msk.bf16.vlgmr.msra.gmra.mrb[60].mxu1 %vm748_vm6, %v8326_v12  ;;  %6117 = vmatmul.mubr.msk.bf16.vlgmr.msra.gmra.mrb[64].mxu0 %vm748_vm6, %v8326_v12 }
 0x6f8   :  { %6121 = vmatpush3.bf16.msra.mxu1 %v6787_v36  ;;  %6141 = vmatpush3.bf16.msra.mxu0 %v6788_v58  ;;  %v6840_v36 = vld [vmem:[%s9136_s4 + $0x2e8] sm:$0xff]   ;;  %v6841_v58 = vld [vmem:[%s9136_s4 + $0x2b0] sm:$0xff]  }
 0x6f9   :  { %6122 = vmatprep.subr.bf16.mxu1 %v6962_v48  ;;  %6142 = vmatprep.subr.bf16.mxu0 %v6962_v48 }
 0x6fa   :  { %6136 = vmatprep.mubr.msk.bf16.mxu1 %vm6964_vm5, %v6962_v48  ;;  %6156 = vmatprep.mubr.msk.bf16.mxu0 %vm6964_vm5, %v6962_v48 }
 0x6fc   :  { %6123 = vmatpush3.bf16.msra.mxu1 %v6789_v59  ;;  %6143 = vmatpush3.bf16.msra.mxu0 %v6790_v37  ;;  %v6842_v59 = vld [vmem:[%s9136_s4 + $0x2f0] sm:$0xff]   ;;  %v6843_v37 = vld [vmem:[%s9136_s4 + $0x300] sm:$0xff]  }
 0x6fd   :  { %6124 = vmatprep.subr.bf16.mxu1 %v6962_v48  ;;  %6144 = vmatprep.subr.bf16.mxu0 %v6962_v48 }
 0x700   :  { %6125 = vmatpush3.bf16.msra.mxu1 %v6791_v41  ;;  %6145 = vmatpush3.bf16.msra.mxu0 %v6792_v42  ;;  %v6846_v41 = vld [vmem:[%s9136_s4 + $0x348] sm:$0xff]   ;;  %v6847_v42 = vld [vmem:[%s9136_s4 + $0x310] sm:$0xff]  }
 0x701   :  { %6126 = vmatprep.subr.bf16.mxu1 %v6962_v48  ;;  %6146 = vmatprep.subr.bf16.mxu0 %v6962_v48 }
 0x704   :  { %6127 = vmatpush3.bf16.msra.mxu1 %v6793_v43  ;;  %6147 = vmatpush3.bf16.msra.mxu0 %v6794_v44  ;;  %v6848_v43 = vld [vmem:[%s9136_s4 + $0x350] sm:$0xff]   ;;  %v6849_v44 = vld [vmem:[%s9136_s4 + $0x318] sm:$0xff]  }
 0x705   :  { %6128 = vmatprep.subr.bf16.mxu1 %v6962_v48  ;;  %6148 = vmatprep.subr.bf16.mxu0 %v6962_v48 }
 0x708   :  { %6129 = vmatpush3.bf16.msra.mxu1 %v6795_v45  ;;  %6149 = vmatpush3.bf16.msra.mxu0 %v6796_v49  ;;  %v6850_v45 = vld [vmem:[%s9136_s4 + $0x358] sm:$0xff]   ;;  %v6851_v49 = vld [vmem:[%s9136_s4 + $0x320] sm:$0xff]  }
 0x709   :  { %6130 = vmatprep.subr.bf16.mxu1 %v6962_v48  ;;  %6150 = vmatprep.subr.bf16.mxu0 %v6962_v48 }
 0x70c   :  { %6131 = vmatpush3.bf16.msra.mxu1 %v6797_v46  ;;  %6151 = vmatpush3.bf16.msra.mxu0 %v6798_v50  ;;  %v6852_v46 = vld [vmem:[%s9136_s4 + $0x360] sm:$0xff]   ;;  %v6853_v50 = vld [vmem:[%s9136_s4 + $0x328] sm:$0xff]  }
 0x70d   :  { %6132 = vmatprep.subr.bf16.mxu1 %v6962_v48  ;;  %6152 = vmatprep.subr.bf16.mxu0 %v6962_v48 }
 0x710   :  { %6133 = vmatpush3.bf16.msra.mxu1 %v6799_v51  ;;  %6153 = vmatpush3.bf16.msra.mxu0 %v6800_v52  ;;  %v6854_v51 = vld [vmem:[%s9136_s4 + $0x368] sm:$0xff]   ;;  %v6855_v52 = vld [vmem:[%s9136_s4 + $0x330] sm:$0xff]  }
 0x711   :  { %6134 = vmatprep.subr.bf16.mxu1 %v6962_v48  ;;  %6154 = vmatprep.subr.bf16.mxu0 %v6962_v48 }
 0x714   :  { %6135 = vmatpush3.bf16.msra.mxu1 %v7439_v13  ;;  %6155 = vmatpush3.bf16.msra.mxu0 %v7442_v14  ;;  %v6802_v13 = vld [vmem:[%s9136_s4 + $0x1c0] sm:$0xff]   ;;  %v6803_v14 = vld [vmem:[%s9136_s4 + $0x188] sm:$0xff]  }
 0x715   :  { %6160 = vmatprep.subr.bf16.mxu1 %v6962_v48  ;;  %6180 = vmatprep.subr.bf16.mxu0 %v6962_v48 }
 0x717   :  { %6137 = vmatmul.mubr.msk.bf16.vlgmr.msra.gmra.mrb[64].mxu1 %vm748_vm6, %v8326_v12  ;;  %6157 = vmatmul.mubr.msk.bf16.vlgmr.msra.gmra.mrb[68].mxu0 %vm748_vm6, %v8326_v12 }
 0x718   :  { %6161 = vmatpush3.bf16.msra.mxu1 %v6801_v11  ;;  %6181 = vmatpush3.bf16.msra.mxu0 %v6802_v13  ;;  %v6856_v11 = vld [vmem:[%s9136_s4 + $0x370] sm:$0xff]   ;;  %v6857_v13 = vld [vmem:[%s9136_s4 + $0x380] sm:$0xff]  }
 0x719   :  { %6162 = vmatprep.subr.bf16.mxu1 %v6962_v48  ;;  %6182 = vmatprep.subr.bf16.mxu0 %v6962_v48 }
 0x71a   :  { %6176 = vmatprep.mubr.msk.bf16.mxu1 %vm6964_vm5, %v6962_v48  ;;  %6196 = vmatprep.mubr.msk.bf16.mxu0 %vm6964_vm5, %v6962_v48 }
 0x71c   :  { %6163 = vmatpush3.bf16.msra.mxu1 %v6803_v14  ;;  %6183 = vmatpush3.bf16.msra.mxu0 %v6804_v53  ;;  %v6860_v14 = vld [vmem:[%s9136_s4 + $0x3c8] sm:$0xff]   ;;  %v6861_v53 = vld [vmem:[%s9136_s4 + $0x390] sm:$0xff]  }
 0x71d   :  { %6164 = vmatprep.subr.bf16.mxu1 %v6962_v48  ;;  %6184 = vmatprep.subr.bf16.mxu0 %v6962_v48 }
 0x720   :  { %6165 = vmatpush3.bf16.msra.mxu1 %v6805_v55  ;;  %6185 = vmatpush3.bf16.msra.mxu0 %v6806_v61  ;;  %v6862_v55 = vld [vmem:[%s9136_s4 + $0x3d0] sm:$0xff]   ;;  %v6863_v61 = vld [vmem:[%s9136_s4 + $0x398] sm:$0xff]  }
 0x721   :  { %6166 = vmatprep.subr.bf16.mxu1 %v6962_v48  ;;  %6186 = vmatprep.subr.bf16.mxu0 %v6962_v48 }
 0x724   :  { %6167 = vmatpush3.bf16.msra.mxu1 %v6807_v62  ;;  %6187 = vmatpush3.bf16.msra.mxu0 %v6808_v63  ;;  %v6864_v62 = vld [vmem:[%s9136_s4 + $0x3d8] sm:$0xff]   ;;  %v6865_v63 = vld [vmem:[%s9136_s4 + $0x3a0] sm:$0xff]  }
 0x725   :  { %6168 = vmatprep.subr.bf16.mxu1 %v6962_v48  ;;  %6188 = vmatprep.subr.bf16.mxu0 %v6962_v48 }
 0x728   :  { %6169 = vmatpush3.bf16.msra.mxu1 %v6809_v0  ;;  %6189 = vmatpush3.bf16.msra.mxu0 %v6810_v2  ;;  %v6866_v0 = vld [vmem:[%s9136_s4 + $0x3e0] sm:$0xff]  }
 0x729   :  { %6170 = vmatprep.subr.bf16.mxu1 %v6962_v48  ;;  %6190 = vmatprep.subr.bf16.mxu0 %v6962_v48 }
 0x72c   :  { %6171 = vmatpush3.bf16.msra.mxu1 %v6811_v1  ;;  %6191 = vmatpush3.bf16.msra.mxu0 %v6812_v47 }
 0x72d   :  { %6172 = vmatprep.subr.bf16.mxu1 %v6962_v48  ;;  %6192 = vmatprep.subr.bf16.mxu0 %v6962_v48 }
 0x730   :  { %6173 = vmatpush3.bf16.msra.mxu1 %v6813_v3  ;;  %6193 = vmatpush3.bf16.msra.mxu0 %v6814_v4 }
 0x731   :  { %6174 = vmatprep.subr.bf16.mxu1 %v6962_v48  ;;  %6194 = vmatprep.subr.bf16.mxu0 %v6962_v48 }
 0x734   :  { %6175 = vmatpush3.bf16.msra.mxu1 %v7519_v34  ;;  %6195 = vmatpush3.bf16.msra.mxu0 %v7522_v35  ;;  %v6816_v34 = vld [vmem:[%s9136_s4 + $0x240] sm:$0xff]   ;;  %v6817_v35 = vld [vmem:[%s9136_s4 + $0x208] sm:$0xff]  }
 0x735   :  { %6200 = vmatprep.subr.bf16.mxu1 %v6962_v48  ;;  %6220 = vmatprep.subr.bf16.mxu0 %v6962_v48 }
 0x737   :  { %6177 = vmatmul.mubr.msk.bf16.vlgmr.msra.gmra.mrb[68].mxu1 %vm748_vm6, %v8326_v12  ;;  %6197 = vmatmul.mubr.msk.bf16.vlgmr.msra.gmra.mrb[72].mxu0 %vm748_vm6, %v8326_v12 }
 0x738   :  { %6201 = vmatpush3.bf16.msra.mxu1 %v6815_v5  ;;  %6221 = vmatpush3.bf16.msra.mxu0 %v6816_v34  ;;  %v6867_v5 = vld [vmem:[%s9136_s4 + $0x3a8] sm:$0xff]  }
 0x739   :  { %6202 = vmatprep.subr.bf16.mxu1 %v6962_v48  ;;  %6222 = vmatprep.subr.bf16.mxu0 %v6962_v48  ;;  %v6868_v34 = vld [vmem:[%s9136_s4 + $0x3e8] sm:$0xff]  }
 0x73a   :  { %6216 = vmatprep.mubr.msk.bf16.mxu1 %vm6964_vm5, %v6962_v48  ;;  %6236 = vmatprep.mubr.msk.bf16.mxu0 %vm6964_vm5, %v6962_v48 }
 0x73c   :  { %6203 = vmatpush3.bf16.msra.mxu1 %v6817_v35  ;;  %6223 = vmatpush3.bf16.msra.mxu0 %v6818_v6 }
 0x73d   :  { %6204 = vmatprep.subr.bf16.mxu1 %v6962_v48  ;;  %6224 = vmatprep.subr.bf16.mxu0 %v6962_v48 }
 0x740   :  { %6205 = vmatpush3.bf16.msra.mxu1 %v6819_v7  ;;  %6225 = vmatpush3.bf16.msra.mxu0 %v6820_v8 }
 0x741   :  { %6206 = vmatprep.subr.bf16.mxu1 %v6962_v48  ;;  %6226 = vmatprep.subr.bf16.mxu0 %v6962_v48 }
 0x744   :  { %6207 = vmatpush3.bf16.msra.mxu1 %v6821_v9  ;;  %6227 = vmatpush3.bf16.msra.mxu0 %v6822_v10 }
 0x745   :  { %6208 = vmatprep.subr.bf16.mxu1 %v6962_v48  ;;  %6228 = vmatprep.subr.bf16.mxu0 %v6962_v48 }
 0x748   :  { %6209 = vmatpush3.bf16.msra.mxu1 %v6823_v26  ;;  %6229 = vmatpush3.bf16.msra.mxu0 %v6824_v27  ;;  %v6869_v27 = vld [vmem:[%s9136_s4 + $0x3b0] sm:$0xff]  }
 0x749   :  { %6210 = vmatprep.subr.bf16.mxu1 %v6962_v48  ;;  %6230 = vmatprep.subr.bf16.mxu0 %v6962_v48 }
 0x74c   :  { %6211 = vmatpush3.bf16.msra.mxu1 %v6825_v19  ;;  %6231 = vmatpush3.bf16.msra.mxu0 %v6826_v20  ;;  %v6870_v19 = vld [vmem:[%s9136_s4 + $0x3f0] sm:$0xff]   ;;  %v6871_v20 = vld [vmem:[%s9139_s7 + $0x40] sm:$0xff]  }
 0x74d   :  { %6212 = vmatprep.subr.bf16.mxu1 %v6962_v48  ;;  %6232 = vmatprep.subr.bf16.mxu0 %v6962_v48 }
 0x750   :  { %6213 = vmatpush3.bf16.msra.mxu1 %v6827_v21  ;;  %6233 = vmatpush3.bf16.msra.mxu0 %v6828_v22  ;;  %v6875_v21 = vld [vmem:[%s9139_s7 + $0x50] sm:$0xff]  }
 0x751   :  { %6214 = vmatprep.subr.bf16.mxu1 %v6962_v48  ;;  %6234 = vmatprep.subr.bf16.mxu0 %v6962_v48  ;;  %v6876_v22 = vld [vmem:[%s9139_s7 + $0x10] sm:$0xff]  }
 0x754   :  { %6215 = vmatpush3.bf16.msra.mxu1 %v7599_v56  ;;  %6235 = vmatpush3.bf16.msra.mxu0 %v7602_v57  ;;  %v6830_v56 = vld [vmem:[%s9136_s4 + $0x2c0] sm:$0xff]   ;;  %v6831_v57 = vld [vmem:[%s9136_s4 + $0x288] sm:$0xff]  }
 0x755   :  { %6240 = vmatprep.subr.bf16.mxu1 %v6962_v48  ;;  %6260 = vmatprep.subr.bf16.mxu0 %v6962_v48 }
 0x757   :  { %6217 = vmatmul.mubr.msk.bf16.vlgmr.msra.gmra.mrb[72].mxu1 %vm748_vm6, %v8326_v12  ;;  %6237 = vmatmul.mubr.msk.bf16.vlgmr.msra.gmra.mrb[76].mxu0 %vm748_vm6, %v8326_v12 }
 0x758   :  { %6241 = vmatpush3.bf16.msra.mxu1 %v6829_v23  ;;  %6261 = vmatpush3.bf16.msra.mxu0 %v6830_v56  ;;  %v6877_v23 = vld [vmem:[%s9139_s7 + $0x58] sm:$0xff]  }
 0x759   :  { %6242 = vmatprep.subr.bf16.mxu1 %v6962_v48  ;;  %6262 = vmatprep.subr.bf16.mxu0 %v6962_v48  ;;  %v6878_v56 = vld [vmem:[%s9139_s7 + $0x18] sm:$0xff]  }
 0x75a   :  { %6256 = vmatprep.mubr.msk.bf16.mxu1 %vm6964_vm5, %v6962_v48  ;;  %6276 = vmatprep.mubr.msk.bf16.mxu0 %vm6964_vm5, %v6962_v48 }
 0x75c   :  { %6243 = vmatpush3.bf16.msra.mxu1 %v6831_v57  ;;  %6263 = vmatpush3.bf16.msra.mxu0 %v6832_v24  ;;  %v6879_v57 = vld [vmem:[%s9139_s7 + $0x60] sm:$0xff]  }
 0x75d   :  { %6244 = vmatprep.subr.bf16.mxu1 %v6962_v48  ;;  %6264 = vmatprep.subr.bf16.mxu0 %v6962_v48  ;;  %v6880_v24 = vld [vmem:[%s9139_s7 + $0x20] sm:$0xff]  }
 0x760   :  { %6245 = vmatpush3.bf16.msra.mxu1 %v6833_v28  ;;  %6265 = vmatpush3.bf16.msra.mxu0 %v6834_v29 }
 0x761   :  { %6246 = vmatprep.subr.bf16.mxu1 %v6962_v48  ;;  %6266 = vmatprep.subr.bf16.mxu0 %v6962_v48 }
 0x764   :  { %6247 = vmatpush3.bf16.msra.mxu1 %v6835_v30  ;;  %6267 = vmatpush3.bf16.msra.mxu0 %v6836_v31  ;;  %v6881_v30 = vld [vmem:[%s9139_s7 + $0x68] sm:$0xff]  }
 0x765   :  { %6248 = vmatprep.subr.bf16.mxu1 %v6962_v48  ;;  %6268 = vmatprep.subr.bf16.mxu0 %v6962_v48 }
 0x768   :  { %6249 = vmatpush3.bf16.msra.mxu1 %v6837_v32  ;;  %6269 = vmatpush3.bf16.msra.mxu0 %v6838_v40 }
 0x769   :  { %6250 = vmatprep.subr.bf16.mxu1 %v6962_v48  ;;  %6270 = vmatprep.subr.bf16.mxu0 %v6962_v48 }
 0x76c   :  { %6251 = vmatpush3.bf16.msra.mxu1 %v6839_v33  ;;  %6271 = vmatpush3.bf16.msra.mxu0 %v6840_v36 }
 0x76d   :  { %6252 = vmatprep.subr.bf16.mxu1 %v6962_v48  ;;  %6272 = vmatprep.subr.bf16.mxu0 %v6962_v48 }
 0x770   :  { %6253 = vmatpush3.bf16.msra.mxu1 %v6841_v58  ;;  %6273 = vmatpush3.bf16.msra.mxu0 %v6842_v59 }
 0x771   :  { %6254 = vmatprep.subr.bf16.mxu1 %v6962_v48  ;;  %6274 = vmatprep.subr.bf16.mxu0 %v6962_v48 }
 0x774   :  { %6255 = vmatpush3.bf16.msra.mxu1 %v7679_v15  ;;  %6275 = vmatpush3.bf16.msra.mxu0 %v7682_v16  ;;  %v6844_v15 = vld [vmem:[%s9136_s4 + $0x340] sm:$0xff]   ;;  %v6845_v16 = vld [vmem:[%s9136_s4 + $0x308] sm:$0xff]  }
 0x775   :  { %6280 = vmatprep.subr.bf16.mxu1 %v6962_v48  ;;  %6300 = vmatprep.subr.bf16.mxu0 %v6962_v48 }
 0x777   :  { %6257 = vmatmul.mubr.msk.bf16.vlgmr.msra.gmra.mrb[76].mxu1 %vm748_vm6, %v8326_v12  ;;  %6277 = vmatmul.mubr.msk.bf16.vlgmr.msra.gmra.mrb[80].mxu0 %vm748_vm6, %v8326_v12 }
 0x778   :  { %6281 = vmatpush3.bf16.msra.mxu1 %v6843_v37  ;;  %6301 = vmatpush3.bf16.msra.mxu0 %v6844_v15 }
 0x779   :  { %6282 = vmatprep.subr.bf16.mxu1 %v6962_v48  ;;  %6302 = vmatprep.subr.bf16.mxu0 %v6962_v48 }
 0x77a   :  { %6296 = vmatprep.mubr.msk.bf16.mxu1 %vm6964_vm5, %v6962_v48  ;;  %6316 = vmatprep.mubr.msk.bf16.mxu0 %vm6964_vm5, %v6962_v48 }
 0x77c   :  { %6283 = vmatpush3.bf16.msra.mxu1 %v6845_v16  ;;  %6303 = vmatpush3.bf16.msra.mxu0 %v6846_v41  ;;  %v6882_v16 = vld [vmem:[%s9139_s7 + $0x28] sm:$0xff]   ;;  %v6883_v41 = vld [vmem:[%s9139_s7 + $0x70] sm:$0xff]  }
 0x77d   :  { %6284 = vmatprep.subr.bf16.mxu1 %v6962_v48  ;;  %6304 = vmatprep.subr.bf16.mxu0 %v6962_v48 }
 0x780   :  { %6285 = vmatpush3.bf16.msra.mxu1 %v6847_v42  ;;  %6305 = vmatpush3.bf16.msra.mxu0 %v6848_v43  ;;  %v6884_v43 = vld [vmem:[%s9139_s7 + $0x30] sm:$0xff]  }
 0x781   :  { %6286 = vmatprep.subr.bf16.mxu1 %v6962_v48  ;;  %6306 = vmatprep.subr.bf16.mxu0 %v6962_v48 }
 0x784   :  { %6287 = vmatpush3.bf16.msra.mxu1 %v6849_v44  ;;  %6307 = vmatpush3.bf16.msra.mxu0 %v6850_v45  ;;  %v6885_v44 = vld [vmem:[%s9139_s7 + $0x78] sm:$0xff]  }
 0x785   :  { %6288 = vmatprep.subr.bf16.mxu1 %v6962_v48  ;;  %6308 = vmatprep.subr.bf16.mxu0 %v6962_v48  ;;  %v6886_v45 = vld [vmem:[%s9139_s7 + $0x38] sm:$0xff]  }
 0x788   :  { %6289 = vmatpush3.bf16.msra.mxu1 %v6851_v49  ;;  %6309 = vmatpush3.bf16.msra.mxu0 %v6852_v46  ;;  %v6887_v49 = vld [vmem:[%s9139_s7 + $0x140] sm:$0xff]  }
 0x789   :  { %6290 = vmatprep.subr.bf16.mxu1 %v6962_v48  ;;  %6310 = vmatprep.subr.bf16.mxu0 %v6962_v48 }
 0x78c   :  { %6291 = vmatpush3.bf16.msra.mxu1 %v6853_v50  ;;  %6311 = vmatpush3.bf16.msra.mxu0 %v6854_v51 }
 0x78d   :  { %6292 = vmatprep.subr.bf16.mxu1 %v6962_v48  ;;  %6312 = vmatprep.subr.bf16.mxu0 %v6962_v48 }
 0x790   :  { %6293 = vmatpush3.bf16.msra.mxu1 %v6855_v52  ;;  %6313 = vmatpush3.bf16.msra.mxu0 %v6856_v11 }
 0x791   :  { %6294 = vmatprep.subr.bf16.mxu1 %v6962_v48  ;;  %6314 = vmatprep.subr.bf16.mxu0 %v6962_v48 }
 0x794   :  { %6295 = vmatpush3.bf16.msra.mxu1 %v7759_v38  ;;  %6315 = vmatpush3.bf16.msra.mxu0 %v7762_v39  ;;  %v6858_v38 = vld [vmem:[%s9136_s4 + $0x3c0] sm:$0xff]   ;;  %v6859_v39 = vld [vmem:[%s9136_s4 + $0x388] sm:$0xff]  }
 0x795   :  { %6320 = vmatprep.subr.bf16.mxu1 %v6962_v48  ;;  %6340 = vmatprep.subr.bf16.mxu0 %v6962_v48 }
 0x797   :  { %6297 = vmatmul.mubr.msk.bf16.vlgmr.msra.gmra.mrb[80].mxu1 %vm748_vm6, %v8326_v12  ;;  %6317 = vmatmul.mubr.msk.bf16.vlgmr.msra.gmra.mrb[84].mxu0 %vm748_vm6, %v8326_v12 }
 0x798   :  { %6321 = vmatpush3.bf16.msra.mxu1 %v6857_v13  ;;  %6341 = vmatpush3.bf16.msra.mxu0 %v6858_v38 }
 0x799   :  { %6322 = vmatprep.subr.bf16.mxu1 %v6962_v48  ;;  %6342 = vmatprep.subr.bf16.mxu0 %v6962_v48 }
 0x79a   :  { %6336 = vmatprep.mubr.msk.bf16.mxu1 %vm6964_vm5, %v6962_v48  ;;  %6356 = vmatprep.mubr.msk.bf16.mxu0 %vm6964_vm5, %v6962_v48 }
 0x79c   :  { %6323 = vmatpush3.bf16.msra.mxu1 %v6859_v39  ;;  %6343 = vmatpush3.bf16.msra.mxu0 %v6860_v14 }
 0x79d   :  { %6324 = vmatprep.subr.bf16.mxu1 %v6962_v48  ;;  %6344 = vmatprep.subr.bf16.mxu0 %v6962_v48 }
 0x7a0   :  { %6325 = vmatpush3.bf16.msra.mxu1 %v6861_v53  ;;  %6345 = vmatpush3.bf16.msra.mxu0 %v6862_v55 }
 0x7a1   :  { %6326 = vmatprep.subr.bf16.mxu1 %v6962_v48  ;;  %6346 = vmatprep.subr.bf16.mxu0 %v6962_v48 }
 0x7a4   :  { %6327 = vmatpush3.bf16.msra.mxu1 %v6863_v61  ;;  %6347 = vmatpush3.bf16.msra.mxu0 %v6864_v62 }
 0x7a5   :  { %6328 = vmatprep.subr.bf16.mxu1 %v6962_v48  ;;  %6348 = vmatprep.subr.bf16.mxu0 %v6962_v48 }
 0x7a8   :  { %6329 = vmatpush3.bf16.msra.mxu1 %v6865_v63  ;;  %6349 = vmatpush3.bf16.msra.mxu0 %v6866_v0 }
 0x7a9   :  { %6330 = vmatprep.subr.bf16.mxu1 %v6962_v48  ;;  %6350 = vmatprep.subr.bf16.mxu0 %v6962_v48 }
 0x7aa   :  { %v3424_v2 = vpop.f32.mrb[56].mxu1  ;;  %v3465_v1 = vpop.f32.mrb[60].mxu0 }
 0x7ab   :  { %v3471_v47 = vpack.c.bf16 %v3465_v1, %v3465_v1  ;;  %v6058_v3 = vpop.f32.mrb[57].mxu1  ;;  %v6078_v4 = vpop.f32.mrb[61].mxu0  ;;  %v3430_v7 = vpack.c.bf16 %v3424_v2, %v3424_v2 }
 0x7ac   :  { %6331 = vmatpush3.bf16.msra.mxu1 %v6867_v5  ;;  %6351 = vmatpush3.bf16.msra.mxu0 %v6868_v34  ;;  %v3427_v35 = vpop.f32.mrb[58].mxu1  ;;  %v3468_v6 = vpop.f32.mrb[62].mxu0 }
 0x7ad   :  { %v4047_v8 = vrot.slane %v3471_v47, 4  ;;  %v6059_v9 = vpop.f32.mrb[59].mxu1  ;;  %v6079_v10 = vpop.f32.mrb[63].mxu0  ;;  %6332 = vmatprep.subr.bf16.mxu1 %v6962_v48  ;;  %6352 = vmatprep.subr.bf16.mxu0 %v6962_v48 }
 0x7af   :  { %v4064_v26 = vsel %vm752_vm3, %v3430_v7, %v4047_v8 }
 0x7b0   :  { %6333 = vmatpush3.bf16.msra.mxu1 %v6869_v27  ;;  %6353 = vmatpush3.bf16.msra.mxu0 %v6870_v19 }
 0x7b1   :  { %6334 = vmatprep.subr.bf16.mxu1 %v6962_v48  ;;  %6354 = vmatprep.subr.bf16.mxu0 %v6962_v48 }
 0x7b4   :  { %6335 = vmatpush3.bf16.msra.mxu1 %v7840_v17  ;;  %6355 = vmatpush3.bf16.msra.mxu0 %v7843_v18  ;;  %v6872_v17 = vld [vmem:[%s9139_s7] sm:$0xff]   ;;  %v6873_v18 = vld [vmem:[%s9139_s7 + $0x48] sm:$0xff]  }
 0x7b5   :  { %6360 = vmatprep.subr.bf16.mxu1 %v6962_v48  ;;  %5596 = vmatprep.subr.bf16.mxu0 %v6871_v20 }
 0x7b7   :  { %6337 = vmatmul.mubr.msk.bf16.vlgmr.msra.gmra.mrb[84].mxu1 %vm748_vm6, %v8326_v12  ;;  %6357 = vmatmul.mubr.msk.bf16.vlgmr.msra.gmra.mrb[88].mxu0 %vm748_vm6, %v8326_v12  ;;  %v6874_v12 = vld [vmem:[%s9139_s7 + $0x8] sm:$0xff]  }
 0x7b8   :  { %6361 = vmatpush3.bf16.msra.mxu1 %v4064_v26  ;;  %6376 = vmatprep.mubr.msk.bf16.mxu1 %vm6964_vm5, %v6962_v48 }
 0x7b9   :  { %6362 = vmatprep.subr.bf16.mxu1 %v6962_v48  ;;  %5597 = vmatpush3.bf16.msra.mxu0 %v6872_v17 }
 0x7ba   :  { %5598 = vmatprep.subr.bf16.mxu0 %v6873_v18 }
 0x7bd   :  { %5599 = vmatpush3.bf16.msra.mxu0 %v6874_v12 }
 0x7be   :  { %5600 = vmatprep.subr.bf16.mxu0 %v6875_v21 }
 0x7c1   :  { %5601 = vmatpush3.bf16.msra.mxu0 %v6876_v22 }
 0x7c2   :  { %5602 = vmatprep.subr.bf16.mxu0 %v6877_v23 }
 0x7c5   :  { %5603 = vmatpush3.bf16.msra.mxu0 %v6878_v56 }
 0x7c6   :  { %5604 = vmatprep.subr.bf16.mxu0 %v6879_v57 }
 0x7c9   :  { %5605 = vmatpush3.bf16.msra.mxu0 %v6880_v24 }
 0x7ca   :  { %v3506_v28 = vpop.f32.mrb[60].mxu1  ;;  %v3547_v29 = vpop.f32.mrb[64].mxu0  ;;  %5606 = vmatprep.subr.bf16.mxu0 %v6881_v30 }
 0x7cb   :  { %v3553_v31 = vpack.c.bf16 %v3547_v29, %v3547_v29  ;;  %v6098_v32 = vpop.f32.mrb[61].mxu1  ;;  %v6118_v40 = vpop.f32.mrb[65].mxu0  ;;  %v3512_v58 = vpack.c.bf16 %v3506_v28, %v3506_v28 }
 0x7cc   :  { %v3509_v33 = vpop.f32.mrb[62].mxu1  ;;  %v3550_v36 = vpop.f32.mrb[66].mxu0 }
 0x7cd   :  { %v4049_v59 = vrot.slane %v3553_v31, 4  ;;  %v6099_v37 = vpop.f32.mrb[63].mxu1  ;;  %v6119_v15 = vpop.f32.mrb[67].mxu0  ;;  %5607 = vmatpush3.bf16.msra.mxu0 %v6882_v16 }
 0x7ce   :  { %5608 = vmatprep.subr.bf16.mxu0 %v6883_v41 }
 0x7cf   :  { %v4068_v42 = vsel %vm752_vm3, %v3512_v58, %v4049_v59 }
 0x7d0   :  { %6363 = vmatpush3.bf16.msra.mxu1 %v4068_v42 }
 0x7d1   :  { %6364 = vmatprep.subr.bf16.mxu1 %v6962_v48  ;;  %5609 = vmatpush3.bf16.msra.mxu0 %v6884_v43 }
 0x7d2   :  { %5610 = vmatprep.subr.bf16.mxu0 %v6885_v44 }
 0x7d5   :  { %5611 = vmatpush3.bf16.msra.mxu0 %v6886_v45 }
 0x7d6   :  { %5640 = vmatprep.subr.bf16.mxu0 %v6887_v49 }
 0x7ea   :  { %v3588_v46 = vpop.f32.mrb[64].mxu1  ;;  %v3629_v50 = vpop.f32.mrb[68].mxu0 }
 0x7eb   :  { %v3635_v51 = vpack.c.bf16 %v3629_v50, %v3629_v50  ;;  %v6138_v52 = vpop.f32.mrb[65].mxu1  ;;  %v6158_v11 = vpop.f32.mrb[69].mxu0  ;;  %v3594_v39 = vpack.c.bf16 %v3588_v46, %v3588_v46 }
 0x7ec   :  { %v3591_v13 = vpop.f32.mrb[66].mxu1  ;;  %v3632_v38 = vpop.f32.mrb[70].mxu0 }
 0x7ed   :  { %v4051_v14 = vrot.slane %v3635_v51, 4  ;;  %v6139_v53 = vpop.f32.mrb[67].mxu1  ;;  %v6159_v55 = vpop.f32.mrb[71].mxu0 }
 0x7ef   :  { %v4072_v61 = vsel %vm752_vm3, %v3594_v39, %v4051_v14 }
 0x7f0   :  { %6365 = vmatpush3.bf16.msra.mxu1 %v4072_v61 }
 0x7f1   :  { %6366 = vmatprep.subr.bf16.mxu1 %v6962_v48 }
 0x80a   :  { %v3670_v62 = vpop.f32.mrb[68].mxu1  ;;  %v3711_v63 = vpop.f32.mrb[72].mxu0 }
 0x80b   :  { %v3717_v0 = vpack.c.bf16 %v3711_v63, %v3711_v63  ;;  %v6178_v2 = vpop.f32.mrb[69].mxu1  ;;  %v6198_v1 = vpop.f32.mrb[73].mxu0  ;;  %v3676_v4 = vpack.c.bf16 %v3670_v62, %v3670_v62  ;;  %v6888_v62 = vld [vmem:[%s9139_s7 + $0xc0] sm:$0xff]  }
 0x80c   :  { %v3673_v47 = vpop.f32.mrb[70].mxu1  ;;  %v3714_v3 = vpop.f32.mrb[74].mxu0  ;;  %v6889_v63 = vld [vmem:[%s9137_s5] sm:$0xff]   ;;  %v6891_v2 = vld [vmem:[%s9139_s7 + $0xc8] sm:$0xff]  }
 0x80d   :  { %v4053_v5 = vrot.slane %v3717_v0, 4  ;;  %v6179_v34 = vpop.f32.mrb[71].mxu1  ;;  %v6199_v35 = vpop.f32.mrb[75].mxu0  ;;  %v6890_v0 = vld [vmem:[%s9139_s7 + $0x80] sm:$0xff]   ;;  %v6892_v1 = vld [vmem:[%s9139_s7 + $0x88] sm:$0xff]   ;;  %v6893_v47 = vld [vmem:[%s9139_s7 + $0xd0] sm:$0xff]  }
 0x80e   :  { %v6894_v3 = vld [vmem:[%s9139_s7 + $0x90] sm:$0xff]   ;;  %v6897_v34 = vld [vmem:[%s9139_s7 + $0xe0] sm:$0xff]  }
 0x80f   :  { %v4076_v6 = vsel %vm752_vm3, %v3676_v4, %v4053_v5  ;;  %v6895_v4 = vld [vmem:[%s9139_s7 + $0xd8] sm:$0xff]   ;;  %v6898_v35 = vld [vmem:[%s9139_s7 + $0xa0] sm:$0xff]  }
 0x810   :  { %6367 = vmatpush3.bf16.msra.mxu1 %v4076_v6  ;;  %v6896_v5 = vld [vmem:[%s9139_s7 + $0x98] sm:$0xff]   ;;  %v6899_v6 = vld [vmem:[%s9139_s7 + $0xe8] sm:$0xff]  }
 0x811   :  { %6368 = vmatprep.subr.bf16.mxu1 %v6962_v48 }
 0x82a   :  { %v3752_v7 = vpop.f32.mrb[72].mxu1  ;;  %v3793_v8 = vpop.f32.mrb[76].mxu0 }
 0x82b   :  { %v3799_v9 = vpack.c.bf16 %v3793_v8, %v3793_v8  ;;  %v6218_v10 = vpop.f32.mrb[73].mxu1  ;;  %v6238_v26 = vpop.f32.mrb[77].mxu0  ;;  %v3758_v20 = vpack.c.bf16 %v3752_v7, %v3752_v7  ;;  %v6900_v7 = vld [vmem:[%s9139_s7 + $0xa8] sm:$0xff]   ;;  %v6901_v8 = vld [vmem:[%s9139_s7 + $0xf0] sm:$0xff]  }
 0x82c   :  { %v3755_v27 = vpop.f32.mrb[74].mxu1  ;;  %v3796_v19 = vpop.f32.mrb[78].mxu0  ;;  %v6903_v10 = vld [vmem:[%s9139_s7 + $0xf8] sm:$0xff]  }
 0x82d   :  { %v4055_v17 = vrot.slane %v3799_v9, 4  ;;  %v6219_v18 = vpop.f32.mrb[75].mxu1  ;;  %v6239_v12 = vpop.f32.mrb[79].mxu0  ;;  %v6902_v9 = vld [vmem:[%s9139_s7 + $0xb0] sm:$0xff]   ;;  %v6904_v26 = vld [vmem:[%s9139_s7 + $0xb8] sm:$0xff]   ;;  %v6905_v27 = vld [vmem:[%s9139_s7 + $0x1c0] sm:$0xff]  }
 0x82f   :  { %v4080_v21 = vsel %vm752_vm3, %v3758_v20, %v4055_v17 }
 0x830   :  { %6369 = vmatpush3.bf16.msra.mxu1 %v4080_v21 }
 0x831   :  { %6370 = vmatprep.subr.bf16.mxu1 %v6962_v48 }
 0x84a   :  { %v3834_v22 = vpop.f32.mrb[76].mxu1  ;;  %v3875_v23 = vpop.f32.mrb[80].mxu0 }
 0x84b   :  { %v3881_v56 = vpack.c.bf16 %v3875_v23, %v3875_v23  ;;  %v6258_v57 = vpop.f32.mrb[77].mxu1  ;;  %v6278_v24 = vpop.f32.mrb[81].mxu0  ;;  %v3840_v30 = vpack.c.bf16 %v3834_v22, %v3834_v22 }
 0x84c   :  { %v3837_v28 = vpop.f32.mrb[78].mxu1  ;;  %v3878_v29 = vpop.f32.mrb[82].mxu0 }
 0x84d   :  { %v4057_v31 = vrot.slane %v3881_v56, 4  ;;  %v6259_v32 = vpop.f32.mrb[79].mxu1  ;;  %v6279_v40 = vpop.f32.mrb[83].mxu0 }
 0x84f   :  { %v4084_v33 = vsel %vm752_vm3, %v3840_v30, %v4057_v31 }
 0x850   :  { %6371 = vmatpush3.bf16.msra.mxu1 %v4084_v33 }
 0x851   :  { %6372 = vmatprep.subr.bf16.mxu1 %v6962_v48 }
 0x86a   :  { %v3916_v36 = vpop.f32.mrb[80].mxu1  ;;  %v3957_v58 = vpop.f32.mrb[84].mxu0 }
 0x86b   :  { %v3963_v59 = vpack.c.bf16 %v3957_v58, %v3957_v58  ;;  %v6298_v37 = vpop.f32.mrb[81].mxu1  ;;  %v6318_v15 = vpop.f32.mrb[85].mxu0  ;;  %v3922_v42 = vpack.c.bf16 %v3916_v36, %v3916_v36 }
 0x86c   :  { %v3919_v16 = vpop.f32.mrb[82].mxu1  ;;  %v3960_v41 = vpop.f32.mrb[86].mxu0 }
 0x86d   :  { %v4059_v43 = vrot.slane %v3963_v59, 4  ;;  %v6299_v44 = vpop.f32.mrb[83].mxu1  ;;  %v6319_v45 = vpop.f32.mrb[87].mxu0  ;;  %v6906_v16 = vld [vmem:[%s9139_s7 + $0x100] sm:$0xff]  }
 0x86f   :  { %v4088_v49 = vsel %vm752_vm3, %v3922_v42, %v4059_v43  ;;  %v6907_v43 = vld [vmem:[%s9139_s7 + $0x148] sm:$0xff]  }
 0x870   :  { %6373 = vmatpush3.bf16.msra.mxu1 %v4088_v49  ;;  %v6908_v49 = vld [vmem:[%s9139_s7 + $0x108] sm:$0xff]  }
 0x871   :  { %6374 = vmatprep.subr.bf16.mxu1 %v6962_v48 }
 0x88a   :  { %v3998_v46 = vpop.f32.mrb[84].mxu1  ;;  %v4039_v50 = vpop.f32.mrb[88].mxu0 }
 0x88b   :  { %v4045_v51 = vpack.c.bf16 %v4039_v50, %v4039_v50  ;;  %v6338_v52 = vpop.f32.mrb[85].mxu1  ;;  %v6358_v11 = vpop.f32.mrb[89].mxu0  ;;  %v4004_v39 = vpack.c.bf16 %v3998_v46, %v3998_v46  ;;  %v6909_v46 = vld [vmem:[%s9139_s7 + $0x180] sm:$0xff]  }
 0x88c   :  { %v4001_v13 = vpop.f32.mrb[86].mxu1  ;;  %v4042_v38 = vpop.f32.mrb[90].mxu0  ;;  %v6911_v11 = vld [vmem:[%s9139_s7 + $0x1c8] sm:$0xff]  }
 0x88d   :  { %v4061_v14 = vrot.slane %v4045_v51, 4  ;;  %v6339_v53 = vpop.f32.mrb[87].mxu1  ;;  %v6359_v55 = vpop.f32.mrb[91].mxu0  ;;  %v6910_v51 = vld [vmem:[%s9139_s7 + $0x150] sm:$0xff]  }
 0x88e   :  { %v6912_v38 = vld [vmem:[%s9139_s7 + $0x110] sm:$0xff]   ;;  %v6914_v53 = vld [vmem:[%s9139_s7 + $0x158] sm:$0xff]  }
 0x88f   :  { %v4092_v61 = vsel %vm752_vm3, %v4004_v39, %v4061_v14  ;;  %v6913_v39 = vld [vmem:[%s9139_s7 + $0x188] sm:$0xff]   ;;  %v6915_v55 = vld [vmem:[%s9139_s7 + $0x1d0] sm:$0xff]  }
 0x890   :  { %6375 = vmatpush3.bf16.msra.mxu1 %v4092_v61 }
 0x891   :  { %5618 = vmatprep.subr.bf16.mxu1 %v6888_v62  ;;  %v6916_v62 = vld [vmem:[%s9139_s7 + $0x118] sm:$0xff]  }
 0x893   :  { %6377 = vmatmul.mubr.bf16.vlgmr.msra.gmra.mrb[88].mxu1 %v6889_v63  ;;  %v6917_v63 = vld [vmem:[%s9139_s7 + $0x190] sm:$0xff]  }
 0x894   :  { %5619 = vmatpush3.bf16.msra.mxu1 %v6890_v0  ;;  %v6918_v0 = vld [vmem:[%s9139_s7 + $0x160] sm:$0xff]  }
 0x895   :  { %5620 = vmatprep.subr.bf16.mxu1 %v6891_v2  ;;  %v6919_v2 = vld [vmem:[%s9139_s7 + $0x1d8] sm:$0xff]  }
 0x898   :  { %5621 = vmatpush3.bf16.msra.mxu1 %v6892_v1  ;;  %v6920_v1 = vld [vmem:[%s9139_s7 + $0x120] sm:$0xff]  }
 0x899   :  { %5622 = vmatprep.subr.bf16.mxu1 %v6893_v47  ;;  %v6921_v47 = vld [vmem:[%s9139_s7 + $0x198] sm:$0xff]  }
 0x89c   :  { %5623 = vmatpush3.bf16.msra.mxu1 %v6894_v3  ;;  %v6922_v3 = vld [vmem:[%s9139_s7 + $0x168] sm:$0xff]  }
 0x89d   :  { %5624 = vmatprep.subr.bf16.mxu1 %v6895_v4  ;;  %v6923_v4 = vld [vmem:[%s9139_s7 + $0x1e0] sm:$0xff]  }
 0x8a0   :  { %5625 = vmatpush3.bf16.msra.mxu1 %v6896_v5  ;;  %v6924_v5 = vld [vmem:[%s9139_s7 + $0x128] sm:$0xff]  }
 0x8a1   :  { %5626 = vmatprep.subr.bf16.mxu1 %v6897_v34  ;;  %v6925_v34 = vld [vmem:[%s9139_s7 + $0x1a0] sm:$0xff]  }
 0x8a4   :  { %5627 = vmatpush3.bf16.msra.mxu1 %v6898_v35  ;;  %v6926_v35 = vld [vmem:[%s9139_s7 + $0x170] sm:$0xff]  }
 0x8a5   :  { %5628 = vmatprep.subr.bf16.mxu1 %v6899_v6  ;;  %v6927_v6 = vld [vmem:[%s9139_s7 + $0x1e8] sm:$0xff]  }
 0x8a8   :  { %5629 = vmatpush3.bf16.msra.mxu1 %v6900_v7  ;;  %v6928_v7 = vld [vmem:[%s9139_s7 + $0x130] sm:$0xff]  }
 0x8a9   :  { %5630 = vmatprep.subr.bf16.mxu1 %v6901_v8  ;;  %v6929_v8 = vld [vmem:[%s9139_s7 + $0x1a8] sm:$0xff]  }
 0x8ac   :  { %5631 = vmatpush3.bf16.msra.mxu1 %v6902_v9 }
 0x8ad   :  { %5632 = vmatprep.subr.bf16.mxu1 %v6903_v10  ;;  %v6930_v10 = vld [vmem:[%s9139_s7 + $0x178] sm:$0xff]  }
 0x8b0   :  { %5633 = vmatpush3.bf16.msra.mxu1 %v6904_v26  ;;  %v6931_v26 = vld [vmem:[%s9139_s7 + $0x1f0] sm:$0xff]  }
 0x8b1   :  { %5662 = vmatprep.subr.bf16.mxu1 %v6905_v27 }
 0x966   :  { %v4128_v19 = vpop.f32.mrb[88].mxu1 }
 0x967   :  { %v4129_v20 = vadd.f32 %v4128_v19, %v7960_v54  ;;  %v6378_v17 = vpop.f32.mrb[89].mxu1  ;;  %v6932_v19 = vld [vmem:[%s9139_s7 + $0x138] sm:$0xff]  }
 0x968   :  { %v4131_v18 = vpop.f32.mrb[90].mxu1  ;;  %v6934_v17 = vld [vmem:[%s9139_s7 + $0x1f8] sm:$0xff]  }
 0x969   :  { %v4132_v12 = vadd.f32 %v4131_v18, %v7962_v60  ;;  %v6379_v21 = vpop.f32.mrb[91].mxu1  ;;  %6718 = vtanh.f32 %v4129_v20  ;;  %v6933_v20 = vld [vmem:[%s9139_s7 + $0x1b0] sm:$0xff]  }
 0x96b   :  { %6720 = vtanh.f32 %v4132_v12 }
 0x96c   :  { %6722 = vtanh.f32 %v8255_v25  ;;  %v6695_v25 = vld [vmem:[%s9143_s11 + $0x18] sm:$0xff]  }
 0x973   :  { %v6719_v22 = vpop.eup %6718 }
 0x975   :  { %v6721_v23 = vpop.eup %6720 }
 0x976   :  { %v8931_v56 = vpack.c.bf16 %v6721_v23, %v6719_v22  ;;  %v6935_v22 = vld [vmem:[%s9139_s7 + $0x1b8] sm:$0xff]  }
 0x978   :  { %v4139_v57 = vshrl.u32 %v8931_v56, 16  ;;  %v4144_v40 = vrot.slane %v8931_v56, 1  ;;  %v4152_v37 = vrot.slane %v8931_v56, 3  ;;  %v4148_v15 = vrot.slane %v8931_v56, 2 }
 0x979   :  { %v4160_v45 = vrot.slane %v8931_v56, 5  ;;  %v4168_v13 = vrot.slane %v8931_v56, 7  ;;  %v4156_v27 = vrot.slane %v8931_v56, 4  ;;  %v4164_v21 = vrot.slane %v8931_v56, 6 }
 0x97a   :  { %4141 = vrot.lane.b32.xlu0 %v4139_v57, %s6965_s28  ;;  %v4145_v24 = vrot.slane %v4139_v57, 1  ;;  %v4149_v28 = vrot.slane %v4139_v57, 2  ;;  %v4153_v54 = vrot.slane %v4139_v57, 3  ;;  %v4157_v60 = vrot.slane %v4139_v57, 4 }
 0x97b   :  { %v4161_v29 = vrot.slane %v4139_v57, 5  ;;  %v4165_v30 = vrot.slane %v4139_v57, 6  ;;  %v4169_v31 = vrot.slane %v4139_v57, 7  ;;  %v6685_v57 = vld [vmem:[%s9141_s9 + $0x8] sm:$0xff]  }
 0x97c   :  { %4146 = vrot.lane.b32.xlu1 %v4145_v24, %s6965_s28  ;;  %v6686_v24 = vld [vmem:[%s9141_s9 + $0x10] sm:$0xff]  }
 0x97e   :  { %4150 = vrot.lane.b32.xlu0 %v4149_v28, %s6965_s28  ;;  %v6687_v28 = vld [vmem:[%s9141_s9 + $0x18] sm:$0xff]  }
 0x980   :  { %4154 = vrot.lane.b32.xlu1 %v4153_v54, %s6965_s28  ;;  %v6688_v54 = vld [vmem:[%s9141_s9 + $0x20] sm:$0xff]  }
 0x982   :  { %4158 = vrot.lane.b32.xlu0 %v4157_v60, %s6965_s28  ;;  %v6689_v60 = vld [vmem:[%s9141_s9 + $0x28] sm:$0xff]  }
 0x984   :  { %4162 = vrot.lane.b32.xlu1 %v4161_v29, %s6965_s28  ;;  %v6690_v29 = vld [vmem:[%s9141_s9 + $0x30] sm:$0xff]  }
 0x986   :  { %4166 = vrot.lane.b32.xlu0 %v4165_v30, %s6965_s28  ;;  %v6691_v30 = vld [vmem:[%s9141_s9 + $0x38] ss:$0 sps:$4 sm:$0xff]  }
 0x988   :  { %4170 = vrot.lane.b32.xlu1 %v4169_v31, %s6965_s28  ;;  %v4445_v31 = vsel %vm752_vm3, %v6691_v30, 0 }
 0x9ec   :  { %v4142_v32 = vpop.permute.xlu0 %4141 }
 0x9ed   :  { %v4173_v58 = vsel %vm2562_vm7, %v8931_v56, %v4142_v32  ;;  %v6684_v56 = vld [vmem:[%s9141_s9] sm:$0xff]  }
 0x9ee   :  { %v4147_v33 = vpop.permute.xlu1 %4146  ;;  %v6692_v32 = vld [vmem:[%s9143_s11] sm:$0xff]  }
 0x9ef   :  { %v4177_v36 = vsel %vm2562_vm7, %v4144_v40, %v4147_v33  ;;  %v6693_v40 = vld [vmem:[%s9143_s11 + $0x8] sm:$0xff]  }
 0x9f0   :  { %4235 = vmatprep.mubr.bf16.mxu0 %v4177_v36  ;;  %v4151_v59 = vpop.permute.xlu0 %4150 }
 0x9f1   :  { %4236 = vmatmul.mubr.bf16.vlgmr.msra.gmra.mrb[92].mxu0 %v4173_v58  ;;  %v4181_v44 = vsel %vm2562_vm7, %v4148_v15, %v4151_v59 }
 0x9f2   :  { %5641 = vmatpush3.bf16.msra.mxu0 %v6906_v16  ;;  %v4155_v41 = vpop.permute.xlu1 %4154 }
 0x9f3   :  { %v4185_v42 = vsel %vm2562_vm7, %v4152_v37, %v4155_v41  ;;  %5642 = vmatprep.subr.bf16.mxu0 %v6907_v43  ;;  %v6936_v41 = vld [vmem:[%s9140_s8] sm:$0x1] }
 0x9f4   :  { %4275 = vmatprep.mubr.bf16.mxu1 %v4185_v42  ;;  %v4159_v9 = vpop.permute.xlu0 %4158 }
 0x9f5   :  { %4276 = vmatmul.mubr.bf16.vlgmr.msra.gmra.mrb[92].mxu1 %v4181_v44  ;;  %v4189_v18 = vsel %vm2562_vm7, %v4156_v27, %v4159_v9  ;;  %v5150_v27 = vld [vmem:[%s9144_s12] ss:$0 sm:$0xff] }
 0x9f6   :  { %5643 = vmatpush3.bf16.msra.mxu0 %v6908_v49  ;;  %5663 = vmatpush3.bf16.msra.mxu1 %v6909_v46  ;;  %v4163_v50 = vpop.permute.xlu1 %4162 }
 0x9f7   :  { %5644 = vmatprep.subr.bf16.mxu0 %v6910_v51  ;;  %v4193_v52 = vsel %vm2562_vm7, %v4160_v45, %v4163_v50  ;;  %5664 = vmatprep.subr.bf16.mxu1 %v6911_v11 }
 0x9f8   :  { %4315 = vmatprep.mubr.bf16.mxu0 %v4193_v52  ;;  %v4167_v12 = vpop.permute.xlu0 %4166 }
 0x9f9   :  { %v4197_v23 = vsel %vm2562_vm7, %v4164_v21, %v4167_v12 }
 0x9fa   :  { %5645 = vmatpush3.bf16.msra.mxu0 %v6912_v38  ;;  %5665 = vmatpush3.bf16.msra.mxu1 %v6913_v39  ;;  %v4171_v14 = vpop.permute.xlu1 %4170 }
 0x9fb   :  { %5646 = vmatprep.subr.bf16.mxu0 %v6914_v53  ;;  %5666 = vmatprep.subr.bf16.mxu1 %v6915_v55  ;;  %v4201_v61 = vsel %vm2562_vm7, %v4168_v13, %v4171_v14 }
 0x9fc   :  { %4355 = vmatprep.mubr.bf16.mxu1 %v4201_v61 }
 0x9fe   :  { %5647 = vmatpush3.bf16.msra.mxu0 %v6916_v62  ;;  %5667 = vmatpush3.bf16.msra.mxu1 %v6917_v63  ;;  %v6723_v62 = vpop.eup %6722 }
 0x9ff   :  { %5648 = vmatprep.subr.bf16.mxu0 %v6918_v0  ;;  %5668 = vmatprep.subr.bf16.mxu1 %v6919_v2  ;;  %v3139_v2 = vpack.c.bf16 %v6723_v62, %v6723_v62 }
 0xa02   :  { %5649 = vmatpush3.bf16.msra.mxu0 %v6920_v1  ;;  %5669 = vmatpush3.bf16.msra.mxu1 %v6921_v47 }
 0xa03   :  { %5650 = vmatprep.subr.bf16.mxu0 %v6922_v3  ;;  %5670 = vmatprep.subr.bf16.mxu1 %v6923_v4  ;;  %v6694_v3 = vld [vmem:[%s9143_s11 + $0x10] sm:$0xff]   ;;  %v6696_v4 = vld [vmem:[%s9143_s11 + $0x20] sm:$0xff]  }
 0xa06   :  { %5651 = vmatpush3.bf16.msra.mxu0 %v6924_v5  ;;  %5671 = vmatpush3.bf16.msra.mxu1 %v6925_v34  ;;  %v6697_v5 = vld [vmem:[%s9143_s11 + $0x28] ss:$0 sps:$4 sm:$0x33]   ;;  %s6966_s11 = smov [#allocation2]  }
 0xa07   :  { %5652 = vmatprep.subr.bf16.mxu0 %v6926_v35  ;;  %5672 = vmatprep.subr.bf16.mxu1 %v6927_v6  ;;  %v4545_v34 = vsel %vm600_vm1, %v6697_v5, 0  ;;  %v5140_v35 = vld [vmem:[%s9142_s10] ss:$0 sm:$0xff]  ;;  %s4594_s17 = sshll.u32 %s6966_s11, 4  ;;  %s4595_s17 = int_to_ptr.vmem [resolvable:$true] %s4594_s17 }
 0xa08   :  { %s6937_s10 = scalar_lea.vmem %s4595_s17, 32  ;;  %p6942_p1 = scmp.lt.s32.totalorder %s4595_s17, %s4595_s17 }
 0xa09   :  { %p6938_p0 = scmp.ne.s32.totalorder %s4595_s17, %s6937_s10  ;;  %p6943_p2 = scmp.lt.s32.totalorder %s6937_s10, %s6937_s10 }
 0xa0a   :  { %5653 = vmatpush3.bf16.msra.mxu0 %v6928_v7  ;;  %5673 = vmatpush3.bf16.msra.mxu1 %v6929_v8 }
 0xa0b   :  { %5654 = vmatprep.subr.bf16.mxu0 %v6930_v10  ;;  %5674 = vmatprep.subr.bf16.mxu1 %v6931_v26  ;;  %p6944_p3 = por %p6943_p2, %p6942_p1 }
 0xa0d   :  { %p6945_p4 = pnand %p6944_p3, %p6938_p0 }
 0xa0e   :  { %5655 = vmatpush3.bf16.msra.mxu0 %v6932_v19  ;;  %5675 = vmatpush3.bf16.msra.mxu1 %v6933_v20 }
 0xa0f   :  { %5676 = vmatprep.subr.bf16.mxu1 %v6934_v17  ;;  %6380 = vmatprep.subr.bf16.mxu0 %v6962_v48 }
 0xa11   :  { %4316 = vmatmul.mubr.bf16.vlgmr.msra.gmra.mrb[96].mxu0 %v4189_v18 }
 0xa12   :  { %5677 = vmatpush3.bf16.msra.mxu1 %v6935_v22  ;;  %6396 = vmatprep.mubr.msk.bf16.mxu0 %vm6964_vm5, %v6962_v48 }
 0xa13   :  { %6400 = vmatprep.subr.bf16.mxu1 %v6962_v48  ;;  %6381 = vmatpush3.bf16.msra.mxu0 %v6684_v56 }
 0xa14   :  { %6382 = vmatprep.subr.bf16.mxu0 %v6962_v48 }
 0xa15   :  { %4356 = vmatmul.mubr.bf16.vlgmr.msra.gmra.mrb[96].mxu1 %v4197_v23 }
 0xa16   :  { %6412 = vmatprep.mubr.msk.bf16.mxu1 %vm6964_vm5, %v6962_v48  ;;  %6401 = vmatpush3.bf16.msra.mxu1 %v6692_v32 }
 0xa17   :  { %6383 = vmatpush3.bf16.msra.mxu0 %v6685_v57  ;;  %6402 = vmatprep.subr.bf16.mxu1 %v6962_v48 }
 0xa18   :  { %6384 = vmatprep.subr.bf16.mxu0 %v6962_v48 }
 0xa1a   :  { %6403 = vmatpush3.bf16.msra.mxu1 %v6693_v40 }
 0xa1b   :  { %6385 = vmatpush3.bf16.msra.mxu0 %v6686_v24  ;;  %6404 = vmatprep.subr.bf16.mxu1 %v6962_v48 }
 0xa1c   :  { %6386 = vmatprep.subr.bf16.mxu0 %v6962_v48 }
 0xa1e   :  { %6405 = vmatpush3.bf16.msra.mxu1 %v6694_v3 }
 0xa1f   :  { %6387 = vmatpush3.bf16.msra.mxu0 %v6687_v28  ;;  %6406 = vmatprep.subr.bf16.mxu1 %v6962_v48 }
 0xa20   :  { %6388 = vmatprep.subr.bf16.mxu0 %v6962_v48 }
 0xa22   :  { %6407 = vmatpush3.bf16.msra.mxu1 %v6695_v25 }
 0xa23   :  { %6389 = vmatpush3.bf16.msra.mxu0 %v6688_v54  ;;  %6408 = vmatprep.subr.bf16.mxu1 %v6962_v48 }
 0xa24   :  { %6390 = vmatprep.subr.bf16.mxu0 %v6962_v48 }
 0xa26   :  { %6409 = vmatpush3.bf16.msra.mxu1 %v6696_v4 }
 0xa27   :  { %6391 = vmatpush3.bf16.msra.mxu0 %v6689_v60  ;;  %6410 = vmatprep.subr.bf16.mxu1 %v6962_v48 }
 0xa28   :  { %6392 = vmatprep.subr.bf16.mxu0 %v6962_v48 }
 0xa2a   :  { %6411 = vmatpush3.bf16.msra.mxu1 %v4545_v34 }
 0xa2b   :  { %6393 = vmatpush3.bf16.msra.mxu0 %v6690_v29 }
 0xa2c   :  { %6394 = vmatprep.subr.bf16.mxu0 %v6962_v48 }
 0xa2f   :  { %6395 = vmatpush3.bf16.msra.mxu0 %v4445_v31 }
 0xac4   :  { %v5612_v33 = vpop.f32.mrb[92].mxu0 }
 0xac5   :  { %v5613_v36 = vpop.f32.mrb[93].mxu0 }
 0xac6   :  { %v5614_v58 = vadd.f32 %v5613_v36, %v5612_v33  ;;  %v5615_v59 = vpop.f32.mrb[94].mxu0 }
 0xac7   :  { %v5616_v37 = vpop.f32.mrb[95].mxu0 }
 0xac8   :  { %v5634_v15 = vpop.f32.mrb[92].mxu1  ;;  %v4238_v42 = vadd.f32 %v6936_v41, %v5614_v58 }
 0xac9   :  { %v5635_v16 = vpop.f32.mrb[93].mxu1 }
 0xaca   :  { %v5636_v43 = vadd.f32 %v5635_v16, %v5634_v15  ;;  %v5637_v44 = vpop.f32.mrb[94].mxu1 }
 0xacb   :  { %v5638_v45 = vpop.f32.mrb[95].mxu1 }
 0xacc   :  { %v4278_v49 = vadd.f32 %v5636_v43, %v4238_v42 }
 0xae4   :  { %v5656_v46 = vpop.f32.mrb[96].mxu0 }
 0xae5   :  { %v5657_v50 = vpop.f32.mrb[97].mxu0 }
 0xae6   :  { %v5658_v51 = vadd.f32 %v5657_v50, %v5656_v46  ;;  %v5659_v52 = vpop.f32.mrb[98].mxu0 }
 0xae7   :  { %v5660_v11 = vpop.f32.mrb[99].mxu0 }
 0xae8   :  { %v4318_v13 = vadd.f32 %v5658_v51, %v4278_v49  ;;  %v5678_v38 = vpop.f32.mrb[96].mxu1 }
 0xae9   :  { %v5679_v39 = vpop.f32.mrb[97].mxu1 }
 0xaea   :  { %v5680_v14 = vadd.f32 %v5679_v39, %v5678_v38  ;;  %v5681_v53 = vpop.f32.mrb[98].mxu1 }
 0xaeb   :  { %v5682_v55 = vpop.f32.mrb[99].mxu1 }
 0xaec   :  { %v4358_v61 = vadd.f32 %v5680_v14, %v4318_v13 }
 0xaee   :  { %6724 = vtanh.f32 %v4358_v61 }
 0xaf8   :  { %v6725_v63 = vpop.eup %6724 }
 0xaf9   :  { %v4364_v0 = vpack.c.bf16 %v6725_v63, %v6725_v63 }
 0xafb   :  { %v4366_v1 = vshll.u32 %v4364_v0, 16 }
 0xafd   :  { %v4372_v47 = vsel %vm4371_vm10, %v3139_v2, %v4366_v1 }
 0xafe   :  { %6397 = vmatmul.mubr.msk.bf16.vlgmr.msra.gmra.mrb[100].mxu0 %vm4440_vm11, %v4372_v47 }
 0xbd1   :  { %v4481_v6 = vpop.f32.mrb[100].mxu0 }
 0xbd2   :  { %v4482_v7 = vadd.f32 %v5140_v35, %v4481_v6  ;;  %v6398_v8 = vpop.f32.mrb[101].mxu0 }
 0xbd3   :  { %v4484_v9 = vpop.f32.mrb[102].mxu0 }
 0xbd4   :  { %6726 = vtanh.f32 %v4482_v7  ;;  %v6399_v10 = vpop.f32.mrb[103].mxu0 }
 0xbde   :  { %v6727_v26 = vpop.eup %6726 }
 0xbdf   :  { %v4488_v48 = vpack.c.bf16 %v6727_v26, %v6727_v26 }
 0xbe1   :  { %6413 = vmatmul.mubr.msk.bf16.vlgmr.msra.gmra.mrb[100].mxu1 %vm4540_vm12, %v4488_v48 }
 0xcb4   :  { %v4581_v19 = vpop.f32.mrb[100].mxu1 }
 0xcb5   :  { %v4582_v20 = vadd.f32 %v5150_v27, %v4581_v19  ;;  %v6414_v17 = vpop.f32.mrb[101].mxu1 }
 0xcb6   :  { %v4584_v18 = vpop.f32.mrb[102].mxu1 }
 0xcb7   :  { %4587 = vst [vmem:[#allocation2] sm:$0x3] %v4582_v20  ;;  %v6415_v12 = vpop.f32.mrb[103].mxu1 }
 0xcb8   :  { %6948 = shalt.err (!%p6945_p4)
}
 0xcb9   :  { %s6949_s12 = scalar_lea.hbm %s9145_s13, 32 }
 0xcba   :  { %p6950_p5 = scmp.ne.s32.totalorder %s9145_s13, %s6949_s12  ;;  %p6953_p6 = scmp.lt.u32.totalorder %s6949_s12, %s9145_s13 }
 0xcbc   :  { %p6955_p7 = pnand %p6953_p6, %p6950_p5 }
 0xcbe   :  { %6958 = shalt.err (!%p6955_p7)
}
 0xcbf   :  { %4597 = dma.vmem_to_hbm [thread:$0]  %s4595_s17, 32, %s9145_s13, [#allocation3]  }
 0xcc0   :  { %6959 = dma.done.wait [#allocation3], 32  }
 0xcc1   :  { %6960 = vsyncadd [#allocation3], 4294967264 }
 0xcc2   :  { %4601 = vsyncpa [#allocation3], 1 }

</bundles_post_ra>
